<compile_context>
chip_gen: v7x
topology: tpu7x:2x2x1
jax: 0.10.0
libtpu: 0.0.40
codegen_flags: <defaults>
</compile_context>

<pallas_src>
import functools

import jax
import jax.numpy as jnp
from jax.experimental import pallas as pl
from jax.experimental.pallas import tpu as pltpu


def _round_up(v, m):
    return ((v + m - 1) // m) * m


def _default_act_dtype():
    """bf16 activations on generations with a bf16 VPU/EUP (v6e, v7x);
    f32 elsewhere (v5e and older have no bf16 vector/transcendental path)."""
    try:
        kind = jax.devices()[0].device_kind.lower()
    except Exception:
        return jnp.float32
    if ("v6" in kind) or ("v7" in kind) or ("7x" in kind):
        return jnp.bfloat16
    return jnp.float32


def _gated_attn_kernel(x_ref, wab_ref, bab_ref, wc_ref, bc_ref, out_ref, *,
                       d, act_dtype):
    # Fused first projection: one MXU pass (bn, L) @ (L, 2D), f32 accumulation,
    # bias added in f32, then the activation path runs in act_dtype.
    pre = jnp.dot(x_ref[...], wab_ref[...],
                  preferred_element_type=jnp.float32)            # (bn, 2D) f32
    pre = (pre + bab_ref[...]).astype(act_dtype)                 # (bn, 2D)

    a = jnp.tanh(pre[:, :d])                                     # (bn, D)
    b = jax.nn.sigmoid(pre[:, d:])                               # (bn, D)
    ab = (a * b).astype(jnp.bfloat16)                            # bf16 MXU operand

    # Epilogue in natural MXU orientation: the big `ab` operand is never
    # transposed. Only the tiny (bn, C_pad) result is XLU-transposed before
    # the lane-dense (C_pad, bn) store (bn multiple of 128 -> unmasked vst).
    res = jnp.dot(ab, wc_ref[...],
                  preferred_element_type=jnp.float32)            # (bn, C_pad) f32
    res = res + bc_ref[...]                                      # (1, C_pad) bcast
    out_ref[...] = res.T.astype(out_ref.dtype)                   # (C_pad, bn)


def attn_net_gated(x, wa, ba, wb, bb, wc, bc, *, block_n=512, act_dtype=None):
    """Gated attention MIL head.

    x:  (N, L) f32        bag of N instances
    wa: (L, D), ba: (D,)  attention_a Linear (weight pre-transposed)
    wb: (L, D), bb: (D,)  attention_b Linear (weight pre-transposed)
    wc: (D, C), bc: (C,)  attention_c Linear (weight pre-transposed)
    Returns (A, x) with A: (N, C) f32, matching the PyTorch module's forward.
    """
    N, L = x.shape
    D = wa.shape[1]
    C = wc.shape[1]

    if act_dtype is None:
        act_dtype = _default_act_dtype()

    # Instance tile size. The lane-dense (C_pad, bn) output block needs bn to
    # be a multiple of 128 unless a single block covers the whole bag. For
    # small bags keep >=2 grid steps so both v7x TensorCores get work.
    if N <= 128:
        bn = N                                     # single block = full bag
    elif block_n >= N:
        bn = max(128, _round_up(pl.cdiv(N, 2), 128))   # >=2 steps (v7x: 2 TCs)
    else:
        bn = max(128, (block_n // 128) * 128)
    grid = (pl.cdiv(N, bn),)

    # Fuse the two (L, D) projections into one (L, 2D) MXU pass; bf16 operands.
    wab = jnp.concatenate([wa, wb], axis=1).astype(jnp.bfloat16)           # (L, 2D)
    bab = jnp.concatenate([ba, bb]).reshape(1, 2 * D).astype(jnp.float32)  # (1, 2D)

    # attention_c weight padded on the class axis to >=8 (sublane alignment of
    # the transposed (C_pad, bn) output). Padded columns are zero, sliced off.
    c_pad = max(8, _round_up(C, 8))
    wcp = jnp.zeros((D, c_pad), jnp.bfloat16).at[:, :C].set(wc.astype(jnp.bfloat16))
    bcp = jnp.zeros((1, c_pad), jnp.float32).at[0, :C].set(bc.astype(jnp.float32))

    x_bf = x.astype(jnp.bfloat16)

    flops = 2 * N * L * (2 * D) + 2 * N * D * c_pad
    transcendentals = 3 * N * D            # tanh + sigmoid (exp + reciprocal)
    bytes_accessed = (x_bf.size * 2 + wab.size * 2 + wcp.size * 2
                      + (bab.size + bcp.size + c_pad * N) * 4)

    a_t = pl.pallas_call(
        functools.partial(_gated_attn_kernel, d=D, act_dtype=act_dtype),
        out_shape=jax.ShapeDtypeStruct((c_pad, N), jnp.float32),
        grid_spec=pltpu.PrefetchScalarGridSpec(
            num_scalar_prefetch=0,
            grid=grid,
            in_specs=[
                pl.BlockSpec((bn, L), lambda i: (i, 0)),       # x tile (streamed)
                # Constant index_map -> weights/biases stay resident in VMEM
                # and are not re-fetched per grid step; only x streams from HBM.
                pl.BlockSpec((L, 2 * D), lambda i: (0, 0)),    # fused Wa|Wb
                pl.BlockSpec((1, 2 * D), lambda i: (0, 0)),    # fused ba|bb
                pl.BlockSpec((D, c_pad), lambda i: (0, 0)),    # Wc (class-padded)
                pl.BlockSpec((1, c_pad), lambda i: (0, 0)),    # bc (class-padded)
            ],
            out_specs=pl.BlockSpec((c_pad, bn), lambda i: (0, i)),
        ),
        compiler_params=pltpu.CompilerParams(
            dimension_semantics=("parallel",),
            # 32 MiB is safe on every generation (incl. v7x's 64 MiB physical
            # VMEM) for these tile sizes; keep <= ~48 MiB on v7x if L/D/block_n
            # are scaled up.
            vmem_limit_bytes=32 * 1024 * 1024,
        ),
        cost_estimate=pl.CostEstimate(
            flops=flops,
            transcendentals=transcendentals,
            bytes_accessed=bytes_accessed,
        ),
    )(x_bf, wab, bab, wcp, bcp)

    A = a_t[:C, :].T                     # back to (N, C), matching the module
    return A, x


def _init_linear(key, in_dim, out_dim):
    """PyTorch-style init U(-1/sqrt(in), 1/sqrt(in)); weight pre-transposed."""
    k_w, k_b = jax.random.split(key)
    bound = 1.0 / jnp.sqrt(in_dim)
    w = jax.random.uniform(k_w, (in_dim, out_dim), jnp.float32, -bound, bound)
    b = jax.random.uniform(k_b, (out_dim,), jnp.float32, -bound, bound)
    return w, b


if __name__ == "__main__":
    # Module defaults: L=1024, D=256, n_classes=1; a small bag of N instances.
    N, L, D, n_classes = 512, 1024, 256, 1

    key = jax.random.PRNGKey(0)
    kx, ka, kb, kc = jax.random.split(key, 4)

    x = jax.random.normal(kx, (N, L), jnp.float32)
    wa, ba = _init_linear(ka, L, D)           # attention_a Linear(L, D)
    wb, bb = _init_linear(kb, L, D)           # attention_b Linear(L, D)
    wc, bc = _init_linear(kc, D, n_classes)   # attention_c Linear(D, n_classes)

    act_dtype = _default_act_dtype()
    A, x_out = attn_net_gated(x, wa, ba, wb, bb, wc, bc)
    jax.block_until_ready((A, x_out))

    # Reference mirrors the kernel's quantization: bf16 MXU operands with f32
    # accumulation, and (on v6e/v7x) bf16-rounded activation inputs/outputs.
    xq = x.astype(jnp.bfloat16).astype(jnp.float32)
    waq = wa.astype(jnp.bfloat16).astype(jnp.float32)
    wbq = wb.astype(jnp.bfloat16).astype(jnp.float32)
    wcq = wc.astype(jnp.bfloat16).astype(jnp.float32)
    hi = jax.lax.Precision.HIGHEST
    pre_a = jnp.dot(xq, waq, precision=hi) + ba
    pre_b = jnp.dot(xq, wbq, precision=hi) + bb
    pre_a = pre_a.astype(act_dtype).astype(jnp.float32)
    pre_b = pre_b.astype(act_dtype).astype(jnp.float32)
    ab_ref = (jnp.tanh(pre_a) * jax.nn.sigmoid(pre_b))
    ab_ref = ab_ref.astype(jnp.bfloat16).astype(jnp.float32)
    A_ref = jnp.dot(ab_ref, wcq, precision=hi) + bc

    # Tight tolerance on the f32-activation path; slightly looser where the
    # kernel evaluates tanh/sigmoid/gating in bf16 (v6e/v7x).
    tol = 1e-2 if act_dtype == jnp.bfloat16 else 2e-3

    assert A.shape == (N, n_classes)
    assert jnp.allclose(A, A_ref, atol=tol, rtol=tol), \
        float(jnp.max(jnp.abs(A - A_ref)))
    assert jnp.array_equal(x_out, x)

    # TODO(synk): the dropout=True variant (nn.Dropout(0.25) in training mode)
    # is not implemented; the module's default config (dropout=False) is.

    print("KERNEL_OK")
</pallas_src>

<mosaic_0001>
module attributes {stable_mosaic.version = 11 : i64} {
  func.func @_gated_attn_kernel(%arg0: i32, %arg1: memref<256x1024xbf16, #tpu.memory_space<vmem>>, %arg2: memref<1024x512xbf16, #tpu.memory_space<vmem>>, %arg3: memref<1x512xf32, #tpu.memory_space<vmem>>, %arg4: memref<256x8xbf16, #tpu.memory_space<vmem>>, %arg5: memref<1x8xf32, #tpu.memory_space<vmem>>, %arg6: memref<8x256xf32, #tpu.memory_space<vmem>>) attributes {dimension_semantics = [#tpu.dimension_semantics<parallel>], iteration_bounds = array<i64: 2>, scalar_prefetch = 0 : i64, scratch_operands = 0 : i64, tpu.core_type = #tpu.core_type<tc>, window_params = [{transform_indices = @transform_0, window_bounds = array<i64: 256, 1024>}, {pipeline_mode = #tpu.pipeline_mode<synchronous>, transform_indices = @transform_1, window_bounds = array<i64: 1024, 512>}, {pipeline_mode = #tpu.pipeline_mode<synchronous>, transform_indices = @transform_2, window_bounds = array<i64: 1, 512>}, {pipeline_mode = #tpu.pipeline_mode<synchronous>, transform_indices = @transform_3, window_bounds = array<i64: 256, 8>}, {pipeline_mode = #tpu.pipeline_mode<synchronous>, transform_indices = @transform_4, window_bounds = array<i64: 1, 8>}, {transform_indices = @transform_5, window_bounds = array<i64: 8, 256>}]} {
    %c0 = arith.constant 0 : index
    %c0_0 = arith.constant 0 : index
    %0 = vector.load %arg1[%c0, %c0_0] : memref<256x1024xbf16, #tpu.memory_space<vmem>>, vector<256x1024xbf16>
    %c0_1 = arith.constant 0 : index
    %c0_2 = arith.constant 0 : index
    %1 = vector.load %arg2[%c0_1, %c0_2] : memref<1024x512xbf16, #tpu.memory_space<vmem>>, vector<1024x512xbf16>
    %cst = arith.constant dense<0.000000e+00> : vector<256x512xf32>
    %2 = tpu.matmul %0, %1, %cst {dimension_numbers = #tpu.dot_dimension_numbers<[1], [0], [0], [1], [0, 0, 1, 1], [], []>} : vector<256x1024xbf16>, vector<1024x512xbf16>, vector<256x512xf32> -> vector<256x512xf32>
    %c0_3 = arith.constant 0 : index
    %c0_4 = arith.constant 0 : index
    %3 = vector.load %arg3[%c0_3, %c0_4] : memref<1x512xf32, #tpu.memory_space<vmem>>, vector<1x512xf32>
    %4 = vector.broadcast %3 : vector<1x512xf32> to vector<256x512xf32>
    %5 = arith.addf %2, %4 : vector<256x512xf32>
    %6 = vector.extract_strided_slice %5 {offsets = [0, 0], sizes = [256, 256], strides = [1, 1]} : vector<256x512xf32> to vector<256x256xf32>
    %7 = math.tanh %6 : vector<256x256xf32>
    %8 = vector.extract_strided_slice %5 {offsets = [0, 256], sizes = [256, 256], strides = [1, 1]} : vector<256x512xf32> to vector<256x256xf32>
    %9 = arith.negf %8 : vector<256x256xf32>
    %10 = math.exp %9 : vector<256x256xf32>
    %cst_5 = arith.constant 1.000000e+00 : f32
    %11 = vector.broadcast %cst_5 : f32 to vector<256x256xf32>
    %12 = arith.addf %11, %10 : vector<256x256xf32>
    %13 = arith.divf %11, %12 : vector<256x256xf32>
    %14 = arith.mulf %7, %13 : vector<256x256xf32>
    %15 = arith.truncf %14 : vector<256x256xf32> to vector<256x256xbf16>
    %c0_6 = arith.constant 0 : index
    %c0_7 = arith.constant 0 : index
    %16 = vector.load %arg4[%c0_6, %c0_7] : memref<256x8xbf16, #tpu.memory_space<vmem>>, vector<256x8xbf16>
    %cst_8 = arith.constant dense<0.000000e+00> : vector<256x8xf32>
    %17 = tpu.matmul %15, %16, %cst_8 {dimension_numbers = #tpu.dot_dimension_numbers<[1], [0], [0], [1], [0, 0, 1, 1], [], []>} : vector<256x256xbf16>, vector<256x8xbf16>, vector<256x8xf32> -> vector<256x8xf32>
    %c0_9 = arith.constant 0 : index
    %c0_10 = arith.constant 0 : index
    %18 = vector.load %arg5[%c0_9, %c0_10] : memref<1x8xf32, #tpu.memory_space<vmem>>, vector<1x8xf32>
    %19 = vector.broadcast %18 : vector<1x8xf32> to vector<256x8xf32>
    %20 = arith.addf %17, %19 : vector<256x8xf32>
    %21 = tpu.transpose %20, [1, 0] : vector<256x8xf32> -> vector<8x256xf32>
    %c0_11 = arith.constant 0 : index
    %c0_12 = arith.constant 0 : index
    %22 = vector.load %arg6[%c0_11, %c0_12] : memref<8x256xf32, #tpu.memory_space<vmem>>, vector<8x256xf32>
    tpu.vector_store %arg6[%c0_11, %c0_12], %21 {strides = array<i32>} : memref<8x256xf32, #tpu.memory_space<vmem>>, vector<8x256xf32>,
    return
  }
  func.func @transform_0(%arg0: i32) -> (i32, i32) {
    %c0_i32 = arith.constant 0 : i32
    %c0_i32_0 = arith.constant 0 : i32
    return %arg0, %c0_i32 : i32, i32
  }
  func.func @transform_1(%arg0: i32) -> (i32, i32) {
    %c0_i32 = arith.constant 0 : i32
    %c0_i32_0 = arith.constant 0 : i32
    %c0_i32_1 = arith.constant 0 : i32
    return %c0_i32, %c0_i32_0 : i32, i32
  }
  func.func @transform_2(%arg0: i32) -> (i32, i32) {
    %c0_i32 = arith.constant 0 : i32
    %c0_i32_0 = arith.constant 0 : i32
    %c0_i32_1 = arith.constant 0 : i32
    return %c0_i32, %c0_i32_0 : i32, i32
  }
  func.func @transform_3(%arg0: i32) -> (i32, i32) {
    %c0_i32 = arith.constant 0 : i32
    %c0_i32_0 = arith.constant 0 : i32
    %c0_i32_1 = arith.constant 0 : i32
    return %c0_i32, %c0_i32_0 : i32, i32
  }
  func.func @transform_4(%arg0: i32) -> (i32, i32) {
    %c0_i32 = arith.constant 0 : i32
    %c0_i32_0 = arith.constant 0 : i32
    %c0_i32_1 = arith.constant 0 : i32
    return %c0_i32, %c0_i32_0 : i32, i32
  }
  func.func @transform_5(%arg0: i32) -> (i32, i32) {
    %c0_i32 = arith.constant 0 : i32
    %c0_i32_0 = arith.constant 0 : i32
    return %c0_i32, %arg0 : i32, i32
  }
}

</mosaic_0001>

<bundles_post_ra>
// kernel: tpu_custom_call.1
= control target key start
LH: loop header
LB: loop body
LE: loop exit
PB: predicated region body
PF: predicated region fallthrough
CT: control target
= control target key end

     0   :  { %10 = vsyncpa [#allocation3], 0  ;;  %s8845_s0 = inlined_call_operand.hbm [shape: bf16[512,1024], index: 0, kind: input, shape index: {}]   ;;  %s8846_s1 = inlined_call_operand.hbm [shape: bf16[1024,512], index: 1, kind: input, shape index: {}]   ;;  %s8847_s2 = inlined_call_operand.vmem [shape: f32[1,512], index: 2, kind: input, shape index: {}]   ;;  %s8848_s3 = inlined_call_operand.vmem [shape: bf16[256,8], index: 3, kind: input, shape index: {}]   ;;  %s8849_s4 = inlined_call_operand.vmem [shape: f32[1,8], index: 4, kind: input, shape index: {}]   ;;  %s8850_s5 = inlined_call_operand.hbm [shape: f32[8,512], index: 5, kind: output, shape index: {}]  }
   0x1   :  { %12 = vsyncpa [#allocation3 + $0x1], 0 }
   0x2   :  { %13 = vsyncpa [#allocation6], 0 }
   0x3   :  { %14 = vsyncpa [#allocation4], 0 }
   0x4   :  { %16 = vsyncpa [#allocation4 + $0x1], 0  ;;  %s7286_s18 = smov 0   ;;  %s7288_s19 = smov 0  }
   0x5   :  { %s7290_s20 = smov 0   ;;  %s7292_s21 = smov 0  }
   0x6 LB: > { %s7307_s22 = sadd.s32 4294967295, %s7247_s21   ;;  %s5133_s23 = sadd.s32 4294967294, %s7247_s21   ;;  %s7247_s21 = sphi %s7292_s21, %s8948_s21   ;;  %s7243_s20 = sphi %s7290_s20, %s8947_s20   ;;  %s7239_s19 = sphi %s7288_s19, %s8946_s19   ;;  %s7235_s18 = sphi %s7286_s18, %s8945_s18  }
   0x7   : > { %p42_p0 = scmp.ne.s32.totalorder %s7239_s19, %s7235_s18  ;;  %p8851_p1 = scmp.eq.s32.totalorder %s7307_s22, 0 }
   0x8   : > { %p156_p3 = scmp.eq.s32.totalorder %s5133_s23, 1  ;;  %p5134_p5 = scmp.ge.s32.totalorder %s7247_s21, 1 }
   0x9   : > { %p7316_p4 = por %p8851_p1, %p42_p0  ;;  %p163_p7 = scmp.lt.s32.totalorder %s7247_s21, 3 }
   0xa   : > { %p7321_p6 = por %p156_p3, %p42_p0  ;;  %s7249_s27 = smov [#allocation5]  }
   0xb   : > { %s8858_s24 = scalar_select %p7316_p4, 1, 0 }
   0xc   : > { %s8859_s25 = scalar_select %p7321_p6, 1, 0 }
   0xd   : > { %p7326_p8 = pnand %p5134_p5, %p163_p7  ;;  %s175_s28 = sshll.u32 %s7249_s27, 4  ;;  %s7330_s28 = int_to_ptr.vmem [resolvable:$true] %s175_s28 }
   0xe   : > { %s7342_s30 = sadd.s32 1, %s7247_s21   ;;  %s29_s6 = sadd.s32 1, %s7243_s20 }
   0xf   : > { %s8860_s26 = scalar_select %p7326_p8, 1, 0 }
  0x10   : > { %p6282_p9 = pneg %p7326_p8  ;;  %s26_s7 = ssub.s32 %s7247_s21, %s7342_s30 }
  0x11   : > { %s7119_s10 = scalar_lea.hbm %s8846_s1, 32768 }
  0x12   : > { %p7337_p11 = pnand %p6282_p9, %p8851_p1  ;;  %p7120_p12 = scmp.ne.s32.totalorder %s8846_s1, %s7119_s10 }
  0x13   : > { %p7126_p5 = scmp.lt.u32.totalorder %s7119_s10, %s8846_s1 }
  0x14   : > { %p7121_p13 = pneg %p7337_p11 }
  0x16   : > { %p7122_p0 = pnand %p7121_p13, %p7120_p12 }
  0x18   : > { %p7123_p3 = pneg %p7122_p0 }
  0x1a   : > { %p7128_p7 = pnand %p7126_p5, %p7123_p3 }
  0x1c   : > { %7131 = shalt.err (!%p7128_p7)
}
  0x1d   : > { %s7132_s15 = scalar_lea.vmem %s7330_s28, 32768  ;;  %p7140_p2 = scmp.lt.s32.totalorder %s7330_s28, %s7330_s28 }
  0x1e   : > { %p7133_p9 = scmp.ne.s32.totalorder %s7330_s28, %s7132_s15  ;;  %p7141_p6 = scmp.lt.s32.totalorder %s7132_s15, %s7132_s15 }
  0x20   : > { %p7135_p10 = pnand %p7133_p9, %p7121_p13  ;;  %p7142_p4 = por %p7141_p6, %p7140_p2 }
  0x22   : > { %p7136_p1 = pneg %p7135_p10 }
  0x24   : > { %p7143_p8 = pnand %p7142_p4, %p7136_p1 }
  0x26   : > { %7146 = shalt.err (!%p7143_p8)
}
  0x27   : > { %s7250_s16 = smov 256   ;;  %s7251_s17 = smov 16  }
  0x28   : > { %6285 = dma.hbm_to_vmem [thread:$0]  (!%p7337_p11), %s8846_s1, 32768, %s7330_s28, [#allocation6], %s7250_s16, %s7250_s16, %s7251_s17  }
  0x29   : > { %p27_p2 = scmp.eq.s32.totalorder %s26_s7, 0  ;;  %p36_p1 = scmp.ne.s32.totalorder %s7243_s20, %s7239_s19 }
  0x2a   : > { %p37_p4 = scmp.eq.s32.totalorder %s7247_s21, 0  ;;  %p6295_p6 = scmp.lt.s32.totalorder %s7247_s21, 2 }
  0x2b   : > { %s7373_s8 = scalar_select %p27_p2, %s7243_s20, %s29_s6  }
  0x2c   : > { %p38_p8 = por %p37_p4, %p36_p1  ;;  %p8862_p10 = scmp.eq.s32.totalorder %s7307_s22, 1 }
  0x2d   : > { %s198_s10 = sand.u32 1, %s7243_s20   ;;  %s5616_s11 = sshll.u32 %s7247_s21, 14 }
  0x2e   : > { %p7377_p12 = por %p8862_p10, %p36_p1  ;;  %s5137_s12 = sshll.u32 %s198_s10, 10 }
  0x2f   : > { %s7386_s14 = scalar_lea.hbm %s8845_s0, %s5616_s11  ;;  %s202_s28 = scalar_lea.vmem [#allocation2], %s5137_s12 }
  0x30   : > { %s210_s6 = sshll.u32 %s202_s28, 4  ;;  %p7388_p11 = pnand %p6295_p6, %p38_p8  ;;  %s7392_s6 = int_to_ptr.vmem [resolvable:$true] %s210_s6 }
  0x31   : > { %s7394_s15 = scalar_lea.sflag [#allocation3], %s198_s10  ;;  %s7147_s16 = scalar_lea.hbm %s7386_s14, 16384 }
  0x32   : > { %p7148_p13 = scmp.ne.s32.totalorder %s7386_s14, %s7147_s16  ;;  %p7149_p0 = pneg %p7388_p11 }
  0x33   : > { %s7152_s27 = scalar_lea.hbm %s8845_s0, 32768  ;;  %p7153_p7 = scmp.lt.u32.totalorder %s7386_s14, %s8845_s0 }
  0x34   : > { %p7150_p3 = pnand %p7149_p0, %p7148_p13  ;;  %p7154_p9 = scmp.lt.u32.totalorder %s7152_s27, %s7147_s16 }
  0x35   : > { %p7156_p1 = scmp.lt.u32.totalorder %s7147_s16, %s7386_s14 }
  0x36   : > { %p7151_p5 = pneg %p7150_p3  ;;  %p7155_p2 = por %p7154_p9, %p7153_p7 }
  0x38   : > { %p7157_p4 = por %p7156_p1, %p7155_p2 }
  0x3a   : > { %p7158_p6 = pnand %p7157_p4, %p7151_p5 }
  0x3c   : > { %7161 = shalt.err (!%p7158_p6)
}
  0x3d   : > { %s7162_s10 = scalar_lea.vmem %s7392_s6, 16384  ;;  %s7252_s29 = smov [#allocation2]  }
  0x3e   : > { %p7163_p8 = scmp.ne.s32.totalorder %s7392_s6, %s7162_s10  ;;  %s7167_s13 = sshll.u32 %s7252_s29, 4  ;;  %s7168_s13 = int_to_ptr.vmem [resolvable:$false] %s7167_s13 }
  0x3f   : > { %s7169_s28 = scalar_lea.vmem %s7168_s13, 32768  ;;  %p7170_p3 = scmp.lt.s32.totalorder %s7392_s6, %s7168_s13 }
  0x40   : > { %p7165_p10 = pnand %p7163_p8, %p7149_p0  ;;  %p7171_p7 = scmp.lt.s32.totalorder %s7169_s28, %s7162_s10 }
  0x42   : > { %p7166_p13 = pneg %p7165_p10  ;;  %p7172_p9 = por %p7171_p7, %p7170_p3 }
  0x44   : > { %p7173_p2 = pnand %p7172_p9, %p7166_p13 }
  0x46   : > { %7176 = shalt.err (!%p7173_p2)
}
  0x47   : > { %s7253_s16 = smov 512   ;;  %s7254_s17 = smov 32  }
  0x48   : > { %6289 = dma.hbm_to_vmem [thread:$0]  (!%p7388_p11), %s7386_s14, 16384, %s7392_s6, %s7394_s15, %s7253_s16, %s7253_s16, %s7254_s17  }
  0x49   : > { %p8865_p0 = scmp.ne.s32.totalorder %s8860_s26, 0 }
  0x4b   : > { %222 = sbr.rel (%p8865_p0) target bundleno = 1280 (0x500), region = 40 }
  0x52   : > { %s7425_s23 = sand.u32 1, %s7239_s19   ;;  %p8866_p5 = scmp.ne.s32.totalorder %s8858_s24, 0 }
  0x53   : > { %s5142_s27 = sshll.u32 %s7425_s23, 10  ;;  %s225_s11 = scalar_lea.sflag [#allocation3], %s7425_s23 }
  0x54   : > { %s7429_s12 = scalar_lea.vmem [#allocation2], %s5142_s27 }
  0x55   : > { %7222 = dma.done.wait (%p8866_p5), %s225_s11, 16384  }
  0x56   : > { %7224 = vsyncadd (%p8866_p5), %s225_s11, 4294950912  ;;  %p8867_p11 = scmp.eq.s32.totalorder %s7307_s22, 0 }
  0x58   : > { %7226 = dma.done.wait (%p8867_p11), [#allocation6], 32768   ;;  %p8868_p1 = pmov %p8867_p11 }
  0x59   : > { %v6335_v0 = vld [vmem:[#allocation5 + $0x4] ss:$16 sps:$4 sm:$0xff]   ;;  %v6337_v1 = vld [vmem:[#allocation5] ss:$16 sps:$4 sm:$0xff]   ;;  %v6388_v39 = vld [vmem:[#allocation5 + $0xc] ss:$16 sps:$4 sm:$0xff]  }
  0x5a   : > { %7228 = vsyncadd (%p8868_p1), [#allocation6], 4294934528  ;;  %2588 = vmatprep.subr.bf16.mxu0 %v6335_v0  ;;  %5730 = vmatprep.subr.bf16.mxu1 %v6335_v0  ;;  %v6338_v2 = vld [vmem:[#allocation5 + $0x24] ss:$16 sps:$4 sm:$0xff]   ;;  %v6340_v3 = vld [vmem:[#allocation5 + $0x20] ss:$16 sps:$4 sm:$0xff]  }
  0x5b   : > { %2589 = vmatpush1.bf16.msra.mxu0 %v6337_v1  ;;  %5746 = vmatpush1.bf16.msra.mxu1 %v6337_v1  ;;  %v6341_v4 = vld [vmem:[#allocation5 + $0x44] ss:$16 sps:$4 sm:$0xff]   ;;  %v6343_v5 = vld [vmem:[#allocation5 + $0x40] ss:$16 sps:$4 sm:$0xff]   ;;  %v6386_v47 = vld [vmem:[#allocation5 + $0x8] ss:$16 sps:$4 sm:$0xff]  }
  0x5c   : > { %2590 = vmatprep.subr.bf16.mxu0 %v6338_v2  ;;  %5731 = vmatprep.subr.bf16.mxu1 %v6338_v2  ;;  %v6344_v6 = vld [vmem:[#allocation5 + $0x64] ss:$16 sps:$4 sm:$0xff]   ;;  %v6346_v7 = vld [vmem:[#allocation5 + $0x60] ss:$16 sps:$4 sm:$0xff]   ;;  %v6394_v49 = vld [vmem:[#allocation5 + $0x2c] ss:$16 sps:$4 sm:$0xff]  }
  0x5d   : > { %v6347_v8 = vld [vmem:[#allocation5 + $0x84] ss:$16 sps:$4 sm:$0xff]   ;;  %v6349_v9 = vld [vmem:[#allocation5 + $0x80] ss:$16 sps:$4 sm:$0xff]   ;;  %v6392_v53 = vld [vmem:[#allocation5 + $0x28] ss:$16 sps:$4 sm:$0xff]  }
  0x5e   : > { %v6350_v10 = vld [vmem:[#allocation5 + $0xa4] ss:$16 sps:$4 sm:$0xff]   ;;  %v6352_v11 = vld [vmem:[#allocation5 + $0xa0] ss:$16 sps:$4 sm:$0xff]   ;;  %v6400_v55 = vld [vmem:[#allocation5 + $0x4c] ss:$16 sps:$4 sm:$0xff]  }
  0x5f   : > { %2591 = vmatpush1.bf16.msra.mxu0 %v6340_v3  ;;  %5747 = vmatpush1.bf16.msra.mxu1 %v6340_v3  ;;  %v6353_v12 = vld [vmem:[#allocation5 + $0xc4] ss:$16 sps:$4 sm:$0xff]   ;;  %v6355_v18 = vld [vmem:[#allocation5 + $0xc0] ss:$16 sps:$4 sm:$0xff]   ;;  %v6398_v63 = vld [vmem:[#allocation5 + $0x48] ss:$16 sps:$4 sm:$0xff]  }
  0x60   : > { %2592 = vmatprep.subr.bf16.mxu0 %v6341_v4  ;;  %5732 = vmatprep.subr.bf16.mxu1 %v6341_v4  ;;  %v7440_v13 = vld [vmem:[%s7429_s12] sm:$0xff]  ;;  %v6406_v1 = vld [vmem:[#allocation5 + $0x6c] ss:$16 sps:$4 sm:$0xff]   ;;  %s5144_s10 = sshll.u32 %s7425_s23, 4  ;;  %s5617_s28 = sshll.u32 %s7307_s22, 8 }
  0x61   : > { %v7443_v14 = vld [vmem:[%s7429_s12 + $0x20] sm:$0xff]  ;;  %s258_s29 = scalar_lea.vmem [#allocation7], %s5144_s10  ;;  %s8803_s27 = scalar_lea.hbm %s8850_s5, %s5617_s28 }
  0x62   : > { %v7447_v15 = vcombine.high %v7440_v13, %v7443_v14  ;;  %v7450_v16 = vld [vmem:[%s7429_s12 + $0x200] sm:$0xff]  ;;  %v7465_v43 = vcombine.low %v7440_v13, %v7443_v14  ;;  %s5053_s13 = sshll.u32 %s258_s29, 4  ;;  %s5039_s11 = scalar_lea.sflag [#allocation4], %s7425_s23  ;;  %s8798_s13 = int_to_ptr.vmem [resolvable:$true] %s5053_s13 }
  0x63   : > { %2593 = vmatpush1.bf16.msra.mxu0 %v6343_v5  ;;  %5748 = vmatpush1.bf16.msra.mxu1 %v6343_v5  ;;  %v7453_v17 = vld [vmem:[%s7429_s12 + $0x220] sm:$0xff]  ;;  %v6404_v5 = vld [vmem:[#allocation5 + $0x68] ss:$16 sps:$4 sm:$0xff]   ;;  %s7255_s24 = smov [#allocation7]  }
  0x64   : > { %2594 = vmatprep.subr.bf16.mxu0 %v6344_v6  ;;  %5733 = vmatprep.subr.bf16.mxu1 %v6344_v6  ;;  %v7457_v19 = vcombine.high %v7450_v16, %v7453_v17  ;;  %v6356_v20 = vld [vmem:[#allocation5 + $0xe4] ss:$16 sps:$4 sm:$0xff]   ;;  %v6358_v21 = vld [vmem:[#allocation5 + $0xe0] ss:$16 sps:$4 sm:$0xff]   ;;  %v7469_v44 = vcombine.low %v7450_v16, %v7453_v17  ;;  %v6410_v16 = vld [vmem:[#allocation5 + $0x88] ss:$16 sps:$4 sm:$0xff]  }
  0x65   : > { %2620 = vmatprep.mubr.bf16.mxu0 %v7447_v15  ;;  %v6359_v22 = vld [vmem:[#allocation5 + $0x104] ss:$16 sps:$4 sm:$0xff]   ;;  %v6361_v23 = vld [vmem:[#allocation5 + $0x100] ss:$16 sps:$4 sm:$0xff]   ;;  %s7181_s22 = sshll.u32 %s7255_s24, 4  ;;  %s7182_s22 = int_to_ptr.vmem [resolvable:$false] %s7181_s22 }
  0x66   : > { %2700 = vmatprep.mubr.bf16.mxu1 %v7457_v19  ;;  %v6362_v24 = vld [vmem:[#allocation5 + $0x124] ss:$16 sps:$4 sm:$0xff]   ;;  %v6364_v25 = vld [vmem:[#allocation5 + $0x120] ss:$16 sps:$4 sm:$0xff]   ;;  %s7183_s26 = scalar_lea.vmem %s7182_s22, 512  ;;  %p7184_p10 = scmp.lt.s32.totalorder %s8798_s13, %s7182_s22 }
  0x67   : > { %2595 = vmatpush1.bf16.msra.mxu0 %v6346_v7  ;;  %5749 = vmatpush1.bf16.msra.mxu1 %v6346_v7  ;;  %v6365_v26 = vld [vmem:[#allocation5 + $0x144] ss:$16 sps:$4 sm:$0xff]   ;;  %v6367_v27 = vld [vmem:[#allocation5 + $0x140] ss:$16 sps:$4 sm:$0xff]   ;;  %v6412_v7 = vld [vmem:[#allocation5 + $0x8c] ss:$16 sps:$4 sm:$0xff]  }
  0x68   : > { %2596 = vmatprep.subr.bf16.mxu0 %v6347_v8  ;;  %5734 = vmatprep.subr.bf16.mxu1 %v6347_v8  ;;  %v6368_v28 = vld [vmem:[#allocation5 + $0x164] ss:$16 sps:$4 sm:$0xff]   ;;  %v6370_v29 = vld [vmem:[#allocation5 + $0x160] ss:$16 sps:$4 sm:$0xff]  }
  0x69   : > { %v6371_v30 = vld [vmem:[#allocation5 + $0x184] ss:$16 sps:$4 sm:$0xff]   ;;  %v6373_v31 = vld [vmem:[#allocation5 + $0x180] ss:$16 sps:$4 sm:$0xff]  }
  0x6a   : > { %v6374_v32 = vld [vmem:[#allocation5 + $0x1a4] ss:$16 sps:$4 sm:$0xff]   ;;  %v6376_v33 = vld [vmem:[#allocation5 + $0x1a0] ss:$16 sps:$4 sm:$0xff]  }
  0x6b   : > { %2597 = vmatpush1.bf16.msra.mxu0 %v6349_v9  ;;  %5750 = vmatpush1.bf16.msra.mxu1 %v6349_v9  ;;  %v6377_v34 = vld [vmem:[#allocation5 + $0x1c4] ss:$16 sps:$4 sm:$0xff]   ;;  %v6379_v35 = vld [vmem:[#allocation5 + $0x1c0] ss:$16 sps:$4 sm:$0xff]  }
  0x6c   : > { %2598 = vmatprep.subr.bf16.mxu0 %v6350_v10  ;;  %5735 = vmatprep.subr.bf16.mxu1 %v6350_v10  ;;  %v6380_v36 = vld [vmem:[#allocation5 + $0x1e4] ss:$16 sps:$4 sm:$0xff]   ;;  %v6382_v37 = vld [vmem:[#allocation5 + $0x1e0] ss:$16 sps:$4 sm:$0xff]  }
  0x6d   : > { %v6385_v38 = vld [vmem:[#allocation5 + $0x204] ss:$16 sps:$4 sm:$0xff]   ;;  %v6383_v40 = vld [vmem:[#allocation5 + $0x200] ss:$16 sps:$4 sm:$0xff]  }
  0x6e   : > { %v270_v41 = vld [vmem:[%s7429_s12 + $0x40] sm:$0xff] }
  0x6f   : > { %2599 = vmatpush1.bf16.msra.mxu0 %v6352_v11  ;;  %5751 = vmatpush1.bf16.msra.mxu1 %v6352_v11  ;;  %v274_v42 = vld [vmem:[%s7429_s12 + $0x60] sm:$0xff] }
  0x70   : > { %2600 = vmatprep.subr.bf16.mxu0 %v6353_v12  ;;  %5736 = vmatprep.subr.bf16.mxu1 %v6353_v12  ;;  %v334_v45 = vld [vmem:[%s7429_s12 + $0x240] sm:$0xff]  ;;  %v7473_v50 = vcombine.high %v270_v41, %v274_v42  ;;  %v7483_v59 = vcombine.low %v270_v41, %v274_v42  ;;  %v6436_v41 = vld [vmem:[#allocation5 + $0x10c] ss:$16 sps:$4 sm:$0xff]  }
  0x71   : > { %v338_v46 = vld [vmem:[%s7429_s12 + $0x260] sm:$0xff] }
  0x72   : > { %v6391_v48 = vld [vmem:[#allocation5 + $0x224] ss:$16 sps:$4 sm:$0xff]   ;;  %v7475_v51 = vcombine.high %v334_v45, %v338_v46  ;;  %v6389_v52 = vld [vmem:[#allocation5 + $0x220] ss:$16 sps:$4 sm:$0xff]   ;;  %v7485_v60 = vcombine.low %v334_v45, %v338_v46 }
  0x73   : > { %2601 = vmatpush1.bf16.msra.mxu0 %v6355_v18  ;;  %5752 = vmatpush1.bf16.msra.mxu1 %v6355_v18  ;;  %v6397_v54 = vld [vmem:[#allocation5 + $0x244] ss:$16 sps:$4 sm:$0xff]   ;;  %v6395_v57 = vld [vmem:[#allocation5 + $0x240] ss:$16 sps:$4 sm:$0xff]   ;;  %v6418_v18 = vld [vmem:[#allocation5 + $0xac] ss:$16 sps:$4 sm:$0xff]  }
  0x74   : > { %2602 = vmatprep.subr.bf16.mxu0 %v6356_v20  ;;  %5737 = vmatprep.subr.bf16.mxu1 %v6356_v20  ;;  %v278_v56 = vld [vmem:[%s7429_s12 + $0x80] sm:$0xff] }
  0x75   : > { %v282_v58 = vld [vmem:[%s7429_s12 + $0xa0] sm:$0xff] }
  0x76   : > { %v342_v61 = vld [vmem:[%s7429_s12 + $0x280] sm:$0xff]  ;;  %v7489_v2 = vcombine.high %v278_v56, %v282_v58  ;;  %v7498_v10 = vcombine.low %v278_v56, %v282_v58 }
  0x77   : > { %2603 = vmatpush1.bf16.msra.mxu0 %v6358_v21  ;;  %5753 = vmatpush1.bf16.msra.mxu1 %v6358_v21  ;;  %v346_v62 = vld [vmem:[%s7429_s12 + $0x2a0] sm:$0xff] }
  0x78   : > { %2604 = vmatprep.subr.bf16.mxu0 %v6359_v22  ;;  %5738 = vmatprep.subr.bf16.mxu1 %v6359_v22  ;;  %v6403_v0 = vld [vmem:[#allocation5 + $0x264] ss:$16 sps:$4 sm:$0xff]   ;;  %v7491_v3 = vcombine.high %v342_v61, %v346_v62  ;;  %v6401_v4 = vld [vmem:[#allocation5 + $0x260] ss:$16 sps:$4 sm:$0xff]   ;;  %v7500_v11 = vcombine.low %v342_v61, %v346_v62  ;;  %v6440_v61 = vld [vmem:[#allocation5 + $0x128] ss:$16 sps:$4 sm:$0xff]  }
  0x79   : > { %v6409_v6 = vld [vmem:[#allocation5 + $0x284] ss:$16 sps:$4 sm:$0xff]   ;;  %v6407_v8 = vld [vmem:[#allocation5 + $0x280] ss:$16 sps:$4 sm:$0xff]  }
  0x7a   : > { %v286_v9 = vld [vmem:[%s7429_s12 + $0xc0] sm:$0xff] }
  0x7b   : > { %2605 = vmatpush1.bf16.msra.mxu0 %v6361_v23  ;;  %5754 = vmatpush1.bf16.msra.mxu1 %v6361_v23  ;;  %v290_v12 = vld [vmem:[%s7429_s12 + $0xe0] sm:$0xff]  ;;  %v6416_v23 = vld [vmem:[#allocation5 + $0xa8] ss:$16 sps:$4 sm:$0xff]  }
  0x7c   : > { %2606 = vmatprep.subr.bf16.mxu0 %v6362_v24  ;;  %5739 = vmatprep.subr.bf16.mxu1 %v6362_v24  ;;  %v350_v13 = vld [vmem:[%s7429_s12 + $0x2c0] sm:$0xff]  ;;  %v7505_v20 = vcombine.high %v286_v9, %v290_v12 }
  0x7d   : > { %v354_v14 = vld [vmem:[%s7429_s12 + $0x2e0] sm:$0xff] }
  0x7e   : > { %v6415_v17 = vld [vmem:[#allocation5 + $0x2a4] ss:$16 sps:$4 sm:$0xff]   ;;  %v7507_v21 = vcombine.high %v350_v13, %v354_v14  ;;  %v6413_v22 = vld [vmem:[#allocation5 + $0x2a0] ss:$16 sps:$4 sm:$0xff]  }
  0x7f   : > { %2607 = vmatpush1.bf16.msra.mxu0 %v6364_v25  ;;  %5755 = vmatpush1.bf16.msra.mxu1 %v6364_v25  ;;  %v6421_v24 = vld [vmem:[#allocation5 + $0x2c4] ss:$16 sps:$4 sm:$0xff]   ;;  %v6424_v25 = vld [vmem:[#allocation5 + $0xcc] ss:$16 sps:$4 sm:$0xff]   ;;  %v6437_v58 = vld [vmem:[#allocation5 + $0x320] ss:$16 sps:$4 sm:$0xff]  }
  0x80   : > { %2608 = vmatprep.subr.bf16.mxu0 %v6365_v26  ;;  %5740 = vmatprep.subr.bf16.mxu1 %v6365_v26  ;;  %v6419_v26 = vld [vmem:[#allocation5 + $0x2c0] ss:$16 sps:$4 sm:$0xff]   ;;  %v6445_v62 = vld [vmem:[#allocation5 + $0x344] ss:$16 sps:$4 sm:$0xff]  }
  0x81   : > { %v302_v42 = vld [vmem:[%s7429_s12 + $0x140] sm:$0xff] }
  0x82   : > { %v306_v45 = vld [vmem:[%s7429_s12 + $0x160] sm:$0xff] }
  0x83   : > { %2609 = vmatpush1.bf16.msra.mxu0 %v6367_v27  ;;  %5756 = vmatpush1.bf16.msra.mxu1 %v6367_v27  ;;  %v294_v27 = vld [vmem:[%s7429_s12 + $0x100] sm:$0xff]  ;;  %v7537_v56 = vcombine.high %v302_v42, %v306_v45 }
  0x84   : > { %2610 = vmatprep.subr.bf16.mxu0 %v6368_v28  ;;  %5741 = vmatprep.subr.bf16.mxu1 %v6368_v28  ;;  %v7514_v28 = vcombine.low %v286_v9, %v290_v12  ;;  %v366_v46 = vld [vmem:[%s7429_s12 + $0x340] sm:$0xff]  ;;  %v6446_v9 = vld [vmem:[#allocation5 + $0x148] ss:$16 sps:$4 sm:$0xff]  }
  0x85   : > { %v6451_v12 = vld [vmem:[#allocation5 + $0x364] ss:$16 sps:$4 sm:$0xff]  }
  0x87   : > { %2611 = vmatpush1.bf16.msra.mxu0 %v6370_v29  ;;  %5757 = vmatpush1.bf16.msra.mxu1 %v6370_v29  ;;  %v7516_v29 = vcombine.low %v350_v13, %v354_v14  ;;  %v6454_v13 = vld [vmem:[#allocation5 + $0x16c] ss:$16 sps:$4 sm:$0xff]  }
  0x88   : > { %2612 = vmatprep.subr.bf16.mxu0 %v6371_v30  ;;  %5742 = vmatprep.subr.bf16.mxu1 %v6371_v30  ;;  %v298_v30 = vld [vmem:[%s7429_s12 + $0x120] sm:$0xff] }
  0x8b   : > { %2613 = vmatpush1.bf16.msra.mxu0 %v6373_v31  ;;  %5758 = vmatpush1.bf16.msra.mxu1 %v6373_v31  ;;  %v358_v31 = vld [vmem:[%s7429_s12 + $0x300] sm:$0xff] }
  0x8c   : > { %2614 = vmatprep.subr.bf16.mxu0 %v6374_v32  ;;  %5743 = vmatprep.subr.bf16.mxu1 %v6374_v32  ;;  %v362_v32 = vld [vmem:[%s7429_s12 + $0x320] sm:$0xff] }
  0x8f   : > { %2615 = vmatpush1.bf16.msra.mxu0 %v6376_v33  ;;  %5759 = vmatpush1.bf16.msra.mxu1 %v6376_v33  ;;  %v6422_v33 = vld [vmem:[#allocation5 + $0xc8] ss:$16 sps:$4 sm:$0xff]  }
  0x90   : > { %2616 = vmatprep.subr.bf16.mxu0 %v6377_v34  ;;  %5744 = vmatprep.subr.bf16.mxu1 %v6377_v34  ;;  %v6427_v34 = vld [vmem:[#allocation5 + $0x2e4] ss:$16 sps:$4 sm:$0xff]  }
  0x93   : > { %2617 = vmatpush1.bf16.msra.mxu0 %v6379_v35  ;;  %5760 = vmatpush1.bf16.msra.mxu1 %v6379_v35  ;;  %v6430_v35 = vld [vmem:[#allocation5 + $0xec] ss:$16 sps:$4 sm:$0xff]  }
  0x94   : > { %2618 = vmatprep.subr.bf16.mxu0 %v6380_v36  ;;  %5745 = vmatprep.subr.bf16.mxu1 %v6380_v36  ;;  %v7521_v36 = vcombine.high %v294_v27, %v298_v30 }
  0x97   : > { %2619 = vmatpush1.bf16.msra.mxu0 %v6382_v37  ;;  %5761 = vmatpush1.bf16.msra.mxu1 %v6382_v37  ;;  %v7523_v37 = vcombine.high %v358_v31, %v362_v32 }
  0x98   : > { %2781 = vmatprep.subr.bf16.mxu0 %v6385_v38  ;;  %3360 = vmatprep.subr.bf16.mxu1 %v6388_v39  ;;  %v6425_v38 = vld [vmem:[#allocation5 + $0x2e0] ss:$16 sps:$4 sm:$0xff]   ;;  %v6428_v39 = vld [vmem:[#allocation5 + $0xe8] ss:$16 sps:$4 sm:$0xff]  }
  0x9a   : > { %2621 = vmatmul.mubr.bf16.vlgmr.msra.gmra.mrb[0].mxu0 %v7465_v43  ;;  %2701 = vmatmul.mubr.bf16.vlgmr.msra.gmra.mrb[0].mxu1 %v7469_v44 }
  0x9b   : > { %2782 = vmatpush1.bf16.msra.mxu0 %v6383_v40  ;;  %3361 = vmatpush1.bf16.msra.mxu1 %v6386_v47  ;;  %v6433_v40 = vld [vmem:[#allocation5 + $0x304] ss:$16 sps:$4 sm:$0xff]   ;;  %v7532_v47 = vcombine.low %v294_v27, %v298_v30 }
  0x9c   : > { %2783 = vmatprep.subr.bf16.mxu0 %v6391_v48  ;;  %3362 = vmatprep.subr.bf16.mxu1 %v6394_v49  ;;  %v7534_v48 = vcombine.low %v358_v31, %v362_v32  ;;  %v370_v49 = vld [vmem:[%s7429_s12 + $0x360] sm:$0xff] }
  0x9d   : > { %2630 = vmatprep.mubr.bf16.mxu0 %v7473_v50  ;;  %2710 = vmatprep.mubr.bf16.mxu1 %v7475_v51  ;;  %v382_v27 = vld [vmem:[%s7429_s12 + $0x3c0] sm:$0xff] }
  0x9e   : > { %v386_v32 = vld [vmem:[%s7429_s12 + $0x3e0] sm:$0xff] }
  0x9f   : > { %2784 = vmatpush1.bf16.msra.mxu0 %v6389_v52  ;;  %3363 = vmatpush1.bf16.msra.mxu1 %v6392_v53  ;;  %v6431_v52 = vld [vmem:[#allocation5 + $0x300] ss:$16 sps:$4 sm:$0xff]   ;;  %v6434_v53 = vld [vmem:[#allocation5 + $0x108] ss:$16 sps:$4 sm:$0xff]  }
  0xa0   : > { %2785 = vmatprep.subr.bf16.mxu0 %v6397_v54  ;;  %3364 = vmatprep.subr.bf16.mxu1 %v6400_v55  ;;  %v6439_v54 = vld [vmem:[#allocation5 + $0x324] ss:$16 sps:$4 sm:$0xff]   ;;  %v6442_v55 = vld [vmem:[#allocation5 + $0x12c] ss:$16 sps:$4 sm:$0xff]  }
  0xa2   : > { %2631 = vmatmul.mubr.bf16.gmra.mrb[4].mxu0 %v7483_v59  ;;  %2711 = vmatmul.mubr.bf16.gmra.mrb[4].mxu1 %v7485_v60 }
  0xa3   : > { %2786 = vmatpush1.bf16.msra.mxu0 %v6395_v57  ;;  %3365 = vmatpush1.bf16.msra.mxu1 %v6398_v63  ;;  %v7539_v57 = vcombine.high %v366_v46, %v370_v49  ;;  %v6448_v63 = vld [vmem:[#allocation5 + $0x14c] ss:$16 sps:$4 sm:$0xff]  }
  0xa4   : > { %2787 = vmatprep.subr.bf16.mxu0 %v6403_v0  ;;  %3366 = vmatprep.subr.bf16.mxu1 %v6406_v1  ;;  %v310_v0 = vld [vmem:[%s7429_s12 + $0x180] sm:$0xff] }
  0xa5   : > { %2640 = vmatprep.mubr.bf16.mxu0 %v7489_v2  ;;  %2720 = vmatprep.mubr.bf16.mxu1 %v7491_v3  ;;  %v6443_v1 = vld [vmem:[#allocation5 + $0x340] ss:$16 sps:$4 sm:$0xff]  }
  0xa7   : > { %2788 = vmatpush1.bf16.msra.mxu0 %v6401_v4  ;;  %3367 = vmatpush1.bf16.msra.mxu1 %v6404_v5  ;;  %v314_v4 = vld [vmem:[%s7429_s12 + $0x1a0] sm:$0xff] }
  0xa8   : > { %2789 = vmatprep.subr.bf16.mxu0 %v6409_v6  ;;  %3368 = vmatprep.subr.bf16.mxu1 %v6412_v7  ;;  %v374_v5 = vld [vmem:[%s7429_s12 + $0x380] sm:$0xff]  ;;  %v7548_v6 = vcombine.low %v302_v42, %v306_v45  ;;  %v7550_v7 = vcombine.low %v366_v46, %v370_v49  ;;  %v7553_v14 = vcombine.high %v310_v0, %v314_v4  ;;  %v6472_v45 = vld [vmem:[#allocation5 + $0x1cc] ss:$16 sps:$4 sm:$0xff]  }
  0xa9   : > { %v7564_v30 = vcombine.low %v310_v0, %v314_v4  ;;  %v6469_v42 = vld [vmem:[#allocation5 + $0x3c4] ss:$16 sps:$4 sm:$0xff]   ;;  %v7579_v49 = vcombine.low %v382_v27, %v386_v32  ;;  %v6476_v0 = vld [vmem:[#allocation5 + $0x1e8] ss:$16 sps:$4 sm:$0xff]  }
  0xaa   : > { %2641 = vmatmul.mubr.bf16.gmra.mrb[8].mxu0 %v7498_v10  ;;  %2721 = vmatmul.mubr.bf16.gmra.mrb[8].mxu1 %v7500_v11  ;;  %v271_v4 = vld [vmem:[%s7429_s12 + $0x48] sm:$0xff] }
  0xab   : > { %2790 = vmatpush1.bf16.msra.mxu0 %v6407_v8  ;;  %3369 = vmatpush1.bf16.msra.mxu1 %v6410_v16  ;;  %v378_v8 = vld [vmem:[%s7429_s12 + $0x3a0] sm:$0xff] }
  0xac   : > { %2791 = vmatprep.subr.bf16.mxu0 %v6415_v17  ;;  %3370 = vmatprep.subr.bf16.mxu1 %v6418_v18  ;;  %v7555_v16 = vcombine.high %v374_v5, %v378_v8  ;;  %v6449_v17 = vld [vmem:[#allocation5 + $0x360] ss:$16 sps:$4 sm:$0xff]   ;;  %v6452_v18 = vld [vmem:[#allocation5 + $0x168] ss:$16 sps:$4 sm:$0xff]   ;;  %v7566_v31 = vcombine.low %v374_v5, %v378_v8  ;;  %v6505_v8 = vld [vmem:[#allocation5 + $0x404] ss:$16 sps:$4 sm:$0xff]  }
  0xad   : > { %2650 = vmatprep.mubr.bf16.mxu0 %v7505_v20  ;;  %2730 = vmatprep.mubr.bf16.mxu1 %v7507_v21  ;;  %v275_v5 = vld [vmem:[%s7429_s12 + $0x68] sm:$0xff] }
  0xaf   : > { %2792 = vmatpush1.bf16.msra.mxu0 %v6413_v22  ;;  %3371 = vmatpush1.bf16.msra.mxu1 %v6416_v23  ;;  %v6457_v22 = vld [vmem:[#allocation5 + $0x384] ss:$16 sps:$4 sm:$0xff]   ;;  %v6460_v23 = vld [vmem:[#allocation5 + $0x18c] ss:$16 sps:$4 sm:$0xff]  }
  0xb0   : > { %2793 = vmatprep.subr.bf16.mxu0 %v6421_v24  ;;  %3372 = vmatprep.subr.bf16.mxu1 %v6424_v25  ;;  %v6455_v24 = vld [vmem:[#allocation5 + $0x380] ss:$16 sps:$4 sm:$0xff]  }
  0xb1   : > { %v318_v25 = vld [vmem:[%s7429_s12 + $0x1c0] sm:$0xff] }
  0xb2   : > { %2651 = vmatmul.mubr.bf16.gmra.mrb[12].mxu0 %v7514_v28  ;;  %2731 = vmatmul.mubr.bf16.gmra.mrb[12].mxu1 %v7516_v29 }
  0xb3   : > { %2794 = vmatpush1.bf16.msra.mxu0 %v6419_v26  ;;  %3373 = vmatpush1.bf16.msra.mxu1 %v6422_v33  ;;  %v322_v26 = vld [vmem:[%s7429_s12 + $0x1e0] sm:$0xff]  ;;  %v6458_v33 = vld [vmem:[#allocation5 + $0x188] ss:$16 sps:$4 sm:$0xff]  }
  0xb4   : > { %2795 = vmatprep.subr.bf16.mxu0 %v6427_v34  ;;  %3374 = vmatprep.subr.bf16.mxu1 %v6430_v35  ;;  %v6463_v34 = vld [vmem:[#allocation5 + $0x3a4] ss:$16 sps:$4 sm:$0xff]   ;;  %v6466_v35 = vld [vmem:[#allocation5 + $0x1ac] ss:$16 sps:$4 sm:$0xff]   ;;  %v7577_v46 = vcombine.low %v318_v25, %v322_v26 }
  0xb5   : > { %2660 = vmatprep.mubr.bf16.mxu0 %v7521_v36  ;;  %2740 = vmatprep.mubr.bf16.mxu1 %v7523_v37 }
  0xb7   : > { %2796 = vmatpush1.bf16.msra.mxu0 %v6425_v38  ;;  %3375 = vmatpush1.bf16.msra.mxu1 %v6428_v39  ;;  %v7569_v38 = vcombine.high %v318_v25, %v322_v26  ;;  %v7571_v39 = vcombine.high %v382_v27, %v386_v32  ;;  %v6511_v25 = vld [vmem:[#allocation5 + $0x424] ss:$16 sps:$4 sm:$0xff]   ;;  %v6509_v26 = vld [vmem:[#allocation5 + $0x420] ss:$16 sps:$4 sm:$0xff]   ;;  %v7601_v27 = vcombine.low %v271_v4, %v275_v5  ;;  %v6485_v32 = vld [vmem:[#allocation5 + $0x248] ss:$16 sps:$4 sm:$0xff]  }
  0xb8   : > { %2797 = vmatprep.subr.bf16.mxu0 %v6433_v40  ;;  %3376 = vmatprep.subr.bf16.mxu1 %v6436_v41  ;;  %v6461_v40 = vld [vmem:[#allocation5 + $0x3a0] ss:$16 sps:$4 sm:$0xff]   ;;  %v6464_v41 = vld [vmem:[#allocation5 + $0x1a8] ss:$16 sps:$4 sm:$0xff]  }
  0xba   : > { %2661 = vmatmul.mubr.bf16.gmra.mrb[16].mxu0 %v7532_v47  ;;  %2741 = vmatmul.mubr.bf16.gmra.mrb[16].mxu1 %v7534_v48 }
  0xbb   : > { %2798 = vmatpush1.bf16.msra.mxu0 %v6431_v52  ;;  %3377 = vmatpush1.bf16.msra.mxu1 %v6434_v53  ;;  %v6467_v52 = vld [vmem:[#allocation5 + $0x3c0] ss:$16 sps:$4 sm:$0xff]   ;;  %v263_v53 = vld [vmem:[%s7429_s12 + $0x8] sm:$0xff] }
  0xbc   : > { %2799 = vmatprep.subr.bf16.mxu0 %v6439_v54  ;;  %3378 = vmatprep.subr.bf16.mxu1 %v6442_v55  ;;  %v267_v54 = vld [vmem:[%s7429_s12 + $0x28] sm:$0xff] }
  0xbd   : > { %2670 = vmatprep.mubr.bf16.mxu0 %v7537_v56  ;;  %2750 = vmatprep.mubr.bf16.mxu1 %v7539_v57  ;;  %v6470_v55 = vld [vmem:[#allocation5 + $0x1c8] ss:$16 sps:$4 sm:$0xff]  }
  0xbf   : > { %2800 = vmatpush1.bf16.msra.mxu0 %v6437_v58  ;;  %3379 = vmatpush1.bf16.msra.mxu1 %v6440_v61  ;;  %v6475_v58 = vld [vmem:[#allocation5 + $0x3e4] ss:$16 sps:$4 sm:$0xff]   ;;  %v6478_v61 = vld [vmem:[#allocation5 + $0x1ec] ss:$16 sps:$4 sm:$0xff]  }
  0xc0   : > { %2801 = vmatprep.subr.bf16.mxu0 %v6445_v62  ;;  %3380 = vmatprep.subr.bf16.mxu1 %v6448_v63  ;;  %v6473_v62 = vld [vmem:[#allocation5 + $0x3e0] ss:$16 sps:$4 sm:$0xff]   ;;  %v7583_v63 = vcombine.high %v263_v53, %v267_v54 }
  0xc2   : > { %2671 = vmatmul.mubr.bf16.gmra.mrb[20].mxu0 %v7548_v6  ;;  %2751 = vmatmul.mubr.bf16.gmra.mrb[20].mxu1 %v7550_v7 }
  0xc3   : > { %2802 = vmatpush1.bf16.msra.mxu0 %v6443_v1  ;;  %3381 = vmatpush1.bf16.msra.mxu1 %v6446_v9  ;;  %v6481_v1 = vld [vmem:[#allocation5 + $0x20c] ss:$16 sps:$4 sm:$0xff]   ;;  %v7591_v9 = vcombine.low %v263_v53, %v267_v54  ;;  %v6491_v54 = vld [vmem:[#allocation5 + $0x288] ss:$16 sps:$4 sm:$0xff]  }
  0xc4   : > { %2803 = vmatprep.subr.bf16.mxu0 %v6451_v12  ;;  %3382 = vmatprep.subr.bf16.mxu1 %v6454_v13  ;;  %v6479_v12 = vld [vmem:[#allocation5 + $0x208] ss:$16 sps:$4 sm:$0xff]   ;;  %v7593_v13 = vcombine.high %v271_v4, %v275_v5  ;;  %v6499_v4 = vld [vmem:[#allocation5 + $0x2cc] ss:$16 sps:$4 sm:$0xff]   ;;  %v6527_v5 = vld [vmem:[#allocation5 + $0x4a0] ss:$16 sps:$4 sm:$0xff]  }
  0xc5   : > { %2680 = vmatprep.mubr.bf16.mxu0 %v7553_v14  ;;  %2760 = vmatprep.mubr.bf16.mxu1 %v7555_v16 }
  0xc7   : > { %2804 = vmatpush1.bf16.msra.mxu0 %v6449_v17  ;;  %3383 = vmatpush1.bf16.msra.mxu1 %v6452_v18  ;;  %v6484_v17 = vld [vmem:[#allocation5 + $0x22c] ss:$16 sps:$4 sm:$0xff]   ;;  %v6503_v18 = vld [vmem:[#allocation5 + $0x400] ss:$16 sps:$4 sm:$0xff]  }
  0xc8   : > { %2805 = vmatprep.subr.bf16.mxu0 %v6457_v22  ;;  %3384 = vmatprep.subr.bf16.mxu1 %v6460_v23  ;;  %v6482_v22 = vld [vmem:[#allocation5 + $0x228] ss:$16 sps:$4 sm:$0xff]  }
  0xc9   : > { %v279_v23 = vld [vmem:[%s7429_s12 + $0x88] sm:$0xff] }
  0xca   : > { %2681 = vmatmul.mubr.bf16.gmra.mrb[24].mxu0 %v7564_v30  ;;  %2761 = vmatmul.mubr.bf16.gmra.mrb[24].mxu1 %v7566_v31 }
  0xcb   : > { %2806 = vmatpush1.bf16.msra.mxu0 %v6455_v24  ;;  %3385 = vmatpush1.bf16.msra.mxu1 %v6458_v33  ;;  %v283_v24 = vld [vmem:[%s7429_s12 + $0xa8] sm:$0xff]  ;;  %v6514_v33 = vld [vmem:[#allocation5 + $0x444] ss:$16 sps:$4 sm:$0xff]  }
  0xcc   : > { %2807 = vmatprep.subr.bf16.mxu0 %v6463_v34  ;;  %3386 = vmatprep.subr.bf16.mxu1 %v6466_v35  ;;  %v6490_v34 = vld [vmem:[#allocation5 + $0x26c] ss:$16 sps:$4 sm:$0xff]   ;;  %v6512_v35 = vld [vmem:[#allocation5 + $0x440] ss:$16 sps:$4 sm:$0xff]   ;;  %v7611_v53 = vcombine.low %v279_v23, %v283_v24 }
  0xcd   : > { %2690 = vmatprep.mubr.bf16.mxu0 %v7569_v38  ;;  %2770 = vmatprep.mubr.bf16.mxu1 %v7571_v39 }
  0xcf   : > { %2808 = vmatpush1.bf16.msra.mxu0 %v6461_v40  ;;  %3387 = vmatpush1.bf16.msra.mxu1 %v6464_v41  ;;  %v291_v40 = vld [vmem:[%s7429_s12 + $0xe8] sm:$0xff] }
  0xd0   : > { %2809 = vmatprep.subr.bf16.mxu0 %v6469_v42  ;;  %3388 = vmatprep.subr.bf16.mxu1 %v6472_v45  ;;  %v6488_v41 = vld [vmem:[#allocation5 + $0x268] ss:$16 sps:$4 sm:$0xff]   ;;  %v6520_v42 = vld [vmem:[#allocation5 + $0x464] ss:$16 sps:$4 sm:$0xff]   ;;  %v6493_v45 = vld [vmem:[#allocation5 + $0x28c] ss:$16 sps:$4 sm:$0xff]  }
  0xd2   : > { %2691 = vmatmul.mubr.bf16.gmra.mrb[28].mxu0 %v7577_v46  ;;  %2771 = vmatmul.mubr.bf16.gmra.mrb[28].mxu1 %v7579_v49 }
  0xd3   : > { %2810 = vmatpush1.bf16.msra.mxu0 %v6467_v52  ;;  %3389 = vmatpush1.bf16.msra.mxu1 %v6470_v55  ;;  %v6518_v52 = vld [vmem:[#allocation5 + $0x460] ss:$16 sps:$4 sm:$0xff]  }
  0xd4   : > { %2811 = vmatprep.subr.bf16.mxu0 %v6475_v58  ;;  %3390 = vmatprep.subr.bf16.mxu1 %v6478_v61  ;;  %v6496_v58 = vld [vmem:[#allocation5 + $0x2ac] ss:$16 sps:$4 sm:$0xff]   ;;  %v6521_v61 = vld [vmem:[#allocation5 + $0x480] ss:$16 sps:$4 sm:$0xff]  }
  0xd5   : > { %2813 = vmatprep.mubr.bf16.mxu0 %v7583_v63  ;;  %3392 = vmatprep.mubr.bf16.mxu1 %v7447_v15  ;;  %v6487_v15 = vld [vmem:[#allocation5 + $0x24c] ss:$16 sps:$4 sm:$0xff]  }
  0xd7   : > { %2812 = vmatpush1.bf16.msra.mxu0 %v6473_v62  ;;  %3391 = vmatpush1.bf16.msra.mxu1 %v6476_v0  ;;  %v299_v62 = vld [vmem:[%s7429_s12 + $0x128] sm:$0xff] }
  0xd8   : > { %3553 = vmatprep.subr.bf16.mxu1 %v6481_v1  ;;  %2974 = vmatprep.subr.bf16.mxu0 %v6505_v8  ;;  %v6494_v0 = vld [vmem:[#allocation5 + $0x2a8] ss:$16 sps:$4 sm:$0xff]   ;;  %v6529_v1 = vld [vmem:[#allocation5 + $0x4a4] ss:$16 sps:$4 sm:$0xff]  }
  0xda   : > { %2814 = vmatmul.mubr.bf16.vlgmr.msra.gmra.mrb[0].mxu0 %v7591_v9  ;;  %3393 = vmatmul.mubr.bf16.vlgmr.msra.gmra.mrb[32].mxu1 %v7465_v43  ;;  %v7603_v43 = vcombine.high %v279_v23, %v283_v24  ;;  %v307_v23 = vld [vmem:[%s7429_s12 + $0x168] sm:$0xff] }
  0xdb   : > { %3554 = vmatpush1.bf16.msra.mxu1 %v6479_v12  ;;  %2823 = vmatprep.mubr.bf16.mxu0 %v7593_v13  ;;  %v6497_v12 = vld [vmem:[#allocation5 + $0x2c8] ss:$16 sps:$4 sm:$0xff]  }
  0xdc   : > { %3402 = vmatprep.mubr.bf16.mxu1 %v7473_v50  ;;  %3555 = vmatprep.subr.bf16.mxu1 %v6484_v17  ;;  %v287_v50 = vld [vmem:[%s7429_s12 + $0xc8] sm:$0xff] }
  0xdd   : > { %2975 = vmatpush1.bf16.msra.mxu0 %v6503_v18  ;;  %v7613_v55 = vcombine.high %v287_v50, %v291_v40  ;;  %v7621_v8 = vcombine.low %v287_v50, %v291_v40  ;;  %v6502_v18 = vld [vmem:[#allocation5 + $0x2ec] ss:$16 sps:$4 sm:$0xff]   ;;  %v6500_v24 = vld [vmem:[#allocation5 + $0x2e8] ss:$16 sps:$4 sm:$0xff]   ;;  %v6539_v50 = vld [vmem:[#allocation5 + $0x500] ss:$16 sps:$4 sm:$0xff]  }
  0xde   : > { %2976 = vmatprep.subr.bf16.mxu0 %v6511_v25  ;;  %v6538_v25 = vld [vmem:[#allocation5 + $0x4e4] ss:$16 sps:$4 sm:$0xff]   ;;  %v315_v40 = vld [vmem:[%s7429_s12 + $0x1a8] sm:$0xff] }
  0xdf   : > { %3556 = vmatpush1.bf16.msra.mxu1 %v6482_v22  ;;  %v6530_v22 = vld [vmem:[#allocation5 + $0x4c0] ss:$16 sps:$4 sm:$0xff]  }
  0xe0   : > { %3557 = vmatprep.subr.bf16.mxu1 %v6487_v15  ;;  %v6508_v15 = vld [vmem:[#allocation5 + $0x30c] ss:$16 sps:$4 sm:$0xff]  }
  0xe1   : > { %2977 = vmatpush1.bf16.msra.mxu0 %v6509_v26  ;;  %v6536_v26 = vld [vmem:[#allocation5 + $0x4e0] ss:$16 sps:$4 sm:$0xff]  }
  0xe2   : > { %2824 = vmatmul.mubr.bf16.gmra.mrb[4].mxu0 %v7601_v27  ;;  %3403 = vmatmul.mubr.bf16.gmra.mrb[36].mxu1 %v7483_v59  ;;  %v6523_v59 = vld [vmem:[#allocation5 + $0x484] ss:$16 sps:$4 sm:$0xff]  }
  0xe3   : > { %2833 = vmatprep.mubr.bf16.mxu0 %v7603_v43  ;;  %3412 = vmatprep.mubr.bf16.mxu1 %v7489_v2  ;;  %v295_v2 = vld [vmem:[%s7429_s12 + $0x108] sm:$0xff] }
  0xe4   : > { %3558 = vmatpush1.bf16.msra.mxu1 %v6485_v32  ;;  %2978 = vmatprep.subr.bf16.mxu0 %v6514_v33  ;;  %v7623_v17 = vcombine.high %v295_v2, %v299_v62  ;;  %v7631_v32 = vcombine.low %v295_v2, %v299_v62  ;;  %v6506_v33 = vld [vmem:[#allocation5 + $0x308] ss:$16 sps:$4 sm:$0xff]   ;;  %v6548_v2 = vld [vmem:[#allocation5 + $0x540] ss:$16 sps:$4 sm:$0xff]  }
  0xe5   : > { %3559 = vmatprep.subr.bf16.mxu1 %v6490_v34  ;;  %2979 = vmatpush1.bf16.msra.mxu0 %v6512_v35  ;;  %v6517_v35 = vld [vmem:[#allocation5 + $0x32c] ss:$16 sps:$4 sm:$0xff]  }
  0xe6   : > { %2980 = vmatprep.subr.bf16.mxu0 %v6520_v42  ;;  %v6547_v42 = vld [vmem:[#allocation5 + $0x524] ss:$16 sps:$4 sm:$0xff]   ;;  %v323_v62 = vld [vmem:[%s7429_s12 + $0x1e8] sm:$0xff] }
  0xe8   : > { %3560 = vmatpush1.bf16.msra.mxu1 %v6488_v41  ;;  %v6515_v41 = vld [vmem:[#allocation5 + $0x328] ss:$16 sps:$4 sm:$0xff]  }
  0xe9   : > { %3561 = vmatprep.subr.bf16.mxu1 %v6493_v45  ;;  %2981 = vmatpush1.bf16.msra.mxu0 %v6518_v52  ;;  %v6526_v45 = vld [vmem:[#allocation5 + $0x34c] ss:$16 sps:$4 sm:$0xff]   ;;  %v6545_v52 = vld [vmem:[#allocation5 + $0x520] ss:$16 sps:$4 sm:$0xff]  }
  0xea   : > { %2834 = vmatmul.mubr.bf16.gmra.mrb[8].mxu0 %v7611_v53  ;;  %3413 = vmatmul.mubr.bf16.gmra.mrb[40].mxu1 %v7498_v10  ;;  %v6532_v10 = vld [vmem:[#allocation5 + $0x4c4] ss:$16 sps:$4 sm:$0xff]  }
  0xeb   : > { %2843 = vmatprep.mubr.bf16.mxu0 %v7613_v55  ;;  %3422 = vmatprep.mubr.bf16.mxu1 %v7505_v20  ;;  %v303_v20 = vld [vmem:[%s7429_s12 + $0x148] sm:$0xff] }
  0xec   : > { %3562 = vmatpush1.bf16.msra.mxu1 %v6491_v54  ;;  %2982 = vmatprep.subr.bf16.mxu0 %v6523_v59  ;;  %v7633_v34 = vcombine.high %v303_v20, %v307_v23  ;;  %v7641_v54 = vcombine.low %v303_v20, %v307_v23  ;;  %v6524_v59 = vld [vmem:[#allocation5 + $0x348] ss:$16 sps:$4 sm:$0xff]   ;;  %v6557_v20 = vld [vmem:[#allocation5 + $0x580] ss:$16 sps:$4 sm:$0xff]   ;;  %v6565_v23 = vld [vmem:[#allocation5 + $0x5a4] ss:$16 sps:$4 sm:$0xff]  }
  0xed   : > { %3563 = vmatprep.subr.bf16.mxu1 %v6496_v58  ;;  %2983 = vmatpush1.bf16.msra.mxu0 %v6521_v61  ;;  %v6535_v61 = vld [vmem:[#allocation5 + $0x36c] ss:$16 sps:$4 sm:$0xff]  }
  0xee   : > { %2984 = vmatprep.subr.bf16.mxu0 %v6529_v1  ;;  %v6556_v1 = vld [vmem:[#allocation5 + $0x564] ss:$16 sps:$4 sm:$0xff]  }
  0xf0   : > { %3564 = vmatpush1.bf16.msra.mxu1 %v6494_v0  ;;  %v6533_v0 = vld [vmem:[#allocation5 + $0x368] ss:$16 sps:$4 sm:$0xff]  }
  0xf1   : > { %3565 = vmatprep.subr.bf16.mxu1 %v6499_v4  ;;  %2985 = vmatpush1.bf16.msra.mxu0 %v6527_v5  ;;  %v6544_v4 = vld [vmem:[#allocation5 + $0x38c] ss:$16 sps:$4 sm:$0xff]   ;;  %v6554_v5 = vld [vmem:[#allocation5 + $0x560] ss:$16 sps:$4 sm:$0xff]  }
  0xf2   : > { %2844 = vmatmul.mubr.bf16.gmra.mrb[12].mxu0 %v7621_v8  ;;  %3423 = vmatmul.mubr.bf16.gmra.mrb[44].mxu1 %v7514_v28  ;;  %v6541_v28 = vld [vmem:[#allocation5 + $0x504] ss:$16 sps:$4 sm:$0xff]  }
  0xf3   : > { %2853 = vmatprep.mubr.bf16.mxu0 %v7623_v17  ;;  %3432 = vmatprep.mubr.bf16.mxu1 %v7521_v36  ;;  %v311_v36 = vld [vmem:[%s7429_s12 + $0x188] sm:$0xff] }
  0xf4   : > { %3566 = vmatpush1.bf16.msra.mxu1 %v6497_v12  ;;  %2986 = vmatprep.subr.bf16.mxu0 %v6532_v10  ;;  %v7643_v58 = vcombine.high %v311_v36, %v315_v40  ;;  %v7651_v12 = vcombine.low %v311_v36, %v315_v40  ;;  %v6542_v10 = vld [vmem:[#allocation5 + $0x388] ss:$16 sps:$4 sm:$0xff]   ;;  %v6574_v36 = vld [vmem:[#allocation5 + $0x5e4] ss:$16 sps:$4 sm:$0xff]  }
  0xf5   : > { %3567 = vmatprep.subr.bf16.mxu1 %v6502_v18  ;;  %2987 = vmatpush1.bf16.msra.mxu0 %v6530_v22  ;;  %v6553_v22 = vld [vmem:[#allocation5 + $0x3ac] ss:$16 sps:$4 sm:$0xff]  }
  0xf6   : > { %2988 = vmatprep.subr.bf16.mxu0 %v6538_v25  ;;  %v6551_v25 = vld [vmem:[#allocation5 + $0x3a8] ss:$16 sps:$4 sm:$0xff]  }
  0xf7   : > { %v335_v40 = vld [vmem:[%s7429_s12 + $0x248] sm:$0xff] }
  0xf8   : > { %3568 = vmatpush1.bf16.msra.mxu1 %v6500_v24  ;;  %v331_v24 = vld [vmem:[%s7429_s12 + $0x228] sm:$0xff] }
  0xf9   : > { %3569 = vmatprep.subr.bf16.mxu1 %v6508_v15  ;;  %2989 = vmatpush1.bf16.msra.mxu0 %v6536_v26  ;;  %v6562_v15 = vld [vmem:[#allocation5 + $0x3cc] ss:$16 sps:$4 sm:$0xff]   ;;  %v6563_v26 = vld [vmem:[#allocation5 + $0x5a0] ss:$16 sps:$4 sm:$0xff]  }
  0xfa   : > { %2854 = vmatmul.mubr.bf16.gmra.mrb[16].mxu0 %v7631_v32  ;;  %3433 = vmatmul.mubr.bf16.gmra.mrb[48].mxu1 %v7532_v47  ;;  %v6550_v47 = vld [vmem:[#allocation5 + $0x544] ss:$16 sps:$4 sm:$0xff]  }
  0xfb   : > { %2863 = vmatprep.mubr.bf16.mxu0 %v7633_v34  ;;  %3442 = vmatprep.mubr.bf16.mxu1 %v7537_v56  ;;  %v319_v56 = vld [vmem:[%s7429_s12 + $0x1c8] sm:$0xff] }
  0xfc   : > { %3570 = vmatpush1.bf16.msra.mxu1 %v6506_v33  ;;  %2990 = vmatprep.subr.bf16.mxu0 %v6541_v28  ;;  %v7653_v18 = vcombine.high %v319_v56, %v323_v62  ;;  %v7661_v33 = vcombine.low %v319_v56, %v323_v62  ;;  %v6560_v28 = vld [vmem:[#allocation5 + $0x3c8] ss:$16 sps:$4 sm:$0xff]  }
  0xfd   : > { %3571 = vmatprep.subr.bf16.mxu1 %v6517_v35  ;;  %2991 = vmatpush1.bf16.msra.mxu0 %v6539_v50  ;;  %v6568_v35 = vld [vmem:[#allocation5 + $0x5c4] ss:$16 sps:$4 sm:$0xff]   ;;  %v6571_v50 = vld [vmem:[#allocation5 + $0x3ec] ss:$16 sps:$4 sm:$0xff]  }
  0xfe   : > { %2992 = vmatprep.subr.bf16.mxu0 %v6547_v42  ;;  %v6569_v42 = vld [vmem:[#allocation5 + $0x3e8] ss:$16 sps:$4 sm:$0xff]  }
 0x100   : > { %3572 = vmatpush1.bf16.msra.mxu1 %v6515_v41  ;;  %v339_v41 = vld [vmem:[%s7429_s12 + $0x268] sm:$0xff] }
 0x101   : > { %3573 = vmatprep.subr.bf16.mxu1 %v6526_v45  ;;  %2993 = vmatpush1.bf16.msra.mxu0 %v6545_v52  ;;  %v6572_v45 = vld [vmem:[#allocation5 + $0x5e0] ss:$16 sps:$4 sm:$0xff]   ;;  %v6577_v52 = vld [vmem:[#allocation5 + $0x40c] ss:$16 sps:$4 sm:$0xff]  }
 0x102   : > { %2864 = vmatmul.mubr.bf16.gmra.mrb[20].mxu0 %v7641_v54  ;;  %3443 = vmatmul.mubr.bf16.gmra.mrb[52].mxu1 %v7548_v6  ;;  %v6559_v6 = vld [vmem:[#allocation5 + $0x584] ss:$16 sps:$4 sm:$0xff]  }
 0x103   : > { %2873 = vmatprep.mubr.bf16.mxu0 %v7643_v58  ;;  %3452 = vmatprep.mubr.bf16.mxu1 %v7553_v14  ;;  %v327_v14 = vld [vmem:[%s7429_s12 + $0x208] sm:$0xff] }
 0x104   : > { %3574 = vmatpush1.bf16.msra.mxu1 %v6524_v59  ;;  %2994 = vmatprep.subr.bf16.mxu0 %v6550_v47  ;;  %v7671_v59 = vcombine.low %v327_v14, %v331_v24  ;;  %v6601_v47 = vld [vmem:[#allocation5 + $0x604] ss:$16 sps:$4 sm:$0xff]  }
 0x105   : > { %3575 = vmatprep.subr.bf16.mxu1 %v6535_v61  ;;  %2995 = vmatpush1.bf16.msra.mxu0 %v6548_v2  ;;  %v347_v61 = vld [vmem:[%s7429_s12 + $0x2a8] sm:$0xff]  ;;  %v7681_v2 = vcombine.low %v335_v40, %v339_v41 }
 0x106   : > { %2996 = vmatprep.subr.bf16.mxu0 %v6556_v1  ;;  %v363_v1 = vld [vmem:[%s7429_s12 + $0x328] sm:$0xff] }
 0x108   : > { %3576 = vmatpush1.bf16.msra.mxu1 %v6533_v0 }
 0x109   : > { %3577 = vmatprep.subr.bf16.mxu1 %v6544_v4  ;;  %2997 = vmatpush1.bf16.msra.mxu0 %v6554_v5  ;;  %v371_v5 = vld [vmem:[%s7429_s12 + $0x368] sm:$0xff] }
 0x10a   : > { %2874 = vmatmul.mubr.bf16.gmra.mrb[24].mxu0 %v7651_v12  ;;  %3453 = vmatmul.mubr.bf16.gmra.mrb[56].mxu1 %v7564_v30  ;;  %v7663_v30 = vcombine.high %v327_v14, %v331_v24 }
 0x10b   : > { %2883 = vmatprep.mubr.bf16.mxu0 %v7653_v18  ;;  %3462 = vmatprep.mubr.bf16.mxu1 %v7569_v38  ;;  %v6566_v38 = vld [vmem:[#allocation5 + $0x5c0] ss:$16 sps:$4 sm:$0xff]  }
 0x10c   : > { %3578 = vmatpush1.bf16.msra.mxu1 %v6542_v10  ;;  %2998 = vmatprep.subr.bf16.mxu0 %v6559_v6  ;;  %v379_v6 = vld [vmem:[%s7429_s12 + $0x3a8] sm:$0xff] }
 0x10d   : > { %3579 = vmatprep.subr.bf16.mxu1 %v6553_v22  ;;  %2999 = vmatpush1.bf16.msra.mxu0 %v6557_v20  ;;  %v387_v20 = vld [vmem:[%s7429_s12 + $0x3e8] sm:$0xff] }
 0x10e   : > { %3000 = vmatprep.subr.bf16.mxu0 %v6565_v23  ;;  %v268_v23 = vld [vmem:[%s7429_s12 + $0x30] sm:$0xff] }
 0x110   : > { %3580 = vmatpush1.bf16.msra.mxu1 %v6551_v25  ;;  %v276_v25 = vld [vmem:[%s7429_s12 + $0x70] sm:$0xff] }
 0x111   : > { %3581 = vmatprep.subr.bf16.mxu1 %v6562_v15  ;;  %3001 = vmatpush1.bf16.msra.mxu0 %v6563_v26 }
 0x112   : > { %2884 = vmatmul.mubr.bf16.gmra.mrb[28].mxu0 %v7661_v33  ;;  %3463 = vmatmul.mubr.bf16.gmra.mrb[60].mxu1 %v7577_v46  ;;  %v7673_v46 = vcombine.high %v335_v40, %v339_v41  ;;  %v6605_v40 = vld [vmem:[#allocation5 + $0x620] ss:$16 sps:$4 sm:$0xff]  }
 0x113   : > { %2893 = vmatprep.mubr.bf16.mxu0 %v7663_v30  ;;  %3472 = vmatprep.mubr.bf16.mxu1 %v7457_v19  ;;  %v343_v19 = vld [vmem:[%s7429_s12 + $0x288] sm:$0xff] }
 0x114   : > { %3582 = vmatpush1.bf16.msra.mxu1 %v6560_v28  ;;  %3002 = vmatprep.subr.bf16.mxu0 %v6568_v35  ;;  %v7683_v56 = vcombine.high %v343_v19, %v347_v61  ;;  %v7691_v62 = vcombine.low %v343_v19, %v347_v61  ;;  %v6580_v28 = vld [vmem:[#allocation5 + $0x42c] ss:$16 sps:$4 sm:$0xff]   ;;  %v6599_v35 = vld [vmem:[#allocation5 + $0x600] ss:$16 sps:$4 sm:$0xff]  }
 0x115   : > { %3583 = vmatprep.subr.bf16.mxu1 %v6571_v50  ;;  %3003 = vmatpush1.bf16.msra.mxu0 %v6566_v38  ;;  %v280_v38 = vld [vmem:[%s7429_s12 + $0x90] sm:$0xff] }
 0x116   : > { %3004 = vmatprep.subr.bf16.mxu0 %v6574_v36  ;;  %v284_v50 = vld [vmem:[%s7429_s12 + $0xb0] sm:$0xff]  ;;  %v6583_v36 = vld [vmem:[#allocation5 + $0x44c] ss:$16 sps:$4 sm:$0xff]  }
 0x117   : > { %v288_v19 = vld [vmem:[%s7429_s12 + $0xd0] sm:$0xff] }
 0x118   : > { %3584 = vmatpush1.bf16.msra.mxu1 %v6569_v42  ;;  %v6581_v42 = vld [vmem:[#allocation5 + $0x448] ss:$16 sps:$4 sm:$0xff]   ;;  %v292_v61 = vld [vmem:[%s7429_s12 + $0xf0] sm:$0xff] }
 0x119   : > { %3005 = vmatpush1.bf16.msra.mxu0 %v6572_v45  ;;  %3746 = vmatprep.subr.bf16.mxu1 %v6577_v52  ;;  %v6610_v45 = vld [vmem:[#allocation5 + $0x644] ss:$16 sps:$4 sm:$0xff]   ;;  %v6586_v52 = vld [vmem:[#allocation5 + $0x46c] ss:$16 sps:$4 sm:$0xff]  }
 0x11a   : > { %2894 = vmatmul.mubr.bf16.gmra.mrb[32].mxu0 %v7671_v59  ;;  %3473 = vmatmul.mubr.bf16.gmra.mrb[64].mxu1 %v7469_v44  ;;  %v351_v44 = vld [vmem:[%s7429_s12 + $0x2c8] sm:$0xff] }
 0x11b   : > { %2903 = vmatprep.mubr.bf16.mxu0 %v7673_v46  ;;  %3482 = vmatprep.mubr.bf16.mxu1 %v7475_v51  ;;  %v355_v51 = vld [vmem:[%s7429_s12 + $0x2e8] sm:$0xff] }
 0x11c   : > { %3167 = vmatprep.subr.bf16.mxu0 %v6601_v47  ;;  %v7693_v0 = vcombine.high %v351_v44, %v355_v51  ;;  %v6616_v47 = vld [vmem:[#allocation5 + $0x664] ss:$16 sps:$4 sm:$0xff]  }
 0x122   : > { %2904 = vmatmul.mubr.bf16.gmra.mrb[36].mxu0 %v7681_v2  ;;  %3483 = vmatmul.mubr.bf16.gmra.mrb[68].mxu1 %v7485_v60  ;;  %v359_v60 = vld [vmem:[%s7429_s12 + $0x308] sm:$0xff] }
 0x123   : > { %2913 = vmatprep.mubr.bf16.mxu0 %v7683_v56  ;;  %3492 = vmatprep.mubr.bf16.mxu1 %v7491_v3  ;;  %v7701_v3 = vcombine.low %v351_v44, %v355_v51  ;;  %v7703_v4 = vcombine.high %v359_v60, %v363_v1  ;;  %v6584_v44 = vld [vmem:[#allocation5 + $0x468] ss:$16 sps:$4 sm:$0xff]   ;;  %v6589_v51 = vld [vmem:[#allocation5 + $0x48c] ss:$16 sps:$4 sm:$0xff]  }
 0x12a   : > { %2914 = vmatmul.mubr.bf16.gmra.mrb[40].mxu0 %v7691_v62  ;;  %3493 = vmatmul.mubr.bf16.gmra.mrb[72].mxu1 %v7500_v11  ;;  %v367_v11 = vld [vmem:[%s7429_s12 + $0x348] sm:$0xff] }
 0x12b   : > { %2923 = vmatprep.mubr.bf16.mxu0 %v7693_v0  ;;  %3502 = vmatprep.mubr.bf16.mxu1 %v7507_v21  ;;  %v7711_v21 = vcombine.low %v359_v60, %v363_v1  ;;  %v7713_v10 = vcombine.high %v367_v11, %v371_v5  ;;  %v6614_v60 = vld [vmem:[#allocation5 + $0x660] ss:$16 sps:$4 sm:$0xff]   ;;  %v7771_v1 = vcombine.low %v280_v38, %v284_v50 }
 0x132   : > { %2924 = vmatmul.mubr.bf16.gmra.mrb[44].mxu0 %v7701_v3  ;;  %3503 = vmatmul.mubr.bf16.gmra.mrb[76].mxu1 %v7516_v29  ;;  %v375_v29 = vld [vmem:[%s7429_s12 + $0x388] sm:$0xff] }
 0x133   : > { %2933 = vmatprep.mubr.bf16.mxu0 %v7703_v4  ;;  %3512 = vmatprep.mubr.bf16.mxu1 %v7523_v37  ;;  %v7721_v37 = vcombine.low %v367_v11, %v371_v5  ;;  %v7723_v22 = vcombine.high %v375_v29, %v379_v6  ;;  %v6587_v11 = vld [vmem:[#allocation5 + $0x488] ss:$16 sps:$4 sm:$0xff]   ;;  %v6619_v5 = vld [vmem:[#allocation5 + $0x684] ss:$16 sps:$4 sm:$0xff]  }
 0x13a   : > { %2934 = vmatmul.mubr.bf16.gmra.mrb[48].mxu0 %v7711_v21  ;;  %3513 = vmatmul.mubr.bf16.gmra.mrb[80].mxu1 %v7534_v48  ;;  %v383_v48 = vld [vmem:[%s7429_s12 + $0x3c8] sm:$0xff] }
 0x13b   : > { %2943 = vmatprep.mubr.bf16.mxu0 %v7713_v10  ;;  %3522 = vmatprep.mubr.bf16.mxu1 %v7539_v57  ;;  %v7731_v57 = vcombine.low %v375_v29, %v379_v6  ;;  %v7733_v14 = vcombine.high %v383_v48, %v387_v20  ;;  %v7741_v24 = vcombine.low %v383_v48, %v387_v20  ;;  %v6617_v29 = vld [vmem:[#allocation5 + $0x680] ss:$16 sps:$4 sm:$0xff]   ;;  %v6625_v6 = vld [vmem:[#allocation5 + $0x6a4] ss:$16 sps:$4 sm:$0xff]  }
 0x13c   : > { %v296_v48 = vld [vmem:[%s7429_s12 + $0x110] sm:$0xff] }
 0x13d   : > { %v300_v20 = vld [vmem:[%s7429_s12 + $0x130] sm:$0xff] }
 0x142   : > { %2944 = vmatmul.mubr.bf16.gmra.mrb[52].mxu0 %v7721_v37  ;;  %3523 = vmatmul.mubr.bf16.gmra.mrb[84].mxu1 %v7550_v7  ;;  %v264_v7 = vld [vmem:[%s7429_s12 + $0x10] sm:$0xff] }
 0x143   : > { %2953 = vmatprep.mubr.bf16.mxu0 %v7723_v22  ;;  %3532 = vmatprep.mubr.bf16.mxu1 %v7555_v16  ;;  %v7743_v16 = vcombine.high %v264_v7, %v268_v23  ;;  %v7751_v15 = vcombine.low %v264_v7, %v268_v23  ;;  %v6590_v7 = vld [vmem:[#allocation5 + $0x4a8] ss:$16 sps:$4 sm:$0xff]  }
 0x14a   : > { %2954 = vmatmul.mubr.bf16.gmra.mrb[56].mxu0 %v7731_v57  ;;  %3533 = vmatmul.mubr.bf16.gmra.mrb[88].mxu1 %v7566_v31  ;;  %v272_v31 = vld [vmem:[%s7429_s12 + $0x50] sm:$0xff] }
 0x14b   : > { %2963 = vmatprep.mubr.bf16.mxu0 %v7733_v14  ;;  %3542 = vmatprep.mubr.bf16.mxu1 %v7571_v39  ;;  %v6575_v39 = vld [vmem:[#allocation5 + $0x408] ss:$16 sps:$4 sm:$0xff]   ;;  %v7753_v26 = vcombine.high %v272_v31, %v276_v25  ;;  %v7761_v41 = vcombine.low %v272_v31, %v276_v25  ;;  %v6595_v31 = vld [vmem:[#allocation5 + $0x4cc] ss:$16 sps:$4 sm:$0xff]   ;;  %v6623_v25 = vld [vmem:[#allocation5 + $0x6a0] ss:$16 sps:$4 sm:$0xff]  }
 0x152   : > { %2964 = vmatmul.mubr.bf16.gmra.mrb[60].mxu0 %v7741_v24  ;;  %3543 = vmatmul.mubr.bf16.gmra.mrb[92].mxu1 %v7579_v49  ;;  %v6607_v49 = vld [vmem:[#allocation5 + $0x624] ss:$16 sps:$4 sm:$0xff]  }
 0x153   : > { %3006 = vmatprep.mubr.bf16.mxu0 %v7743_v16  ;;  %3585 = vmatprep.mubr.bf16.mxu1 %v7583_v63  ;;  %v6578_v63 = vld [vmem:[#allocation5 + $0x428] ss:$16 sps:$4 sm:$0xff]  }
 0x15a   : > { %3007 = vmatmul.mubr.bf16.vlgmr.msra.gmra.mrb[0].mxu0 %v7751_v15  ;;  %3586 = vmatmul.mubr.bf16.vlgmr.msra.gmra.mrb[32].mxu1 %v7591_v9  ;;  %v7763_v9 = vcombine.high %v280_v38, %v284_v50  ;;  %v6598_v38 = vld [vmem:[#allocation5 + $0x4ec] ss:$16 sps:$4 sm:$0xff]   ;;  %v6626_v50 = vld [vmem:[#allocation5 + $0x6c0] ss:$16 sps:$4 sm:$0xff]  }
 0x15b   : > { %3747 = vmatpush1.bf16.msra.mxu1 %v6575_v39  ;;  %3016 = vmatprep.mubr.bf16.mxu0 %v7753_v26 }
 0x15c   : > { %3595 = vmatprep.mubr.bf16.mxu1 %v7593_v13  ;;  %3748 = vmatprep.subr.bf16.mxu1 %v6580_v28  ;;  %v6608_v13 = vld [vmem:[#allocation5 + $0x640] ss:$16 sps:$4 sm:$0xff]   ;;  %v7785_v28 = vcombine.low %v288_v19, %v292_v61 }
 0x15d   : > { %3168 = vmatpush1.bf16.msra.mxu0 %v6599_v35 }
 0x15e   : > { %3169 = vmatprep.subr.bf16.mxu0 %v6607_v49  ;;  %v6593_v49 = vld [vmem:[#allocation5 + $0x4c8] ss:$16 sps:$4 sm:$0xff]  }
 0x15f   : > { %3749 = vmatpush1.bf16.msra.mxu1 %v6578_v63  ;;  %v6628_v63 = vld [vmem:[#allocation5 + $0x6c4] ss:$16 sps:$4 sm:$0xff]  }
 0x160   : > { %3750 = vmatprep.subr.bf16.mxu1 %v6583_v36  ;;  %v6634_v36 = vld [vmem:[#allocation5 + $0x6e4] ss:$16 sps:$4 sm:$0xff]  }
 0x161   : > { %3170 = vmatpush1.bf16.msra.mxu0 %v6605_v40  ;;  %v304_v40 = vld [vmem:[%s7429_s12 + $0x150] sm:$0xff] }
 0x162   : > { %3017 = vmatmul.mubr.bf16.gmra.mrb[4].mxu0 %v7761_v41  ;;  %3596 = vmatmul.mubr.bf16.gmra.mrb[36].mxu1 %v7601_v27  ;;  %v7773_v27 = vcombine.high %v288_v19, %v292_v61  ;;  %v7803_v61 = vcombine.low %v296_v48, %v300_v20 }
 0x163   : > { %3026 = vmatprep.mubr.bf16.mxu0 %v7763_v9  ;;  %3605 = vmatprep.mubr.bf16.mxu1 %v7603_v43  ;;  %v6592_v43 = vld [vmem:[#allocation5 + $0x4ac] ss:$16 sps:$4 sm:$0xff]  }
 0x164   : > { %3751 = vmatpush1.bf16.msra.mxu1 %v6581_v42  ;;  %3171 = vmatprep.subr.bf16.mxu0 %v6610_v45  ;;  %v308_v42 = vld [vmem:[%s7429_s12 + $0x170] sm:$0xff]  ;;  %v6596_v45 = vld [vmem:[#allocation5 + $0x4e8] ss:$16 sps:$4 sm:$0xff]  }
 0x165   : > { %3752 = vmatprep.subr.bf16.mxu1 %v6586_v52  ;;  %3172 = vmatpush1.bf16.msra.mxu0 %v6608_v13  ;;  %v6604_v13 = vld [vmem:[#allocation5 + $0x50c] ss:$16 sps:$4 sm:$0xff]  }
 0x166   : > { %3173 = vmatprep.subr.bf16.mxu0 %v6616_v47  ;;  %v6632_v47 = vld [vmem:[#allocation5 + $0x6e0] ss:$16 sps:$4 sm:$0xff]  }
 0x168   : > { %3753 = vmatpush1.bf16.msra.mxu1 %v6584_v44 }
 0x169   : > { %3754 = vmatprep.subr.bf16.mxu1 %v6589_v51  ;;  %3174 = vmatpush1.bf16.msra.mxu0 %v6614_v60  ;;  %v6602_v51 = vld [vmem:[#allocation5 + $0x508] ss:$16 sps:$4 sm:$0xff]   ;;  %v6637_v60 = vld [vmem:[#allocation5 + $0x704] ss:$16 sps:$4 sm:$0xff]  }
 0x16a   : > { %3027 = vmatmul.mubr.bf16.gmra.mrb[8].mxu0 %v7771_v1  ;;  %3606 = vmatmul.mubr.bf16.gmra.mrb[40].mxu1 %v7611_v53 }
 0x16b   : > { %3036 = vmatprep.mubr.bf16.mxu0 %v7773_v27  ;;  %3615 = vmatprep.mubr.bf16.mxu1 %v7613_v55  ;;  %v7789_v55 = vcombine.high %v296_v48, %v300_v20  ;;  %v6611_v48 = vld [vmem:[#allocation5 + $0x528] ss:$16 sps:$4 sm:$0xff]  }
 0x16c   : > { %3755 = vmatpush1.bf16.msra.mxu1 %v6587_v11  ;;  %3175 = vmatprep.subr.bf16.mxu0 %v6619_v5  ;;  %v6613_v11 = vld [vmem:[#allocation5 + $0x52c] ss:$16 sps:$4 sm:$0xff]   ;;  %v6635_v5 = vld [vmem:[#allocation5 + $0x700] ss:$16 sps:$4 sm:$0xff]  }
 0x16d   : > { %v7781_v23 = vpop.f32.mrb[0].mxu1  ;;  %3756 = vmatprep.subr.bf16.mxu1 %v6592_v43  ;;  %3176 = vmatpush1.bf16.msra.mxu0 %v6617_v29  ;;  %v6643_v43 = vld [vmem:[#allocation5 + $0x724] ss:$16 sps:$4 sm:$0xff]  }
 0x16e   : > { %v7783_v39 = vpop.f32.mrb[1].mxu1  ;;  %3177 = vmatprep.subr.bf16.mxu0 %v6625_v6  ;;  %v312_v29 = vld [vmem:[%s7429_s12 + $0x190] sm:$0xff] }
 0x16f   : > { %v7787_v53 = vpop.f32.mrb[2].mxu1  ;;  %v316_v6 = vld [vmem:[%s7429_s12 + $0x1b0] sm:$0xff] }
 0x170   : > { %v7791_v35 = vpop.f32.mrb[3].mxu1  ;;  %3757 = vmatpush1.bf16.msra.mxu1 %v6590_v7  ;;  %v6622_v7 = vld [vmem:[#allocation5 + $0x54c] ss:$16 sps:$4 sm:$0xff]  }
 0x171   : > { %3758 = vmatprep.subr.bf16.mxu1 %v6595_v31  ;;  %3178 = vmatpush1.bf16.msra.mxu0 %v6623_v25  ;;  %v6641_v31 = vld [vmem:[#allocation5 + $0x720] ss:$16 sps:$4 sm:$0xff]  }
 0x172   : > { %3037 = vmatmul.mubr.bf16.gmra.mrb[12].mxu0 %v7785_v28  ;;  %3616 = vmatmul.mubr.bf16.gmra.mrb[44].mxu1 %v7621_v8 }
 0x173   : > { %3046 = vmatprep.mubr.bf16.mxu0 %v7789_v55  ;;  %3625 = vmatprep.mubr.bf16.mxu1 %v7623_v17  ;;  %v7807_v17 = vcombine.high %v304_v40, %v308_v42 }
 0x174   : > { %3759 = vmatpush1.bf16.msra.mxu1 %v6593_v49  ;;  %3179 = vmatprep.subr.bf16.mxu0 %v6628_v63  ;;  %v7821_v49 = vcombine.low %v304_v40, %v308_v42  ;;  %v6652_v40 = vld [vmem:[#allocation5 + $0x764] ss:$16 sps:$4 sm:$0xff]  }
 0x175   : > { %v7799_v52 = vpop.f32.mrb[4].mxu1  ;;  %3760 = vmatprep.subr.bf16.mxu1 %v6598_v38  ;;  %3180 = vmatpush1.bf16.msra.mxu0 %v6626_v50  ;;  %v6620_v38 = vld [vmem:[#allocation5 + $0x548] ss:$16 sps:$4 sm:$0xff]   ;;  %v6646_v50 = vld [vmem:[#allocation5 + $0x744] ss:$16 sps:$4 sm:$0xff]  }
 0x176   : > { %v7801_v19 = vpop.f32.mrb[5].mxu1  ;;  %3181 = vmatprep.subr.bf16.mxu0 %v6634_v36  ;;  %v6631_v36 = vld [vmem:[#allocation5 + $0x56c] ss:$16 sps:$4 sm:$0xff]   ;;  %v320_v42 = vld [vmem:[%s7429_s12 + $0x1d0] sm:$0xff] }
 0x177   : > { %v7805_v8 = vpop.f32.mrb[6].mxu1 }
 0x178   : > { %v7809_v44 = vpop.f32.mrb[7].mxu1  ;;  %3761 = vmatpush1.bf16.msra.mxu1 %v6596_v45  ;;  %v6644_v45 = vld [vmem:[#allocation5 + $0x740] ss:$16 sps:$4 sm:$0xff]  }
 0x179   : > { %3762 = vmatprep.subr.bf16.mxu1 %v6604_v13  ;;  %3182 = vmatpush1.bf16.msra.mxu0 %v6632_v47  ;;  %v324_v13 = vld [vmem:[%s7429_s12 + $0x1f0] sm:$0xff]  ;;  %v6629_v47 = vld [vmem:[#allocation5 + $0x568] ss:$16 sps:$4 sm:$0xff]  }
 0x17a   : > { %3047 = vmatmul.mubr.bf16.gmra.mrb[16].mxu0 %v7803_v61  ;;  %3626 = vmatmul.mubr.bf16.gmra.mrb[48].mxu1 %v7631_v32 }
 0x17b   : > { %3056 = vmatprep.mubr.bf16.mxu0 %v7807_v17  ;;  %3635 = vmatprep.mubr.bf16.mxu1 %v7633_v34  ;;  %v7825_v34 = vcombine.high %v312_v29, %v316_v6 }
 0x17c   : > { %3763 = vmatpush1.bf16.msra.mxu1 %v6602_v51  ;;  %3183 = vmatprep.subr.bf16.mxu0 %v6637_v60  ;;  %v6640_v60 = vld [vmem:[#allocation5 + $0x58c] ss:$16 sps:$4 sm:$0xff]  }
 0x17d   : > { %v7817_v20 = vpop.f32.mrb[8].mxu1  ;;  %3764 = vmatprep.subr.bf16.mxu1 %v6613_v11  ;;  %3184 = vmatpush1.bf16.msra.mxu0 %v6635_v5  ;;  %v6650_v11 = vld [vmem:[#allocation5 + $0x760] ss:$16 sps:$4 sm:$0xff]  }
 0x17e   : > { %v7819_v25 = vpop.f32.mrb[9].mxu1  ;;  %3185 = vmatprep.subr.bf16.mxu0 %v6643_v43  ;;  %v7839_v43 = vcombine.low %v312_v29, %v316_v6  ;;  %v6661_v29 = vld [vmem:[#allocation5 + $0x7a4] ss:$16 sps:$4 sm:$0xff]  }
 0x17f   : > { %v7823_v32 = vpop.f32.mrb[10].mxu1  ;;  %v328_v6 = vld [vmem:[%s7429_s12 + $0x210] sm:$0xff] }
 0x180   : > { %v7827_v63 = vpop.f32.mrb[11].mxu1  ;;  %3765 = vmatpush1.bf16.msra.mxu1 %v6611_v48 }
 0x181   : > { %3766 = vmatprep.subr.bf16.mxu1 %v6622_v7  ;;  %3186 = vmatpush1.bf16.msra.mxu0 %v6641_v31  ;;  %v6638_v7 = vld [vmem:[#allocation5 + $0x588] ss:$16 sps:$4 sm:$0xff]   ;;  %v6655_v31 = vld [vmem:[#allocation5 + $0x784] ss:$16 sps:$4 sm:$0xff]  }
 0x182   : > { %3057 = vmatmul.mubr.bf16.gmra.mrb[20].mxu0 %v7821_v49  ;;  %3636 = vmatmul.mubr.bf16.gmra.mrb[52].mxu1 %v7641_v54 }
 0x183   : > { %3066 = vmatprep.mubr.bf16.mxu0 %v7825_v34  ;;  %3645 = vmatprep.mubr.bf16.mxu1 %v7643_v58  ;;  %v7843_v58 = vcombine.high %v320_v42, %v324_v13 }
 0x184   : > { %3767 = vmatpush1.bf16.msra.mxu1 %v6620_v38  ;;  %3187 = vmatprep.subr.bf16.mxu0 %v6646_v50  ;;  %v6649_v38 = vld [vmem:[#allocation5 + $0x5ac] ss:$16 sps:$4 sm:$0xff]   ;;  %v6653_v50 = vld [vmem:[#allocation5 + $0x780] ss:$16 sps:$4 sm:$0xff]  }
 0x185   : > { %v7835_v51 = vpop.f32.mrb[12].mxu1  ;;  %3768 = vmatprep.subr.bf16.mxu1 %v6631_v36  ;;  %3188 = vmatpush1.bf16.msra.mxu0 %v6644_v45  ;;  %v332_v36 = vld [vmem:[%s7429_s12 + $0x230] sm:$0xff]  ;;  %v6647_v45 = vld [vmem:[#allocation5 + $0x5a8] ss:$16 sps:$4 sm:$0xff]  }
 0x186   : > { %v7837_v5 = vpop.f32.mrb[13].mxu1  ;;  %3189 = vmatprep.subr.bf16.mxu0 %v6652_v40 }
 0x187   : > { %v7841_v54 = vpop.f32.mrb[14].mxu1 }
 0x188   : > { %v7845_v48 = vpop.f32.mrb[15].mxu1  ;;  %3769 = vmatpush1.bf16.msra.mxu1 %v6629_v47  ;;  %v6658_v47 = vld [vmem:[#allocation5 + $0x5cc] ss:$16 sps:$4 sm:$0xff]  }
 0x189   : > { %8869 = vst [vmem:[#allocation11_spill] sm:$0xff] %v7845_v48  ;;  %3770 = vmatprep.subr.bf16.mxu1 %v6640_v60  ;;  %3190 = vmatpush1.bf16.msra.mxu0 %v6650_v11  ;;  %v6659_v60 = vld [vmem:[#allocation5 + $0x7a0] ss:$16 sps:$4 sm:$0xff]   ;;  %v7857_v48 = vcombine.low %v320_v42, %v324_v13  ;;  %v6670_v42 = vld [vmem:[#allocation5 + $0x7e4] ss:$16 sps:$4 sm:$0xff]  }
 0x18a   : > { %3067 = vmatmul.mubr.bf16.gmra.mrb[24].mxu0 %v7839_v43  ;;  %3646 = vmatmul.mubr.bf16.gmra.mrb[56].mxu1 %v7651_v12  ;;  %v336_v13 = vld [vmem:[%s7429_s12 + $0x250] sm:$0xff] }
 0x18b   : > { %3076 = vmatprep.mubr.bf16.mxu0 %v7843_v58  ;;  %3655 = vmatprep.mubr.bf16.mxu1 %v7653_v18  ;;  %v7861_v18 = vcombine.high %v328_v6, %v332_v36 }
 0x18c   : > { %3771 = vmatpush1.bf16.msra.mxu1 %v6638_v7  ;;  %3191 = vmatprep.subr.bf16.mxu0 %v6655_v31  ;;  %v6656_v31 = vld [vmem:[#allocation5 + $0x5c8] ss:$16 sps:$4 sm:$0xff]  }
 0x18d   : > { %v7853_v40 = vpop.f32.mrb[16].mxu1  ;;  %3772 = vmatprep.subr.bf16.mxu1 %v6649_v38  ;;  %3192 = vmatpush1.bf16.msra.mxu0 %v6653_v50  ;;  %v6662_v38 = vld [vmem:[#allocation5 + $0x7c0] ss:$16 sps:$4 sm:$0xff]   ;;  %v6667_v50 = vld [vmem:[#allocation5 + $0x5ec] ss:$16 sps:$4 sm:$0xff]  }
 0x18e   : > { %8870 = vst [vmem:[#allocation12_spill] sm:$0xff] %v7853_v40  ;;  %v7855_v11 = vpop.f32.mrb[17].mxu1  ;;  %3193 = vmatprep.subr.bf16.mxu0 %v6661_v29  ;;  %v6664_v40 = vld [vmem:[#allocation5 + $0x7c4] ss:$16 sps:$4 sm:$0xff]  }
 0x18f   : > { %8871 = vst [vmem:[#allocation13_spill] sm:$0xff] %v7855_v11  ;;  %v7859_v12 = vpop.f32.mrb[18].mxu1  ;;  %v340_v29 = vld [vmem:[%s7429_s12 + $0x270] sm:$0xff] }
 0x190   : > { %8872 = vst [vmem:[#allocation14_spill] sm:$0xff] %v7859_v12  ;;  %v7863_v7 = vpop.f32.mrb[19].mxu1  ;;  %3773 = vmatpush1.bf16.msra.mxu1 %v6647_v45  ;;  %v6665_v45 = vld [vmem:[#allocation5 + $0x5e8] ss:$16 sps:$4 sm:$0xff]  }
 0x191   : > { %8873 = vst [vmem:[#allocation15_spill] sm:$0xff] %v7863_v7  ;;  %3774 = vmatprep.subr.bf16.mxu1 %v6658_v47  ;;  %3194 = vmatpush1.bf16.msra.mxu0 %v6659_v60  ;;  %v6668_v47 = vld [vmem:[#allocation5 + $0x7e0] ss:$16 sps:$4 sm:$0xff]   ;;  %v6673_v60 = vld [vmem:[#allocation5 + $0x60c] ss:$16 sps:$4 sm:$0xff]  }
 0x192   : > { %3077 = vmatmul.mubr.bf16.gmra.mrb[28].mxu0 %v7857_v48  ;;  %3656 = vmatmul.mubr.bf16.gmra.mrb[60].mxu1 %v7661_v33  ;;  %v7875_v33 = vcombine.low %v328_v6, %v332_v36  ;;  %v344_v6 = vld [vmem:[%s7429_s12 + $0x290] sm:$0xff] }
 0x193   : > { %3086 = vmatprep.mubr.bf16.mxu0 %v7861_v18  ;;  %3665 = vmatprep.mubr.bf16.mxu1 %v7663_v30  ;;  %v7879_v30 = vcombine.high %v336_v13, %v340_v29  ;;  %v348_v36 = vld [vmem:[%s7429_s12 + $0x2b0] sm:$0xff] }
 0x194   : > { %3775 = vmatpush1.bf16.msra.mxu1 %v6656_v31  ;;  %3195 = vmatprep.subr.bf16.mxu0 %v6664_v40 }
 0x195   : > { %v7871_v7 = vpop.f32.mrb[20].mxu1  ;;  %3776 = vmatprep.subr.bf16.mxu1 %v6667_v50  ;;  %3196 = vmatpush1.bf16.msra.mxu0 %v6662_v38  ;;  %v7893_v50 = vcombine.low %v336_v13, %v340_v29 }
 0x196   : > { %v7873_v12 = vpop.f32.mrb[21].mxu1  ;;  %3197 = vmatprep.subr.bf16.mxu0 %v6670_v42 }
 0x197   : > { %v7877_v11 = vpop.f32.mrb[22].mxu1 }
 0x198   : > { %v7881_v31 = vpop.f32.mrb[23].mxu1  ;;  %3777 = vmatpush1.bf16.msra.mxu1 %v6665_v45  ;;  %v7897_v45 = vcombine.high %v344_v6, %v348_v36 }
 0x199   : > { %3198 = vmatpush1.bf16.msra.mxu0 %v6668_v47  ;;  %3939 = vmatprep.subr.bf16.mxu1 %v6673_v60  ;;  %v7911_v60 = vcombine.low %v344_v6, %v348_v36  ;;  %v364_v6 = vld [vmem:[%s7429_s12 + $0x330] sm:$0xff] }
 0x19a   : > { %3087 = vmatmul.mubr.bf16.gmra.mrb[32].mxu0 %v7875_v33  ;;  %3666 = vmatmul.mubr.bf16.gmra.mrb[64].mxu1 %v7671_v59  ;;  %v352_v59 = vld [vmem:[%s7429_s12 + $0x2d0] sm:$0xff] }
 0x19b   : > { %3096 = vmatprep.mubr.bf16.mxu0 %v7879_v30  ;;  %3675 = vmatprep.mubr.bf16.mxu1 %v7673_v46  ;;  %v356_v46 = vld [vmem:[%s7429_s12 + $0x2f0] sm:$0xff] }
 0x19c   : > { %v7925_v36 = vcombine.low %v352_v59, %v356_v46 }
 0x19d   : > { %v7889_v40 = vpop.f32.mrb[24].mxu1 }
 0x19e   : > { %8874 = vst [vmem:[#allocation16_spill] sm:$0xff] %v7889_v40  ;;  %v7891_v38 = vpop.f32.mrb[25].mxu1  ;;  %v6677_v40 = vld [vmem:[#allocation5 + $0x648] ss:$16 sps:$4 sm:$0xff]  }
 0x19f   : > { %8875 = vst [vmem:[#allocation17_spill] sm:$0xff] %v7891_v38  ;;  %v7895_v42 = vpop.f32.mrb[26].mxu1 }
 0x1a0   : > { %8876 = vst [vmem:[#allocation18_spill] sm:$0xff] %v7895_v42  ;;  %v7899_v47 = vpop.f32.mrb[27].mxu1  ;;  %v7915_v42 = vcombine.high %v352_v59, %v356_v46  ;;  %v380_v59 = vld [vmem:[%s7429_s12 + $0x3b0] sm:$0xff] }
 0x1a1   : > { %8877 = vst [vmem:[#allocation19_spill] sm:$0xff] %v7899_v47 }
 0x1a2   : > { %3097 = vmatmul.mubr.bf16.gmra.mrb[36].mxu0 %v7893_v50  ;;  %3676 = vmatmul.mubr.bf16.gmra.mrb[68].mxu1 %v7681_v2 }
 0x1a3   : > { %3106 = vmatprep.mubr.bf16.mxu0 %v7897_v45  ;;  %3685 = vmatprep.mubr.bf16.mxu1 %v7683_v56  ;;  %v360_v56 = vld [vmem:[%s7429_s12 + $0x310] sm:$0xff] }
 0x1a5   : > { %v7907_v13 = vpop.f32.mrb[28].mxu1 }
 0x1a6   : > { %8878 = vst [vmem:[#allocation20_spill] sm:$0xff] %v7907_v13  ;;  %v7909_v29 = vpop.f32.mrb[29].mxu1 }
 0x1a7   : > { %8879 = vst [vmem:[#allocation21_spill] sm:$0xff] %v7909_v29  ;;  %v7913_v47 = vpop.f32.mrb[30].mxu1 }
 0x1a8   : > { %8880 = vst [vmem:[#allocation22_spill] sm:$0xff] %v7913_v47  ;;  %v7917_v2 = vpop.f32.mrb[31].mxu1  ;;  %v7927_v47 = vcombine.high %v360_v56, %v364_v6 }
 0x1a9   : > { %8881 = vst [vmem:[#allocation23_spill] sm:$0xff] %v7917_v2  ;;  %v372_v2 = vld [vmem:[%s7429_s12 + $0x370] sm:$0xff] }
 0x1aa   : > { %3107 = vmatmul.mubr.bf16.gmra.mrb[40].mxu0 %v7911_v60  ;;  %3686 = vmatmul.mubr.bf16.gmra.mrb[72].mxu1 %v7691_v62  ;;  %v368_v62 = vld [vmem:[%s7429_s12 + $0x350] sm:$0xff] }
 0x1ab   : > { %3116 = vmatprep.mubr.bf16.mxu0 %v7915_v42  ;;  %3695 = vmatprep.mubr.bf16.mxu1 %v7693_v0  ;;  %v7935_v0 = vcombine.low %v360_v56, %v364_v6  ;;  %v7937_v29 = vcombine.high %v368_v62, %v372_v2  ;;  %v388_v56 = vld [vmem:[%s7429_s12 + $0x3f0] sm:$0xff] }
 0x1b2   : > { %3117 = vmatmul.mubr.bf16.gmra.mrb[44].mxu0 %v7925_v36  ;;  %3696 = vmatmul.mubr.bf16.gmra.mrb[76].mxu1 %v7701_v3  ;;  %v376_v3 = vld [vmem:[%s7429_s12 + $0x390] sm:$0xff] }
 0x1b3   : > { %3126 = vmatprep.mubr.bf16.mxu0 %v7927_v47  ;;  %3705 = vmatprep.mubr.bf16.mxu1 %v7703_v4  ;;  %v7945_v4 = vcombine.low %v368_v62, %v372_v2  ;;  %v7947_v46 = vcombine.high %v376_v3, %v380_v59  ;;  %v269_v2 = vld [vmem:[%s7429_s12 + $0x38] sm:$0xff] }
 0x1ba   : > { %3127 = vmatmul.mubr.bf16.gmra.mrb[48].mxu0 %v7935_v0  ;;  %3706 = vmatmul.mubr.bf16.gmra.mrb[80].mxu1 %v7711_v21  ;;  %v384_v21 = vld [vmem:[%s7429_s12 + $0x3d0] sm:$0xff] }
 0x1bb   : > { %3136 = vmatprep.mubr.bf16.mxu0 %v7937_v29  ;;  %3715 = vmatprep.mubr.bf16.mxu1 %v7713_v10  ;;  %v7955_v10 = vcombine.low %v376_v3, %v380_v59  ;;  %v7957_v6 = vcombine.high %v384_v21, %v388_v56  ;;  %v7965_v62 = vcombine.low %v384_v21, %v388_v56  ;;  %v277_v3 = vld [vmem:[%s7429_s12 + $0x78] sm:$0xff] }
 0x1bc   : > { %v6676_v21 = vld [vmem:[#allocation5 + $0x62c] ss:$16 sps:$4 sm:$0xff]  }
 0x1bd   : > { %v285_v56 = vld [vmem:[%s7429_s12 + $0xb8] sm:$0xff] }
 0x1c2   : > { %3137 = vmatmul.mubr.bf16.gmra.mrb[52].mxu0 %v7945_v4  ;;  %3716 = vmatmul.mubr.bf16.gmra.mrb[84].mxu1 %v7721_v37  ;;  %v265_v37 = vld [vmem:[%s7429_s12 + $0x18] sm:$0xff] }
 0x1c3   : > { %3146 = vmatprep.mubr.bf16.mxu0 %v7947_v46  ;;  %3725 = vmatprep.mubr.bf16.mxu1 %v7723_v22  ;;  %v7967_v22 = vcombine.high %v265_v37, %v269_v2  ;;  %v7975_v59 = vcombine.low %v265_v37, %v269_v2  ;;  %v6679_v37 = vld [vmem:[#allocation5 + $0x64c] ss:$16 sps:$4 sm:$0xff]  }
 0x1ca   : > { %3147 = vmatmul.mubr.bf16.gmra.mrb[56].mxu0 %v7955_v10  ;;  %3726 = vmatmul.mubr.bf16.gmra.mrb[88].mxu1 %v7731_v57  ;;  %v273_v57 = vld [vmem:[%s7429_s12 + $0x58] sm:$0xff] }
 0x1cb   : > { %3156 = vmatprep.mubr.bf16.mxu0 %v7957_v6  ;;  %3735 = vmatprep.mubr.bf16.mxu1 %v7733_v14  ;;  %v6671_v14 = vld [vmem:[#allocation5 + $0x608] ss:$16 sps:$4 sm:$0xff]   ;;  %v7977_v13 = vcombine.high %v273_v57, %v277_v3  ;;  %v7985_v2 = vcombine.low %v273_v57, %v277_v3 }
 0x1cc   : > { %v293_v57 = vld [vmem:[%s7429_s12 + $0xf8] sm:$0xff] }
 0x1cd   : > { %v6680_v3 = vld [vmem:[#allocation5 + $0x668] ss:$16 sps:$4 sm:$0xff]  }
 0x1d2   : > { %3157 = vmatmul.mubr.bf16.gmra.mrb[60].mxu0 %v7965_v62  ;;  %3736 = vmatmul.mubr.bf16.gmra.mrb[92].mxu1 %v7741_v24  ;;  %v6674_v24 = vld [vmem:[#allocation5 + $0x628] ss:$16 sps:$4 sm:$0xff]  }
 0x1d3   : > { %3199 = vmatprep.mubr.bf16.mxu0 %v7967_v22  ;;  %3778 = vmatprep.mubr.bf16.mxu1 %v7743_v16  ;;  %v281_v16 = vld [vmem:[%s7429_s12 + $0x98] sm:$0xff] }
 0x1d4   : > { %v7987_v38 = vcombine.high %v281_v16, %v285_v56 }
 0x1da   : > { %3200 = vmatmul.mubr.bf16.vlgmr.msra.gmra.mrb[0].mxu0 %v7975_v59  ;;  %3779 = vmatmul.mubr.bf16.vlgmr.msra.gmra.mrb[32].mxu1 %v7751_v15  ;;  %v6682_v15 = vld [vmem:[#allocation5 + $0x66c] ss:$16 sps:$4 sm:$0xff]  }
 0x1db   : > { %3940 = vmatpush1.bf16.msra.mxu1 %v6671_v14  ;;  %3209 = vmatprep.mubr.bf16.mxu0 %v7977_v13  ;;  %v6685_v14 = vld [vmem:[#allocation5 + $0x68c] ss:$16 sps:$4 sm:$0xff]  }
 0x1dc   : > { %3788 = vmatprep.mubr.bf16.mxu1 %v7753_v26  ;;  %3941 = vmatprep.subr.bf16.mxu1 %v6676_v21  ;;  %v289_v26 = vld [vmem:[%s7429_s12 + $0xd8] sm:$0xff]  ;;  %v7995_v21 = vcombine.low %v281_v16, %v285_v56 }
 0x1dd   : > { %v6686_v16 = vld [vmem:[#allocation5 + $0x6a8] ss:$16 sps:$4 sm:$0xff]   ;;  %v6691_v56 = vld [vmem:[#allocation5 + $0x6cc] ss:$16 sps:$4 sm:$0xff]  }
 0x1df   : > { %3942 = vmatpush1.bf16.msra.mxu1 %v6674_v24  ;;  %v7997_v24 = vcombine.high %v289_v26, %v293_v57 }
 0x1e0   : > { %3943 = vmatprep.subr.bf16.mxu1 %v6679_v37  ;;  %v6683_v37 = vld [vmem:[#allocation5 + $0x688] ss:$16 sps:$4 sm:$0xff]  }
 0x1e2   : > { %3210 = vmatmul.mubr.bf16.gmra.mrb[4].mxu0 %v7985_v2  ;;  %3789 = vmatmul.mubr.bf16.gmra.mrb[36].mxu1 %v7761_v41  ;;  %v6688_v41 = vld [vmem:[#allocation5 + $0x6ac] ss:$16 sps:$4 sm:$0xff]  }
 0x1e3   : > { %3219 = vmatprep.mubr.bf16.mxu0 %v7987_v38  ;;  %3798 = vmatprep.mubr.bf16.mxu1 %v7763_v9  ;;  %v297_v9 = vld [vmem:[%s7429_s12 + $0x118] sm:$0xff] }
 0x1e4   : > { %3944 = vmatpush1.bf16.msra.mxu1 %v6677_v40  ;;  %v301_v40 = vld [vmem:[%s7429_s12 + $0x138] sm:$0xff] }
 0x1e5   : > { %3945 = vmatprep.subr.bf16.mxu1 %v6682_v15  ;;  %v8005_v15 = vcombine.low %v289_v26, %v293_v57  ;;  %v6692_v26 = vld [vmem:[#allocation5 + $0x6e8] ss:$16 sps:$4 sm:$0xff]   ;;  %v6697_v57 = vld [vmem:[#allocation5 + $0x70c] ss:$16 sps:$4 sm:$0xff]  }
 0x1e8   : > { %3946 = vmatpush1.bf16.msra.mxu1 %v6680_v3  ;;  %v8007_v3 = vcombine.high %v297_v9, %v301_v40 }
 0x1e9   : > { %3947 = vmatprep.subr.bf16.mxu1 %v6685_v14  ;;  %v6689_v14 = vld [vmem:[#allocation5 + $0x6c8] ss:$16 sps:$4 sm:$0xff]  }
 0x1ea   : > { %3220 = vmatmul.mubr.bf16.gmra.mrb[8].mxu0 %v7995_v21  ;;  %3799 = vmatmul.mubr.bf16.gmra.mrb[40].mxu1 %v7771_v1  ;;  %v6694_v1 = vld [vmem:[#allocation5 + $0x6ec] ss:$16 sps:$4 sm:$0xff]  }
 0x1eb   : > { %3229 = vmatprep.mubr.bf16.mxu0 %v7997_v24  ;;  %3808 = vmatprep.mubr.bf16.mxu1 %v7773_v27  ;;  %v305_v27 = vld [vmem:[%s7429_s12 + $0x158] sm:$0xff] }
 0x1ec   : > { %3948 = vmatpush1.bf16.msra.mxu1 %v6683_v37  ;;  %v309_v37 = vld [vmem:[%s7429_s12 + $0x178] sm:$0xff] }
 0x1ed   : > { %3949 = vmatprep.subr.bf16.mxu1 %v6688_v41  ;;  %v8015_v41 = vcombine.low %v297_v9, %v301_v40  ;;  %v6698_v9 = vld [vmem:[#allocation5 + $0x728] ss:$16 sps:$4 sm:$0xff]   ;;  %v6703_v40 = vld [vmem:[#allocation5 + $0x74c] ss:$16 sps:$4 sm:$0xff]  }
 0x1f0   : > { %3950 = vmatpush1.bf16.msra.mxu1 %v6686_v16  ;;  %v8017_v16 = vcombine.high %v305_v27, %v309_v37 }
 0x1f1   : > { %3951 = vmatprep.subr.bf16.mxu1 %v6691_v56  ;;  %v6695_v56 = vld [vmem:[#allocation5 + $0x708] ss:$16 sps:$4 sm:$0xff]  }
 0x1f2   : > { %3230 = vmatmul.mubr.bf16.gmra.mrb[12].mxu0 %v8005_v15  ;;  %3809 = vmatmul.mubr.bf16.gmra.mrb[44].mxu1 %v7785_v28  ;;  %v6700_v28 = vld [vmem:[#allocation5 + $0x72c] ss:$16 sps:$4 sm:$0xff]  }
 0x1f3   : > { %3239 = vmatprep.mubr.bf16.mxu0 %v8007_v3  ;;  %3818 = vmatprep.mubr.bf16.mxu1 %v7789_v55  ;;  %v313_v55 = vld [vmem:[%s7429_s12 + $0x198] sm:$0xff] }
 0x1f4   : > { %3952 = vmatpush1.bf16.msra.mxu1 %v6689_v14  ;;  %v317_v14 = vld [vmem:[%s7429_s12 + $0x1b8] sm:$0xff] }
 0x1f5   : > { %3953 = vmatprep.subr.bf16.mxu1 %v6694_v1  ;;  %v8025_v1 = vcombine.low %v305_v27, %v309_v37  ;;  %v6704_v27 = vld [vmem:[#allocation5 + $0x768] ss:$16 sps:$4 sm:$0xff]   ;;  %v6709_v37 = vld [vmem:[#allocation5 + $0x78c] ss:$16 sps:$4 sm:$0xff]  }
 0x1f8   : > { %3954 = vmatpush1.bf16.msra.mxu1 %v6692_v26  ;;  %v8027_v26 = vcombine.high %v313_v55, %v317_v14 }
 0x1f9   : > { %3955 = vmatprep.subr.bf16.mxu1 %v6697_v57  ;;  %v6701_v57 = vld [vmem:[#allocation5 + $0x748] ss:$16 sps:$4 sm:$0xff]  }
 0x1fa   : > { %3240 = vmatmul.mubr.bf16.gmra.mrb[16].mxu0 %v8015_v41  ;;  %3819 = vmatmul.mubr.bf16.gmra.mrb[48].mxu1 %v7803_v61  ;;  %v6706_v61 = vld [vmem:[#allocation5 + $0x76c] ss:$16 sps:$4 sm:$0xff]  }
 0x1fb   : > { %3249 = vmatprep.mubr.bf16.mxu0 %v8017_v16  ;;  %3828 = vmatprep.mubr.bf16.mxu1 %v7807_v17  ;;  %v321_v17 = vld [vmem:[%s7429_s12 + $0x1d8] sm:$0xff] }
 0x1fc   : > { %3956 = vmatpush1.bf16.msra.mxu1 %v6695_v56  ;;  %v325_v56 = vld [vmem:[%s7429_s12 + $0x1f8] sm:$0xff] }
 0x1fd   : > { %3957 = vmatprep.subr.bf16.mxu1 %v6700_v28  ;;  %v8035_v28 = vcombine.low %v313_v55, %v317_v14  ;;  %v6710_v55 = vld [vmem:[#allocation5 + $0x7a8] ss:$16 sps:$4 sm:$0xff]   ;;  %v6715_v14 = vld [vmem:[#allocation5 + $0x7cc] ss:$16 sps:$4 sm:$0xff]  }
 0x200   : > { %3958 = vmatpush1.bf16.msra.mxu1 %v6698_v9  ;;  %v8037_v9 = vcombine.high %v321_v17, %v325_v56 }
 0x201   : > { %3959 = vmatprep.subr.bf16.mxu1 %v6703_v40  ;;  %v6707_v40 = vld [vmem:[#allocation5 + $0x788] ss:$16 sps:$4 sm:$0xff]  }
 0x202   : > { %3250 = vmatmul.mubr.bf16.gmra.mrb[20].mxu0 %v8025_v1  ;;  %3829 = vmatmul.mubr.bf16.gmra.mrb[52].mxu1 %v7821_v49  ;;  %v6712_v49 = vld [vmem:[#allocation5 + $0x7ac] ss:$16 sps:$4 sm:$0xff]  }
 0x203   : > { %3259 = vmatprep.mubr.bf16.mxu0 %v8027_v26  ;;  %3838 = vmatprep.mubr.bf16.mxu1 %v7825_v34  ;;  %v329_v34 = vld [vmem:[%s7429_s12 + $0x218] sm:$0xff] }
 0x204   : > { %3960 = vmatpush1.bf16.msra.mxu1 %v6701_v57  ;;  %v333_v57 = vld [vmem:[%s7429_s12 + $0x238] sm:$0xff] }
 0x205   : > { %3961 = vmatprep.subr.bf16.mxu1 %v6706_v61  ;;  %v8045_v61 = vcombine.low %v321_v17, %v325_v56  ;;  %v6716_v17 = vld [vmem:[#allocation5 + $0x7e8] ss:$16 sps:$4 sm:$0xff]   ;;  %v8055_v56 = vcombine.low %v329_v34, %v333_v57 }
 0x208   : > { %3962 = vmatpush1.bf16.msra.mxu1 %v6704_v27  ;;  %v8047_v27 = vcombine.high %v329_v34, %v333_v57  ;;  %v357_v57 = vld [vmem:[%s7429_s12 + $0x2f8] sm:$0xff] }
 0x209   : > { %3963 = vmatprep.subr.bf16.mxu1 %v6709_v37  ;;  %v6713_v37 = vld [vmem:[#allocation5 + $0x7c8] ss:$16 sps:$4 sm:$0xff]  }
 0x20a   : > { %3260 = vmatmul.mubr.bf16.gmra.mrb[24].mxu0 %v8035_v28  ;;  %3839 = vmatmul.mubr.bf16.gmra.mrb[56].mxu1 %v7839_v43  ;;  %v6718_v43 = vld [vmem:[#allocation5 + $0x7ec] ss:$16 sps:$4 sm:$0xff]  }
 0x20b   : > { %3269 = vmatprep.mubr.bf16.mxu0 %v8037_v9  ;;  %3848 = vmatprep.mubr.bf16.mxu1 %v7843_v58  ;;  %v337_v58 = vld [vmem:[%s7429_s12 + $0x258] sm:$0xff] }
 0x20c   : > { %3964 = vmatpush1.bf16.msra.mxu1 %v6707_v40  ;;  %v341_v40 = vld [vmem:[%s7429_s12 + $0x278] sm:$0xff] }
 0x20d   : > { %3965 = vmatprep.subr.bf16.mxu1 %v6712_v49  ;;  %v8057_v49 = vcombine.high %v337_v58, %v341_v40 }
 0x210   : > { %3966 = vmatpush1.bf16.msra.mxu1 %v6710_v55  ;;  %v8065_v55 = vcombine.low %v337_v58, %v341_v40  ;;  %v373_v58 = vld [vmem:[%s7429_s12 + $0x378] sm:$0xff] }
 0x211   : > { %3967 = vmatprep.subr.bf16.mxu1 %v6715_v14 }
 0x212   : > { %3270 = vmatmul.mubr.bf16.gmra.mrb[28].mxu0 %v8045_v61  ;;  %3849 = vmatmul.mubr.bf16.gmra.mrb[60].mxu1 %v7857_v48  ;;  %v345_v48 = vld [vmem:[%s7429_s12 + $0x298] sm:$0xff] }
 0x213   : > { %3279 = vmatprep.mubr.bf16.mxu0 %v8047_v27  ;;  %3858 = vmatprep.mubr.bf16.mxu1 %v7861_v18  ;;  %v349_v18 = vld [vmem:[%s7429_s12 + $0x2b8] sm:$0xff] }
 0x214   : > { %3968 = vmatpush1.bf16.msra.mxu1 %v6713_v37  ;;  %v8067_v34 = vcombine.high %v345_v48, %v349_v18  ;;  %v365_v37 = vld [vmem:[%s7429_s12 + $0x338] sm:$0xff] }
 0x215   : > { %3969 = vmatprep.subr.bf16.mxu1 %v6718_v43 }
 0x218   : > { %3970 = vmatpush1.bf16.msra.mxu1 %v6716_v17  ;;  %v381_v17 = vld [vmem:[%s7429_s12 + $0x3b8] sm:$0xff] }
 0x21a   : > { %3280 = vmatmul.mubr.bf16.gmra.mrb[32].mxu0 %v8055_v56  ;;  %3859 = vmatmul.mubr.bf16.gmra.mrb[64].mxu1 %v7875_v33  ;;  %v353_v33 = vld [vmem:[%s7429_s12 + $0x2d8] sm:$0xff] }
 0x21b   : > { %3289 = vmatprep.mubr.bf16.mxu0 %v8057_v49  ;;  %3868 = vmatprep.mubr.bf16.mxu1 %v7879_v30  ;;  %v8075_v30 = vcombine.low %v345_v48, %v349_v18  ;;  %v8077_v14 = vcombine.high %v353_v33, %v357_v57  ;;  %v385_v18 = vld [vmem:[%s7429_s12 + $0x3d8] sm:$0xff] }
 0x222   : > { %3290 = vmatmul.mubr.bf16.gmra.mrb[36].mxu0 %v8065_v55  ;;  %3869 = vmatmul.mubr.bf16.gmra.mrb[68].mxu1 %v7893_v50  ;;  %v361_v50 = vld [vmem:[%s7429_s12 + $0x318] sm:$0xff] }
 0x223   : > { %3299 = vmatprep.mubr.bf16.mxu0 %v8067_v34  ;;  %3878 = vmatprep.mubr.bf16.mxu1 %v7897_v45  ;;  %v8085_v45 = vcombine.low %v353_v33, %v357_v57  ;;  %v8087_v43 = vcombine.high %v361_v50, %v365_v37 }
 0x22a   : > { %3300 = vmatmul.mubr.bf16.gmra.mrb[40].mxu0 %v8075_v30  ;;  %3879 = vmatmul.mubr.bf16.gmra.mrb[72].mxu1 %v7911_v60  ;;  %v369_v60 = vld [vmem:[%s7429_s12 + $0x358] sm:$0xff] }
 0x22b   : > { %3309 = vmatprep.mubr.bf16.mxu0 %v8077_v14  ;;  %3888 = vmatprep.mubr.bf16.mxu1 %v7915_v42  ;;  %v8095_v42 = vcombine.low %v361_v50, %v365_v37  ;;  %v8097_v40 = vcombine.high %v369_v60, %v373_v58  ;;  %v8105_v48 = vcombine.low %v369_v60, %v373_v58  ;;  %v6734_v58 = vld [vmem:[%s8848_s3 + $0x38] sm:$0xff]  }
 0x232   : > { %3310 = vmatmul.mubr.bf16.gmra.mrb[44].mxu0 %v8085_v45  ;;  %3889 = vmatmul.mubr.bf16.gmra.mrb[76].mxu1 %v7925_v36  ;;  %v377_v36 = vld [vmem:[%s7429_s12 + $0x398] sm:$0xff] }
 0x233   : > { %3319 = vmatprep.mubr.bf16.mxu0 %v8087_v43  ;;  %3898 = vmatprep.mubr.bf16.mxu1 %v7927_v47  ;;  %v8107_v47 = vcombine.high %v377_v36, %v381_v17  ;;  %v8115_v33 = vcombine.low %v377_v36, %v381_v17 }
 0x23a   : > { %3320 = vmatmul.mubr.bf16.gmra.mrb[48].mxu0 %v8095_v42  ;;  %3899 = vmatmul.mubr.bf16.gmra.mrb[80].mxu1 %v7935_v0  ;;  %v389_v0 = vld [vmem:[%s7429_s12 + $0x3f8] sm:$0xff]  ;;  %s7177_s12 = scalar_lea.vmem %s8798_s13, 256 }
 0x23b   : > { %3329 = vmatprep.mubr.bf16.mxu0 %v8097_v40  ;;  %3908 = vmatprep.mubr.bf16.mxu1 %v7937_v29  ;;  %v8117_v57 = vcombine.high %v385_v18, %v389_v0  ;;  %v8123_v29 = vcombine.low %v385_v18, %v389_v0  ;;  %v648_v18 = vlaneseq  ;;  %p7178_p4 = scmp.ne.s32.totalorder %s8798_s13, %s7177_s12  ;;  %p7185_p13 = scmp.lt.s32.totalorder %s7183_s26, %s7177_s12 }
 0x23d   : > { %p7179_p6 = pnand %p7178_p4, %p7377_p12  ;;  %p7186_p3 = por %p7185_p13, %p7184_p10 }
 0x23f   : > { %p7180_p8 = pneg %p7179_p6 }
 0x241   : > { %p7187_p7 = pnand %p7186_p3, %p7180_p8 }
 0x242   : > { %3330 = vmatmul.mubr.bf16.gmra.mrb[52].mxu0 %v8105_v48  ;;  %3909 = vmatmul.mubr.bf16.gmra.mrb[84].mxu1 %v7945_v4  ;;  %v6719_v4 = vld [vmem:[%s8848_s3 + $0x40] sm:$0xff]  }
 0x243   : > { %3339 = vmatprep.mubr.bf16.mxu0 %v8107_v47  ;;  %3918 = vmatprep.mubr.bf16.mxu1 %v7947_v46  ;;  %v6720_v46 = vld [vmem:[%s8848_s3] sm:$0xff]  }
 0x244   : > { %5618 = vmatprep.subr.bf16.mxu0 %v6719_v4  ;;  %v8261_v4 = vshrl.u32 %v648_v18, 7 }
 0x245   : > { %5619 = vmatpush3.bf16.msra.mxu0 %v6720_v46 }
 0x246   : > { %8882 = vst [vmem:[#allocation24_spill] sm:$0xff] %v8261_v4 }
 0x24a   : > { %3340 = vmatmul.mubr.bf16.gmra.mrb[56].mxu0 %v8115_v33  ;;  %3919 = vmatmul.mubr.bf16.gmra.mrb[88].mxu1 %v7955_v10  ;;  %v6721_v10 = vld [vmem:[%s8848_s3 + $0x48] sm:$0xff]  }
 0x24b   : > { %3349 = vmatprep.mubr.bf16.mxu0 %v8117_v57  ;;  %3928 = vmatprep.mubr.bf16.mxu1 %v7957_v6  ;;  %v6722_v6 = vld [vmem:[%s8848_s3 + $0x8] sm:$0xff]  }
 0x24c   : > { %5620 = vmatprep.subr.bf16.mxu0 %v6721_v10  ;;  %v8269_v10 = vld [vmem:[%s8847_s2] sm:$0xf] }
 0x24d   : > { %5621 = vmatpush3.bf16.msra.mxu0 %v6722_v6  ;;  %8883 = vst [vmem:[#allocation25_spill] sm:$0xff] %v8269_v10  ;;  %v654_v6 = vsub.s32 1, %v8261_v4 }
 0x252   : > { %3350 = vmatmul.mubr.bf16.gmra.mrb[60].mxu0 %v8123_v29  ;;  %3929 = vmatmul.mubr.bf16.gmra.mrb[92].mxu1 %v7965_v62  ;;  %v6725_v62 = vld [vmem:[%s8848_s3 + $0x58] sm:$0xff]  }
 0x253   : > { %3971 = vmatprep.mubr.bf16.mxu1 %v7967_v22  ;;  %v6726_v22 = vld [vmem:[%s8848_s3 + $0x18] sm:$0xff]  }
 0x25a   : > { %3972 = vmatmul.mubr.bf16.vlgmr.msra.gmra.mrb[32].mxu1 %v7975_v59  ;;  %v6727_v59 = vld [vmem:[%s8848_s3 + $0x60] sm:$0xff]  }
 0x25b   : > { %3981 = vmatprep.mubr.bf16.mxu1 %v7977_v13  ;;  %v6724_v13 = vld [vmem:[%s8848_s3 + $0x10] sm:$0xff]  }
 0x262   : > { %3982 = vmatmul.mubr.bf16.gmra.mrb[36].mxu1 %v7985_v2  ;;  %v6728_v2 = vld [vmem:[%s8848_s3 + $0x20] sm:$0xff]  }
 0x263   : > { %3991 = vmatprep.mubr.bf16.mxu1 %v7987_v38  ;;  %v6723_v38 = vld [vmem:[%s8848_s3 + $0x50] sm:$0xff]  }
 0x264   : > { %5622 = vmatprep.subr.bf16.mxu0 %v6723_v38 }
 0x265   : > { %5623 = vmatpush3.bf16.msra.mxu0 %v6724_v13 }
 0x266   : > { %5624 = vmatprep.subr.bf16.mxu0 %v6725_v62 }
 0x269   : > { %5625 = vmatpush3.bf16.msra.mxu0 %v6726_v22 }
 0x26a   : > { %3992 = vmatmul.mubr.bf16.gmra.mrb[40].mxu1 %v7995_v21  ;;  %5626 = vmatprep.subr.bf16.mxu0 %v6727_v59  ;;  %v6729_v21 = vld [vmem:[%s8848_s3 + $0x68] sm:$0xff]  }
 0x26b   : > { %4001 = vmatprep.mubr.bf16.mxu1 %v7997_v24  ;;  %v6730_v24 = vld [vmem:[%s8848_s3 + $0x28] sm:$0xff]  }
 0x26d   : > { %5627 = vmatpush3.bf16.msra.mxu0 %v6728_v2  ;;  %v8284_v2 = vrot.slane %v8269_v10, %v654_v6 }
 0x26e   : > { %5628 = vmatprep.subr.bf16.mxu0 %v6729_v21 }
 0x26f   : > { %v2709_v18 = vadd.f32 %v7791_v35, %v8284_v2 }
 0x271   : > { %5629 = vmatpush3.bf16.msra.mxu0 %v6730_v24  ;;  %v2705_v24 = vadd.f32 %v7783_v39, %v8284_v2 }
 0x272   : > { %4002 = vmatmul.mubr.bf16.gmra.mrb[44].mxu1 %v8005_v15 }
 0x273   : > { %4011 = vmatprep.mubr.bf16.mxu1 %v8007_v3 }
 0x27a   : > { %4012 = vmatmul.mubr.bf16.gmra.mrb[48].mxu1 %v8015_v41 }
 0x27b   : > { %4021 = vmatprep.mubr.bf16.mxu1 %v8017_v16 }
 0x282   : > { %4022 = vmatmul.mubr.bf16.gmra.mrb[52].mxu1 %v8025_v1 }
 0x283   : > { %4031 = vmatprep.mubr.bf16.mxu1 %v8027_v26 }
 0x28a   : > { %4032 = vmatmul.mubr.bf16.gmra.mrb[56].mxu1 %v8035_v28 }
 0x28b   : > { %4041 = vmatprep.mubr.bf16.mxu1 %v8037_v9 }
 0x292   : > { %4042 = vmatmul.mubr.bf16.gmra.mrb[60].mxu1 %v8045_v61 }
 0x293   : > { %4051 = vmatprep.mubr.bf16.mxu1 %v8047_v27 }
 0x29a   : > { %4052 = vmatmul.mubr.bf16.gmra.mrb[64].mxu1 %v8055_v56 }
 0x29b   : > { %4061 = vmatprep.mubr.bf16.mxu1 %v8057_v49 }
 0x2a2   : > { %4062 = vmatmul.mubr.bf16.gmra.mrb[68].mxu1 %v8065_v55  ;;  %v6731_v55 = vld [vmem:[%s8848_s3 + $0x70] sm:$0xff]  }
 0x2a3   : > { %4071 = vmatprep.mubr.bf16.mxu1 %v8067_v34  ;;  %v6732_v34 = vld [vmem:[%s8848_s3 + $0x30] sm:$0xff]   ;;  %5630 = vmatprep.subr.bf16.mxu0 %v6731_v55 }
 0x2a4   : > { %5631 = vmatpush3.bf16.msra.mxu0 %v6732_v34 }
 0x2aa   : > { %4072 = vmatmul.mubr.bf16.gmra.mrb[72].mxu1 %v8075_v30 }
 0x2ab   : > { %4081 = vmatprep.mubr.bf16.mxu1 %v8077_v14 }
 0x2ad   : > { %v8186_v15 = vpop.f32.mrb[0].mxu0 }
 0x2ae   : > { %v8188_v3 = vpop.f32.mrb[1].mxu0 }
 0x2af   : > { %v8190_v41 = vpop.f32.mrb[2].mxu0 }
 0x2b0   : > { %v8192_v16 = vpop.f32.mrb[3].mxu0 }
 0x2b2   : > { %4082 = vmatmul.mubr.bf16.gmra.mrb[76].mxu1 %v8085_v45 }
 0x2b3   : > { %4091 = vmatprep.mubr.bf16.mxu1 %v8087_v43  ;;  %v6733_v43 = vld [vmem:[%s8848_s3 + $0x78] sm:$0xff]  }
 0x2b4   : > { %5632 = vmatprep.subr.bf16.mxu0 %v6733_v43 }
 0x2b5   : > { %v8196_v1 = vpop.f32.mrb[4].mxu0  ;;  %5633 = vmatpush3.bf16.msra.mxu0 %v6734_v58 }
 0x2b6   : > { %v8198_v26 = vpop.f32.mrb[5].mxu0 }
 0x2b7   : > { %v8200_v28 = vpop.f32.mrb[6].mxu0 }
 0x2b8   : > { %v8202_v9 = vpop.f32.mrb[7].mxu0 }
 0x2ba   : > { %4092 = vmatmul.mubr.bf16.gmra.mrb[80].mxu1 %v8095_v42 }
 0x2bb   : > { %4101 = vmatprep.mubr.bf16.mxu1 %v8097_v40 }
 0x2bd   : > { %v8206_v61 = vpop.f32.mrb[8].mxu0 }
 0x2be   : > { %v8208_v27 = vpop.f32.mrb[9].mxu0 }
 0x2bf   : > { %v8210_v56 = vpop.f32.mrb[10].mxu0 }
 0x2c0   : > { %v8212_v49 = vpop.f32.mrb[11].mxu0 }
 0x2c2   : > { %4102 = vmatmul.mubr.bf16.gmra.mrb[84].mxu1 %v8105_v48 }
 0x2c3   : > { %4111 = vmatprep.mubr.bf16.mxu1 %v8107_v47 }
 0x2c5   : > { %v8222_v30 = vpop.f32.mrb[12].mxu0 }
 0x2c6   : > { %v8224_v14 = vpop.f32.mrb[13].mxu0 }
 0x2c7   : > { %v8226_v50 = vpop.f32.mrb[14].mxu0 }
 0x2c8   : > { %v8228_v37 = vpop.f32.mrb[15].mxu0 }
 0x2ca   : > { %4112 = vmatmul.mubr.bf16.gmra.mrb[88].mxu1 %v8115_v33 }
 0x2cb   : > { %4121 = vmatprep.mubr.bf16.mxu1 %v8117_v57 }
 0x2cd   : > { %v8232_v45 = vpop.f32.mrb[16].mxu0 }
 0x2ce   : > { %v8237_v60 = vpop.f32.mrb[17].mxu0 }
 0x2cf   : > { %v8242_v42 = vpop.f32.mrb[18].mxu0 }
 0x2d0   : > { %v8244_v40 = vpop.f32.mrb[19].mxu0 }
 0x2d2   : > { %4122 = vmatmul.mubr.bf16.gmra.mrb[92].mxu1 %v8123_v29  ;;  %v650_v29 = vsub.s32 0, %v8261_v4 }
 0x2d4   : > { %v8279_v22 = vrot.slane %v8269_v10, %v650_v29 }
 0x2d5   : > { %v8247_v36 = vpop.f32.mrb[20].mxu0 }
 0x2d6   : > { %v8249_v17 = vpop.f32.mrb[21].mxu0  ;;  %v2703_v21 = vadd.f32 %v7781_v23, %v8279_v22  ;;  %v2707_v34 = vadd.f32 %v7787_v53, %v8279_v22  ;;  %v2713_v39 = vadd.f32 %v7799_v52, %v8279_v22  ;;  %v2715_v53 = vadd.f32 %v7801_v19, %v8284_v2 }
 0x2d7   : > { %v8251_v48 = vpop.f32.mrb[22].mxu0  ;;  %v5762_v19 = vadd.f32 %v8186_v15, %v8279_v22 }
 0x2d8   : > { %v8253_v47 = vpop.f32.mrb[23].mxu0 }
 0x2d9   : > { %6735 = vtanh.f32 %v5762_v19  ;;  %v5771_v19 = vadd.f32 %v8208_v27, %v8284_v2  ;;  %v8885_v27 = vld [vmem:[#allocation11_spill] sm:$0xff] }
 0x2dd   : > { %v8255_v0 = vpop.f32.mrb[24].mxu0 }
 0x2de   : > { %v8257_v33 = vpop.f32.mrb[25].mxu0 }
 0x2df   : > { %v8259_v57 = vpop.f32.mrb[26].mxu0 }
 0x2e0   : > { %v8263_v46 = vpop.f32.mrb[27].mxu0 }
 0x2e5   : > { %v8272_v38 = vpop.f32.mrb[28].mxu0 }
 0x2e6   : > { %v8274_v13 = vpop.f32.mrb[29].mxu0 }
 0x2e7   : > { %v8276_v62 = vpop.f32.mrb[30].mxu0 }
 0x2e8   : > { %v8281_v59 = vpop.f32.mrb[31].mxu0 }
 0x2ed   : > { %v3281_v55 = vpop.f32.mrb[32].mxu0 }
 0x2ee   : > { %v8292_v43 = vadd.f32 %v3281_v55, %v2703_v21  ;;  %v3283_v58 = vpop.f32.mrb[33].mxu0  ;;  %v2717_v55 = vadd.f32 %v7805_v8, %v8279_v22  ;;  %v2723_v8 = vadd.f32 %v7817_v20, %v8279_v22  ;;  %v2729_v20 = vadd.f32 %v7827_v63, %v8284_v2 }
 0x2ef   : > { %v8296_v29 = vadd.f32 %v3283_v58, %v2705_v24  ;;  %v3285_v6 = vpop.f32.mrb[34].mxu0  ;;  %v2719_v24 = vadd.f32 %v7809_v44, %v8284_v2  ;;  %v2725_v44 = vadd.f32 %v7819_v25, %v8284_v2  ;;  %v5766_v25 = vadd.f32 %v8196_v1, %v8279_v22 }
 0x2f0   : > { %8884 = vst [vmem:[#allocation26_spill] sm:$0xff] %v8292_v43  ;;  %v8298_v10 = vadd.f32 %v3285_v6, %v2707_v34  ;;  %v3287_v4 = vpop.f32.mrb[35].mxu0  ;;  %v5763_v6 = vadd.f32 %v8188_v3, %v8284_v2  ;;  %v5769_v63 = vadd.f32 %v8202_v9, %v8284_v2  ;;  %v5770_v1 = vadd.f32 %v8206_v61, %v8279_v22 }
 0x2f1   : > { %v8300_v23 = vadd.f32 %v3287_v4, %v2709_v18  ;;  %v2737_v9 = vadd.f32 %v7841_v54, %v8279_v22  ;;  %v5773_v61 = vadd.f32 %v8212_v49, %v8284_v2  ;;  %v5775_v54 = vadd.f32 %v8224_v14, %v8284_v2 }
 0x2f2   : > { %6737 = vtanh.f32 %v5763_v6  ;;  %v5778_v14 = vadd.f32 %v8232_v45, %v8279_v22 }
 0x2f5   : > { %v3291_v21 = vpop.f32.mrb[36].mxu0 }
 0x2f6   : > { %v8308_v43 = vadd.f32 %v3291_v21, %v2713_v39  ;;  %v3293_v35 = vpop.f32.mrb[37].mxu0  ;;  %v5764_v39 = vadd.f32 %v8190_v41, %v8279_v22  ;;  %v2727_v21 = vadd.f32 %v7823_v32, %v8279_v22  ;;  %v5767_v32 = vadd.f32 %v8198_v26, %v8284_v2 }
 0x2f7   : > { %v8312_v34 = vadd.f32 %v3293_v35, %v2715_v53  ;;  %v3295_v4 = vpop.f32.mrb[38].mxu0  ;;  %v2733_v26 = vadd.f32 %v7835_v51, %v8279_v22 }
 0x2f8   : > { %v8314_v58 = vadd.f32 %v3295_v4, %v2717_v55  ;;  %v3297_v18 = vpop.f32.mrb[39].mxu0  ;;  %v5765_v55 = vadd.f32 %v8192_v16, %v8284_v2  ;;  %6739 = vtanh.f32 %v5764_v39  ;;  %v5768_v4 = vadd.f32 %v8200_v28, %v8279_v22 }
 0x2f9   : > { %v8316_v52 = vadd.f32 %v3297_v18, %v2719_v24  ;;  %v2735_v28 = vadd.f32 %v7837_v5, %v8284_v2  ;;  %v2739_v39 = vadd.f32 %v8885_v27, %v8284_v2  ;;  %v5774_v5 = vadd.f32 %v8222_v30, %v8279_v22 }
 0x2fa   : > { %6741 = vtanh.f32 %v5765_v55  ;;  %v8376_v55 = vpop.eup %6735  ;;  %v5777_v30 = vadd.f32 %v8228_v37, %v8284_v2 }
 0x2fb   : > { %6743 = vtanh.f32 %v5766_v25 }
 0x2fc   : > { %6745 = vtanh.f32 %v5767_v32  ;;  %v8382_v25 = vpop.eup %6737 }
 0x2fd   : > { %v3301_v53 = vpop.f32.mrb[40].mxu0  ;;  %6747 = vtanh.f32 %v5768_v4 }
 0x2fe   : > { %v8332_v15 = vadd.f32 %v3301_v53, %v2723_v8  ;;  %v3303_v35 = vpop.f32.mrb[41].mxu0  ;;  %v5772_v8 = vadd.f32 %v8210_v56, %v8279_v22  ;;  %6749 = vtanh.f32 %v5769_v63 }
 0x2ff   : > { %v8338_v3 = vadd.f32 %v3303_v35, %v2725_v44  ;;  %v3305_v41 = vpop.f32.mrb[42].mxu0  ;;  %6751 = vtanh.f32 %v5770_v1  ;;  %v5776_v35 = vadd.f32 %v8226_v50, %v8279_v22  ;;  %v5779_v50 = vadd.f32 %v8237_v60, %v8284_v2  ;;  %v8887_v1 = vld [vmem:[#allocation13_spill] sm:$0xff] }
 0x300   : > { %v8342_v24 = vadd.f32 %v3305_v41, %v2727_v21  ;;  %v3307_v16 = vpop.f32.mrb[43].mxu0  ;;  %6753 = vtanh.f32 %v5771_v19  ;;  %v2745_v37 = vadd.f32 %v8887_v1, %v8284_v2  ;;  %v2753_v1 = vadd.f32 %v7871_v7, %v8279_v22 }
 0x301   : > { %v8346_v18 = vadd.f32 %v3307_v16, %v2729_v20  ;;  %6755 = vtanh.f32 %v5772_v8  ;;  %v8886_v16 = vld [vmem:[#allocation12_spill] sm:$0xff]  ;;  %v5789_v7 = vadd.f32 %v8263_v46, %v8284_v2  ;;  %v5791_v46 = vadd.f32 %v8274_v13, %v8284_v2 }
 0x302   : > { %6757 = vtanh.f32 %v5773_v61  ;;  %v8386_v41 = vpop.eup %6739  ;;  %v2743_v4 = vadd.f32 %v8886_v16, %v8279_v22  ;;  %v5785_v16 = vadd.f32 %v8253_v47, %v8284_v2  ;;  %v2755_v47 = vadd.f32 %v7873_v12, %v8284_v2 }
 0x303   : > { %6759 = vtanh.f32 %v5774_v5  ;;  %v2759_v12 = vadd.f32 %v7881_v31, %v8284_v2  ;;  %v5792_v31 = vadd.f32 %v8276_v62, %v8279_v22  ;;  %v8891_v62 = vld [vmem:[#allocation17_spill] sm:$0xff] }
 0x304   : > { %v8390_v32 = vpop.eup %6741  ;;  %6761 = vtanh.f32 %v5775_v54 }
 0x305   : > { %v3311_v6 = vpop.f32.mrb[44].mxu0  ;;  %v8396_v63 = vpop.eup %6743  ;;  %6763 = vtanh.f32 %v5776_v35 }
 0x306   : > { %v8364_v51 = vadd.f32 %v3311_v6, %v2733_v26  ;;  %v3313_v44 = vpop.f32.mrb[45].mxu0  ;;  %v5780_v26 = vadd.f32 %v8242_v42, %v8279_v22  ;;  %v8402_v45 = vpop.eup %6745  ;;  %6765 = vtanh.f32 %v5777_v30  ;;  %v5781_v6 = vadd.f32 %v8244_v40, %v8284_v2 }
 0x307   : > { %v8370_v53 = vadd.f32 %v3313_v44, %v2735_v28  ;;  %v3315_v56 = vpop.f32.mrb[46].mxu0  ;;  %v8888_v28 = vld [vmem:[#allocation14_spill] sm:$0xff]  ;;  %v8410_v61 = vpop.eup %6747  ;;  %v8889_v44 = vld [vmem:[#allocation15_spill] sm:$0xff]  ;;  %6767 = vtanh.f32 %v5778_v14  ;;  %v5782_v42 = vadd.f32 %v8247_v36, %v8279_v22  ;;  %v5783_v40 = vadd.f32 %v8249_v17, %v8284_v2 }
 0x308   : > { %v8374_v21 = vadd.f32 %v3315_v56, %v2737_v9  ;;  %v3317_v49 = vpop.f32.mrb[47].mxu0  ;;  %v2747_v8 = vadd.f32 %v8888_v28, %v8279_v22  ;;  %v2749_v27 = vadd.f32 %v8889_v44, %v8284_v2  ;;  %v8418_v56 = vpop.eup %6749  ;;  %6769 = vtanh.f32 %v5779_v50 }
 0x309   : > { %v8380_v20 = vadd.f32 %v3317_v49, %v2739_v39  ;;  %v8424_v35 = vpop.eup %6751  ;;  %6771 = vtanh.f32 %v5780_v26  ;;  %v5784_v30 = vadd.f32 %v8251_v48, %v8279_v22  ;;  %v5786_v17 = vadd.f32 %v8255_v0, %v8279_v22 }
 0x30a   : > { %v8430_v36 = vpop.eup %6753  ;;  %6773 = vtanh.f32 %v5781_v6  ;;  %v5787_v48 = vadd.f32 %v8257_v33, %v8284_v2  ;;  %v5788_v26 = vadd.f32 %v8259_v57, %v8279_v22  ;;  %v2757_v28 = vadd.f32 %v7877_v11, %v8279_v22 }
 0x30b   : > { %6775 = vtanh.f32 %v5782_v42  ;;  %v5790_v57 = vadd.f32 %v8272_v38, %v8279_v22 }
 0x30c   : > { %6777 = vtanh.f32 %v5783_v40 }
 0x30d   : > { %v3321_v19 = vpop.f32.mrb[48].mxu0  ;;  %6779 = vtanh.f32 %v5784_v30 }
 0x30e   : > { %v8408_v60 = vadd.f32 %v3321_v19, %v2743_v4  ;;  %v3323_v9 = vpop.f32.mrb[49].mxu0  ;;  %v8434_v4 = vpop.eup %6755  ;;  %6781 = vtanh.f32 %v5785_v16  ;;  %v8890_v16 = vld [vmem:[#allocation16_spill] sm:$0xff] }
 0x30f   : > { %v8416_v39 = vadd.f32 %v3323_v9, %v2745_v37  ;;  %v3325_v5 = vpop.f32.mrb[50].mxu0  ;;  %v8438_v50 = vpop.eup %6757  ;;  %6783 = vtanh.f32 %v5786_v17  ;;  %v2763_v17 = vadd.f32 %v8890_v16, %v8279_v22 }
 0x310   : > { %v8422_v54 = vadd.f32 %v3325_v5, %v2747_v8  ;;  %v3327_v49 = vpop.f32.mrb[51].mxu0  ;;  %v8444_v37 = vpop.eup %6759  ;;  %6785 = vtanh.f32 %v5787_v48  ;;  %v2765_v48 = vadd.f32 %v8891_v62, %v8284_v2 }
 0x311   : > { %v8428_v14 = vadd.f32 %v3327_v49, %v2749_v27  ;;  %v8450_v0 = vpop.eup %6761  ;;  %6787 = vtanh.f32 %v5788_v26  ;;  %v5793_v49 = vadd.f32 %v8281_v59, %v8284_v2  ;;  %v8892_v59 = vld [vmem:[#allocation18_spill] sm:$0xff] }
 0x312   : > { %v8458_v6 = vpop.eup %6763  ;;  %6789 = vtanh.f32 %v5789_v7 }
 0x313   : > { %v8466_v11 = vpop.eup %6765  ;;  %6791 = vtanh.f32 %v5790_v57 }
 0x314   : > { %v8472_v5 = vpop.eup %6767  ;;  %6793 = vtanh.f32 %v5791_v46 }
 0x315   : > { %v3331_v19 = vpop.f32.mrb[52].mxu0  ;;  %v8478_v38 = vpop.eup %6769  ;;  %6795 = vtanh.f32 %v5792_v31 }
 0x316   : > { %v8456_v33 = vadd.f32 %v3331_v19, %v2753_v1  ;;  %v3333_v8 = vpop.f32.mrb[53].mxu0  ;;  %v8482_v30 = vpop.eup %6771  ;;  %v2767_v19 = vadd.f32 %v8892_v59, %v8279_v22  ;;  %6797 = vtanh.f32 %v5793_v49 }
 0x317   : > { %v8464_v9 = vadd.f32 %v3333_v8, %v2755_v47  ;;  %v3335_v44 = vpop.f32.mrb[54].mxu0  ;;  %v8484_v13 = vpop.eup %6773 }
 0x318   : > { %v8470_v27 = vadd.f32 %v3335_v44, %v2757_v28  ;;  %v3337_v42 = vpop.f32.mrb[55].mxu0  ;;  %v8488_v1 = vpop.eup %6775  ;;  %v8894_v44 = vld [vmem:[#allocation26_spill] sm:$0xff] }
 0x319   : > { %v8476_v40 = vadd.f32 %v3337_v42, %v2759_v12  ;;  %v8492_v26 = vpop.eup %6777  ;;  %v8893_v12 = vld [vmem:[#allocation19_spill] sm:$0xff]  ;;  %6799 = vtanh.f32 %v8894_v44  ;;  %v8901_v44 = vld [vmem:[#allocation22_spill] sm:$0xff] }
 0x31a   : > { %v8498_v8 = vpop.eup %6779  ;;  %v2769_v57 = vadd.f32 %v8893_v12, %v8284_v2  ;;  %6801 = vtanh.f32 %v8296_v29  ;;  %v8897_v29 = vld [vmem:[#allocation20_spill] sm:$0xff] }
 0x31b   : > { %v8505_v31 = vpop.eup %6781  ;;  %6803 = vtanh.f32 %v8298_v10  ;;  %v8899_v10 = vld [vmem:[#allocation21_spill] sm:$0xff] }
 0x31c   : > { %6805 = vtanh.f32 %v8300_v23  ;;  %v2775_v12 = vadd.f32 %v8899_v10, %v8284_v2 }
 0x31d   : > { %v3341_v47 = vpop.f32.mrb[56].mxu0  ;;  %6807 = vtanh.f32 %v8308_v43  ;;  %v2777_v43 = vadd.f32 %v8901_v44, %v8279_v22 }
 0x31e   : > { %v8496_v28 = vadd.f32 %v3341_v47, %v2763_v17  ;;  %v3343_v7 = vpop.f32.mrb[57].mxu0  ;;  %v8510_v17 = vpop.eup %6783  ;;  %6809 = vtanh.f32 %v8312_v34 }
 0x31f   : > { %v8503_v46 = vadd.f32 %v3343_v7, %v2765_v48  ;;  %v3345_v42 = vpop.f32.mrb[58].mxu0  ;;  %v8515_v47 = vpop.eup %6785  ;;  %6811 = vtanh.f32 %v8314_v58 }
 0x320   : > { %v8508_v16 = vadd.f32 %v3345_v42, %v2767_v19  ;;  %v3347_v49 = vpop.f32.mrb[59].mxu0  ;;  %v8518_v48 = vpop.eup %6787  ;;  %v2773_v19 = vadd.f32 %v8897_v29, %v8279_v22  ;;  %6813 = vtanh.f32 %v8316_v52  ;;  %v8903_v29 = vld [vmem:[#allocation24_spill] sm:$0xff] }
 0x321   : > { %v8513_v62 = vadd.f32 %v3347_v49, %v2769_v57  ;;  %v8521_v59 = vpop.eup %6789  ;;  %v658_v34 = vsub.s32 2, %v8903_v29  ;;  %6815 = vtanh.f32 %v8332_v15  ;;  %v8908_v15 = vld [vmem:[#allocation25_spill] sm:$0xff] }
 0x322   : > { %8896 = vst [vmem:[#allocation12_spill] sm:$0xff] %v8521_v59  ;;  %v8526_v7 = vpop.eup %6791  ;;  %v662_v59 = vsub.s32 3, %v8903_v29  ;;  %6817 = vtanh.f32 %v8338_v3 }
 0x323   : > { %8895 = vst [vmem:[#allocation11_spill] sm:$0xff] %v8513_v62  ;;  %8898 = vst [vmem:[#allocation13_spill] sm:$0xff] %v8526_v7  ;;  %v8531_v23 = vpop.eup %6793  ;;  %v8904_v7 = vld [vmem:[#allocation23_spill] sm:$0xff]  ;;  %6819 = vtanh.f32 %v8342_v24 }
 0x324   : > { %8900 = vst [vmem:[#allocation14_spill] sm:$0xff] %v8531_v23  ;;  %v8539_v62 = vpop.eup %6795  ;;  %v2779_v10 = vadd.f32 %v8904_v7, %v8284_v2  ;;  %6821 = vtanh.f32 %v8346_v18  ;;  %v8561_v7 = vrot.slane %v8908_v15, %v658_v34  ;;  %v8567_v3 = vrot.slane %v8908_v15, %v662_v59 }
 0x325   : > { %v3351_v57 = vpop.f32.mrb[60].mxu0  ;;  %v8547_v22 = vpop.eup %6797  ;;  %6823 = vtanh.f32 %v8364_v51 }
 0x326   : > { %v8536_v42 = vadd.f32 %v3351_v57, %v2773_v19  ;;  %v3353_v49 = vpop.f32.mrb[61].mxu0  ;;  %v8552_v57 = vpop.eup %6799  ;;  %6825 = vtanh.f32 %v8370_v53 }
 0x327   : > { %v8544_v58 = vadd.f32 %v3353_v49, %v2775_v12  ;;  %v3355_v23 = vpop.f32.mrb[62].mxu0  ;;  %v8557_v2 = vpop.eup %6801  ;;  %6827 = vtanh.f32 %v8374_v21 }
 0x328   : > { %8902 = vst [vmem:[#allocation15_spill] sm:$0xff] %v8536_v42  ;;  %v8550_v52 = vadd.f32 %v3355_v23, %v2777_v43  ;;  %v3357_v19 = vpop.f32.mrb[63].mxu0  ;;  %v8563_v12 = vpop.eup %6803  ;;  %6829 = vtanh.f32 %v8380_v20 }
 0x329   : > { %8905 = vst [vmem:[#allocation16_spill] sm:$0xff] %v8544_v58  ;;  %v8555_v44 = vadd.f32 %v3357_v19, %v2779_v10  ;;  %v8569_v23 = vpop.eup %6805  ;;  %6831 = vtanh.f32 %v8408_v60 }
 0x32a   : > { %8906 = vst [vmem:[#allocation17_spill] sm:$0xff] %v8550_v52  ;;  %v8572_v24 = vpop.eup %6807  ;;  %6833 = vtanh.f32 %v8416_v39 }
 0x32b   : > { %8907 = vst [vmem:[#allocation18_spill] sm:$0xff] %v8555_v44  ;;  %v8575_v18 = vpop.eup %6809  ;;  %6835 = vtanh.f32 %v8422_v54 }
 0x32c   : > { %v8579_v51 = vpop.eup %6811 }
 0x32d   : > { %v3973_v43 = vpop.f32.mrb[32].mxu1  ;;  %v8583_v53 = vpop.eup %6813 }
 0x32e   : > { %v5858_v49 = vadd.f32 %v3973_v43, %v8561_v7  ;;  %v3975_v29 = vpop.f32.mrb[33].mxu1  ;;  %v8587_v15 = vpop.eup %6815 }
 0x32f   : > { %v5859_v59 = vadd.f32 %v3975_v29, %v8567_v3  ;;  %v3977_v34 = vpop.f32.mrb[34].mxu1  ;;  %v8591_v44 = vpop.eup %6817 }
 0x330   : > { %v5529_v21 = vmul.f32 -1.442695, %v5858_v49  ;;  %v5860_v10 = vadd.f32 %v3977_v34, %v8561_v7  ;;  %v3979_v19 = vpop.f32.mrb[35].mxu1  ;;  %v8593_v29 = vpop.eup %6819 }
 0x331   : > { %v5530_v20 = vmul.f32 -1.442695, %v5859_v59  ;;  %v5861_v43 = vadd.f32 %v3979_v19, %v8567_v3  ;;  %v8595_v39 = vpop.eup %6821 }
 0x332   : > { %6837 = vpow2.f32 %v5529_v21  ;;  %v5531_v60 = vmul.f32 -1.442695, %v5860_v10  ;;  %8909 = vst [vmem:[#allocation19_spill] sm:$0xff] %v8595_v39  ;;  %v8597_v49 = vpop.eup %6823 }
 0x333   : > { %6839 = vpow2.f32 %v5530_v20  ;;  %v5532_v52 = vmul.f32 -1.442695, %v5861_v43  ;;  %8910 = vst [vmem:[#allocation26_spill] sm:$0xff] %v8597_v49  ;;  %v8599_v58 = vpop.eup %6825 }
 0x334   : > { %6841 = vpow2.f32 %v5531_v60  ;;  %8911 = vst [vmem:[#allocation20_spill] sm:$0xff] %v8599_v58  ;;  %v8603_v21 = vpop.eup %6827 }
 0x335   : > { %6843 = vpow2.f32 %v5532_v52  ;;  %v3983_v34 = vpop.f32.mrb[36].mxu1  ;;  %8912 = vst [vmem:[#allocation21_spill] sm:$0xff] %v8603_v21  ;;  %v8607_v20 = vpop.eup %6829 }
 0x336   : > { %6845 = vtanh.f32 %v8428_v14  ;;  %v5862_v54 = vadd.f32 %v3983_v34, %v8561_v7  ;;  %v3985_v59 = vpop.f32.mrb[37].mxu1  ;;  %8913 = vst [vmem:[#allocation22_spill] sm:$0xff] %v8607_v20  ;;  %v8611_v42 = vpop.eup %6831 }
 0x337   : > { %6847 = vtanh.f32 %v8456_v33  ;;  %v5863_v10 = vadd.f32 %v3985_v59, %v8567_v3  ;;  %v3987_v19 = vpop.f32.mrb[38].mxu1  ;;  %8914 = vst [vmem:[#allocation24_spill] sm:$0xff] %v8611_v42  ;;  %v8615_v21 = vpop.eup %6833 }
 0x338   : > { %6849 = vtanh.f32 %v8464_v9  ;;  %v5533_v52 = vmul.f32 -1.442695, %v5862_v54  ;;  %v5864_v43 = vadd.f32 %v3987_v19, %v8561_v7  ;;  %v3989_v60 = vpop.f32.mrb[39].mxu1  ;;  %8915 = vst [vmem:[#allocation23_spill] sm:$0xff] %v8615_v21  ;;  %v8617_v59 = vpop.eup %6835 }
 0x339   : > { %6851 = vtanh.f32 %v8470_v27  ;;  %v5534_v14 = vmul.f32 -1.442695, %v5863_v10  ;;  %v5865_v34 = vadd.f32 %v3989_v60, %v8567_v3  ;;  %8916 = vst [vmem:[#allocation25_spill] sm:$0xff] %v8617_v59 }
 0x33a   : > { %6853 = vpow2.f32 %v5533_v52  ;;  %v5535_v33 = vmul.f32 -1.442695, %v5864_v43 }
 0x33b   : > { %6855 = vpow2.f32 %v5534_v14  ;;  %v5536_v20 = vmul.f32 -1.442695, %v5865_v34 }
 0x33c   : > { %v6838_v9 = vpop.eup %6837  ;;  %6857 = vpow2.f32 %v5535_v33 }
 0x33d   : > { %v6840_v54 = vpop.eup %6839  ;;  %v4388_v19 = vadd.f32 1.0, %v6838_v9  ;;  %6859 = vpow2.f32 %v5536_v20  ;;  %v3993_v58 = vpop.f32.mrb[40].mxu1 }
 0x33e   : > { %v6842_v42 = vpop.eup %6841  ;;  %6861 = vtanh.f32 %v8476_v40  ;;  %v4389_v27 = vadd.f32 1.0, %v6840_v54  ;;  %v5866_v10 = vadd.f32 %v3993_v58, %v8561_v7  ;;  %v3995_v60 = vpop.f32.mrb[41].mxu1 }
 0x33f   : > { %v6844_v21 = vpop.eup %6843  ;;  %6863 = vrcp.f32 %v4388_v19  ;;  %v4390_v52 = vadd.f32 1.0, %v6842_v42  ;;  %v5867_v43 = vadd.f32 %v3995_v60, %v8567_v3  ;;  %v3997_v14 = vpop.f32.mrb[42].mxu1 }
 0x340   : > { %v8622_v34 = vpop.eup %6845  ;;  %6865 = vrcp.f32 %v4389_v27  ;;  %v4391_v33 = vadd.f32 1.0, %v6844_v21  ;;  %v5537_v9 = vmul.f32 -1.442695, %v5866_v10  ;;  %v5868_v20 = vadd.f32 %v3997_v14, %v8561_v7  ;;  %v3999_v59 = vpop.f32.mrb[43].mxu1 }
 0x341   : > { %8917 = vst [vmem:[#allocation27_spill] sm:$0xff] %v8622_v34  ;;  %v8625_v49 = vpop.eup %6847  ;;  %6867 = vrcp.f32 %v4390_v52  ;;  %v5538_v40 = vmul.f32 -1.442695, %v5867_v43  ;;  %v5869_v58 = vadd.f32 %v3999_v59, %v8567_v3 }
 0x342   : > { %8918 = vst [vmem:[#allocation28_spill] sm:$0xff] %v8625_v49  ;;  %v8628_v54 = vpop.eup %6849  ;;  %6869 = vrcp.f32 %v4391_v33  ;;  %v5539_v42 = vmul.f32 -1.442695, %v5868_v20 }
 0x343   : > { %8919 = vst [vmem:[#allocation29_spill] sm:$0xff] %v8628_v54  ;;  %v8630_v19 = vpop.eup %6851  ;;  %6871 = vpow2.f32 %v5537_v9  ;;  %v5540_v60 = vmul.f32 -1.442695, %v5869_v58 }
 0x344   : > { %8920 = vst [vmem:[#allocation30_spill] sm:$0xff] %v8630_v19  ;;  %v6854_v27 = vpop.eup %6853  ;;  %6873 = vpow2.f32 %v5538_v40 }
 0x345   : > { %v6856_v21 = vpop.eup %6855  ;;  %v4392_v10 = vadd.f32 1.0, %v6854_v27  ;;  %6875 = vpow2.f32 %v5539_v42  ;;  %v4003_v14 = vpop.f32.mrb[44].mxu1 }
 0x346   : > { %v6858_v34 = vpop.eup %6857  ;;  %v4393_v49 = vadd.f32 1.0, %v6856_v21  ;;  %6877 = vpow2.f32 %v5540_v60  ;;  %v5870_v52 = vadd.f32 %v4003_v14, %v8561_v7  ;;  %v4005_v59 = vpop.f32.mrb[45].mxu1 }
 0x347   : > { %v6860_v43 = vpop.eup %6859  ;;  %6879 = vrcp.f32 %v4392_v10  ;;  %v4394_v33 = vadd.f32 1.0, %v6858_v34  ;;  %v5871_v20 = vadd.f32 %v4005_v59, %v8567_v3  ;;  %v4007_v19 = vpop.f32.mrb[46].mxu1 }
 0x348   : > { %v8634_v9 = vpop.eup %6861  ;;  %6881 = vrcp.f32 %v4393_v49  ;;  %v4395_v40 = vadd.f32 1.0, %v6860_v43  ;;  %v5541_v58 = vmul.f32 -1.442695, %v5870_v52  ;;  %v5872_v42 = vadd.f32 %v4007_v19, %v8561_v7  ;;  %v4009_v27 = vpop.f32.mrb[47].mxu1 }
 0x349   : > { %8921 = vst [vmem:[#allocation31_spill] sm:$0xff] %v8634_v9  ;;  %v6864_v54 = vpop.eup %6863  ;;  %6883 = vrcp.f32 %v4394_v33  ;;  %v5542_v60 = vmul.f32 -1.442695, %v5871_v20  ;;  %v5873_v21 = vadd.f32 %v4009_v27, %v8567_v3 }
 0x34a   : > { %v6866_v14 = vpop.eup %6865  ;;  %6885 = vrcp.f32 %v4395_v40  ;;  %v5543_v10 = vmul.f32 -1.442695, %v5872_v42  ;;  %v4580_v34 = vmul.f32 %v6864_v54, %v8376_v55 }
 0x34b   : > { %v6868_v59 = vpop.eup %6867  ;;  %6887 = vpow2.f32 %v5541_v58  ;;  %v5544_v39 = vmul.f32 -1.442695, %v5873_v21  ;;  %v4581_v49 = vmul.f32 %v6866_v14, %v8382_v25 }
 0x34c   : > { %v6870_v43 = vpop.eup %6869  ;;  %6889 = vpow2.f32 %v5542_v60  ;;  %v4582_v19 = vmul.f32 %v6868_v59, %v8386_v41 }
 0x34d   : > { %v6872_v52 = vpop.eup %6871  ;;  %6891 = vpow2.f32 %v5543_v10  ;;  %v4013_v33 = vpop.f32.mrb[48].mxu1  ;;  %v4583_v20 = vmul.f32 %v6870_v43, %v8390_v32 }
 0x34e   : > { %v6874_v27 = vpop.eup %6873  ;;  %v4396_v9 = vadd.f32 1.0, %v6872_v52  ;;  %6893 = vpow2.f32 %v5544_v39  ;;  %v5874_v40 = vadd.f32 %v4013_v33, %v8561_v7  ;;  %v4015_v55 = vpop.f32.mrb[49].mxu1  ;;  %v4644_v54 = vpack.c.bf16 %v4582_v19, %v4580_v34 }
 0x34f   : > { %v6876_v58 = vpop.eup %6875  ;;  %6895 = vtanh.f32 %v8496_v28  ;;  %v4397_v25 = vadd.f32 1.0, %v6874_v27  ;;  %v5875_v42 = vadd.f32 %v4015_v55, %v8567_v3  ;;  %v4017_v60 = vpop.f32.mrb[50].mxu1  ;;  %v4645_v41 = vpack.c.bf16 %v4583_v20, %v4581_v49 }
 0x350   : > { %v6878_v21 = vpop.eup %6877  ;;  %6897 = vrcp.f32 %v4396_v9  ;;  %v4398_v14 = vadd.f32 1.0, %v6876_v58  ;;  %v5545_v10 = vmul.f32 -1.442695, %v5874_v40  ;;  %v5876_v32 = vadd.f32 %v4017_v60, %v8561_v7  ;;  %v4019_v59 = vpop.f32.mrb[51].mxu1 }
 0x351   : > { %v6880_v39 = vpop.eup %6879  ;;  %6899 = vrcp.f32 %v4397_v25  ;;  %v4399_v43 = vadd.f32 1.0, %v6878_v21  ;;  %v5546_v52 = vmul.f32 -1.442695, %v5875_v42  ;;  %v5877_v34 = vadd.f32 %v4019_v59, %v8567_v3  ;;  %4843 = vmatprep.mubr.bf16.mxu0 %v4645_v41 }
 0x352   : > { %v6882_v28 = vpop.eup %6881  ;;  %6901 = vrcp.f32 %v4398_v14  ;;  %v5547_v19 = vmul.f32 -1.442695, %v5876_v32  ;;  %4844 = vmatmul.mubr.bf16.vlgmr.msra.gmra.mrb[64].mxu0 %v4644_v54  ;;  %v4584_v49 = vmul.f32 %v6880_v39, %v8396_v63 }
 0x353   : > { %v6884_v33 = vpop.eup %6883  ;;  %6903 = vrcp.f32 %v4399_v43  ;;  %v5548_v9 = vmul.f32 -1.442695, %v5877_v34  ;;  %v4585_v20 = vmul.f32 %v6882_v28, %v8402_v45 }
 0x354   : > { %v6886_v27 = vpop.eup %6885  ;;  %6905 = vpow2.f32 %v5545_v10  ;;  %v4586_v40 = vmul.f32 %v6884_v33, %v8410_v61 }
 0x355   : > { %v6888_v55 = vpop.eup %6887  ;;  %6907 = vpow2.f32 %v5546_v52  ;;  %v4023_v58 = vpop.f32.mrb[52].mxu1  ;;  %v4587_v25 = vmul.f32 %v6886_v27, %v8418_v56 }
 0x356   : > { %v6890_v42 = vpop.eup %6889  ;;  %v4400_v60 = vadd.f32 1.0, %v6888_v55  ;;  %6909 = vpow2.f32 %v5547_v19  ;;  %v5878_v54 = vadd.f32 %v4023_v58, %v8561_v7  ;;  %v4025_v63 = vpop.f32.mrb[53].mxu1  ;;  %v4646_v41 = vpack.c.bf16 %v4586_v40, %v4584_v49 }
 0x357   : > { %v6892_v21 = vpop.eup %6891  ;;  %v4401_v14 = vadd.f32 1.0, %v6890_v42  ;;  %6911 = vpow2.f32 %v5548_v9  ;;  %v5879_v45 = vadd.f32 %v4025_v63, %v8567_v3  ;;  %v4027_v10 = vpop.f32.mrb[54].mxu1  ;;  %v4647_v32 = vpack.c.bf16 %v4587_v25, %v4585_v20 }
 0x358   : > { %v6894_v61 = vpop.eup %6893  ;;  %6913 = vrcp.f32 %v4400_v60  ;;  %v4402_v59 = vadd.f32 1.0, %v6892_v21  ;;  %v5549_v39 = vmul.f32 -1.442695, %v5878_v54  ;;  %v5880_v56 = vadd.f32 %v4027_v10, %v8561_v7  ;;  %v4029_v43 = vpop.f32.mrb[55].mxu1 }
 0x359   : > { %v8654_v52 = vpop.eup %6895  ;;  %6915 = vrcp.f32 %v4401_v14  ;;  %v4403_v34 = vadd.f32 1.0, %v6894_v61  ;;  %v5550_v28 = vmul.f32 -1.442695, %v5879_v45  ;;  %v5881_v19 = vadd.f32 %v4029_v43, %v8567_v3  ;;  %4851 = vmatprep.mubr.bf16.mxu0 %v4647_v32 }
 0x35a   : > { %v6898_v49 = vpop.eup %6897  ;;  %6917 = vrcp.f32 %v4402_v59  ;;  %v5551_v33 = vmul.f32 -1.442695, %v5880_v56  ;;  %4852 = vmatmul.mubr.bf16.gmra.mrb[68].mxu0 %v4646_v41 }
 0x35b   : > { %v6900_v9 = vpop.eup %6899  ;;  %6919 = vrcp.f32 %v4403_v34  ;;  %v5552_v20 = vmul.f32 -1.442695, %v5881_v19  ;;  %v4588_v27 = vmul.f32 %v6898_v49, %v8424_v35 }
 0x35c   : > { %v6902_v40 = vpop.eup %6901  ;;  %6921 = vpow2.f32 %v5549_v39  ;;  %v4589_v55 = vmul.f32 %v6900_v9, %v8430_v36 }
 0x35d   : > { %v6904_v58 = vpop.eup %6903  ;;  %6923 = vpow2.f32 %v5550_v28  ;;  %v4033_v25 = vpop.f32.mrb[56].mxu1  ;;  %v4590_v42 = vmul.f32 %v6902_v40, %v8434_v4 }
 0x35e   : > { %v6906_v60 = vpop.eup %6905  ;;  %6925 = vpow2.f32 %v5551_v33  ;;  %v5882_v54 = vadd.f32 %v4033_v25, %v8561_v7  ;;  %v4035_v63 = vpop.f32.mrb[57].mxu1  ;;  %v4591_v41 = vmul.f32 %v6904_v58, %v8438_v50 }
 0x35f   : > { %v6908_v21 = vpop.eup %6907  ;;  %v4404_v14 = vadd.f32 1.0, %v6906_v60  ;;  %6927 = vpow2.f32 %v5552_v20  ;;  %v5883_v35 = vadd.f32 %v4035_v63, %v8567_v3  ;;  %v4037_v45 = vpop.f32.mrb[58].mxu1  ;;  %v4648_v10 = vpack.c.bf16 %v4590_v42, %v4588_v27 }
 0x360   : > { %v6910_v36 = vpop.eup %6909  ;;  %6929 = vtanh.f32 %v8503_v46  ;;  %v4405_v32 = vadd.f32 1.0, %v6908_v21  ;;  %v5884_v4 = vadd.f32 %v4037_v45, %v8561_v7  ;;  %v4039_v61 = vpop.f32.mrb[59].mxu1  ;;  %v4649_v59 = vpack.c.bf16 %v4591_v41, %v4589_v55 }
 0x361   : > { %v6912_v39 = vpop.eup %6911  ;;  %6931 = vrcp.f32 %v4404_v14  ;;  %v4406_v56 = vadd.f32 1.0, %v6910_v36  ;;  %v5553_v43 = vmul.f32 -1.442695, %v5882_v54  ;;  %v5885_v50 = vadd.f32 %v4039_v61, %v8567_v3 }
 0x362   : > { %v6914_v34 = vpop.eup %6913  ;;  %6933 = vrcp.f32 %v4405_v32  ;;  %v4407_v28 = vadd.f32 1.0, %v6912_v39  ;;  %v5554_v19 = vmul.f32 -1.442695, %v5883_v35  ;;  %4859 = vmatprep.mubr.bf16.mxu0 %v4649_v59  ;;  %v5555_v33 = vmul.f32 -1.442695, %v5884_v4 }
 0x363   : > { %v6916_v49 = vpop.eup %6915  ;;  %6935 = vrcp.f32 %v4406_v56  ;;  %4860 = vmatmul.mubr.bf16.gmra.mrb[72].mxu0 %v4648_v10  ;;  %v4592_v46 = vmul.f32 %v6914_v34, %v8444_v37  ;;  %v5556_v20 = vmul.f32 -1.442695, %v5885_v50 }
 0x364   : > { %v6918_v9 = vpop.eup %6917  ;;  %6937 = vrcp.f32 %v4407_v28  ;;  %v4593_v27 = vmul.f32 %v6916_v49, %v8450_v0 }
 0x365   : > { %v6920_v40 = vpop.eup %6919  ;;  %6939 = vpow2.f32 %v5553_v43  ;;  %v4043_v55 = vpop.f32.mrb[60].mxu1  ;;  %v4594_v58 = vmul.f32 %v6918_v9, %v8458_v6 }
 0x366   : > { %v6922_v25 = vpop.eup %6921  ;;  %6941 = vpow2.f32 %v5554_v19  ;;  %v5886_v42 = vadd.f32 %v4043_v55, %v8561_v7  ;;  %v4045_v60 = vpop.f32.mrb[61].mxu1  ;;  %v4595_v54 = vmul.f32 %v6920_v40, %v8466_v11 }
 0x367   : > { %v6924_v63 = vpop.eup %6923  ;;  %v4408_v41 = vadd.f32 1.0, %v6922_v25  ;;  %6943 = vpow2.f32 %v5555_v33  ;;  %v5887_v37 = vadd.f32 %v4045_v60, %v8567_v3  ;;  %v4047_v21 = vpop.f32.mrb[62].mxu1  ;;  %v4650_v14 = vpack.c.bf16 %v4594_v58, %v4592_v46 }
 0x368   : > { %v6926_v0 = vpop.eup %6925  ;;  %v4409_v35 = vadd.f32 1.0, %v6924_v63  ;;  %6945 = vpow2.f32 %v5556_v20  ;;  %v5888_v45 = vadd.f32 %v4047_v21, %v8561_v7  ;;  %v4049_v6 = vpop.f32.mrb[63].mxu1  ;;  %v5557_v32 = vmul.f32 -1.442695, %v5886_v42 }
 0x369   : > { %v6928_v10 = vpop.eup %6927  ;;  %6947 = vrcp.f32 %v4408_v41  ;;  %v4410_v36 = vadd.f32 1.0, %v6926_v0  ;;  %v5889_v4 = vadd.f32 %v4049_v6, %v8567_v3  ;;  %v5558_v59 = vmul.f32 -1.442695, %v5887_v37 }
 0x36a   : > { %v8674_v11 = vpop.eup %6929  ;;  %6949 = vrcp.f32 %v4409_v35  ;;  %v4411_v61 = vadd.f32 1.0, %v6928_v10  ;;  %v4651_v39 = vpack.c.bf16 %v4595_v54, %v4593_v27  ;;  %v5559_v43 = vmul.f32 -1.442695, %v5888_v45 }
 0x36b   : > { %v6932_v56 = vpop.eup %6931  ;;  %6951 = vrcp.f32 %v4410_v36  ;;  %v5560_v34 = vmul.f32 -1.442695, %v5889_v4 }
 0x36c   : > { %v6934_v50 = vpop.eup %6933  ;;  %6953 = vrcp.f32 %v4411_v61  ;;  %4867 = vmatprep.mubr.bf16.mxu0 %v4651_v39  ;;  %v4596_v28 = vmul.f32 %v6932_v56, %v8472_v5 }
 0x36d   : > { %v6936_v19 = vpop.eup %6935  ;;  %6955 = vpow2.f32 %v5557_v32  ;;  %4868 = vmatmul.mubr.bf16.gmra.mrb[76].mxu0 %v4650_v14  ;;  %v4053_v49 = vpop.f32.mrb[64].mxu1  ;;  %v4597_v33 = vmul.f32 %v6934_v50, %v8478_v38 }
 0x36e   : > { %v6938_v46 = vpop.eup %6937  ;;  %6957 = vpow2.f32 %v5558_v59  ;;  %v5890_v9 = vadd.f32 %v4053_v49, %v8561_v7  ;;  %v4055_v20 = vpop.f32.mrb[65].mxu1  ;;  %v4598_v27 = vmul.f32 %v6936_v19, %v8482_v30 }
 0x36f   : > { %v6940_v40 = vpop.eup %6939  ;;  %6959 = vpow2.f32 %v5559_v43  ;;  %v5891_v55 = vadd.f32 %v4055_v20, %v8567_v3  ;;  %v4057_v58 = vpop.f32.mrb[66].mxu1  ;;  %v4599_v5 = vmul.f32 %v6938_v46, %v8484_v13 }
 0x370   : > { %v6942_v25 = vpop.eup %6941  ;;  %v4412_v42 = vadd.f32 1.0, %v6940_v40  ;;  %6961 = vpow2.f32 %v5560_v34  ;;  %v5892_v60 = vadd.f32 %v4057_v58, %v8561_v7  ;;  %v4059_v38 = vpop.f32.mrb[67].mxu1  ;;  %v5561_v14 = vmul.f32 -1.442695, %v5890_v9 }
 0x371   : > { %v6944_v54 = vpop.eup %6943  ;;  %6963 = vtanh.f32 %v8508_v16  ;;  %v4413_v63 = vadd.f32 1.0, %v6942_v25  ;;  %v5893_v41 = vadd.f32 %v4059_v38, %v8567_v3  ;;  %v4653_v30 = vpack.c.bf16 %v4599_v5, %v4597_v33 }
 0x372   : > { %v6946_v37 = vpop.eup %6945  ;;  %6965 = vrcp.f32 %v4412_v42  ;;  %v4414_v21 = vadd.f32 1.0, %v6944_v54  ;;  %v4652_v0 = vpack.c.bf16 %v4598_v27, %v4596_v28  ;;  %v5562_v45 = vmul.f32 -1.442695, %v5891_v55 }
 0x373   : > { %v6948_v35 = vpop.eup %6947  ;;  %6967 = vrcp.f32 %v4413_v63  ;;  %v4415_v13 = vadd.f32 1.0, %v6946_v37  ;;  %4875 = vmatprep.mubr.bf16.mxu0 %v4653_v30  ;;  %v5563_v10 = vmul.f32 -1.442695, %v5892_v60  ;;  %v5564_v32 = vmul.f32 -1.442695, %v5893_v41 }
 0x374   : > { %v6950_v6 = vpop.eup %6949  ;;  %6969 = vrcp.f32 %v4414_v21  ;;  %v4600_v36 = vmul.f32 %v6948_v35, %v8488_v1 }
 0x375   : > { %v6952_v16 = vpop.eup %6951  ;;  %6971 = vrcp.f32 %v4415_v13  ;;  %4876 = vmatmul.mubr.bf16.gmra.mrb[80].mxu0 %v4652_v0  ;;  %v4063_v4 = vpop.f32.mrb[68].mxu1  ;;  %v4601_v61 = vmul.f32 %v6950_v6, %v8492_v26 }
 0x376   : > { %v6954_v59 = vpop.eup %6953  ;;  %6973 = vpow2.f32 %v5561_v14  ;;  %v5894_v39 = vadd.f32 %v4063_v4, %v8561_v7  ;;  %v4065_v56 = vpop.f32.mrb[69].mxu1  ;;  %v4602_v43 = vmul.f32 %v6952_v16, %v8498_v8  ;;  %v8922_v16 = vld [vmem:[#allocation12_spill] sm:$0xff] }
 0x377   : > { %v6956_v50 = vpop.eup %6955  ;;  %6975 = vpow2.f32 %v5562_v45  ;;  %v5895_v34 = vadd.f32 %v4065_v56, %v8567_v3  ;;  %v4067_v28 = vpop.f32.mrb[70].mxu1  ;;  %v4603_v1 = vmul.f32 %v6954_v59, %v8505_v31 }
 0x378   : > { %v6958_v19 = vpop.eup %6957  ;;  %v4416_v49 = vadd.f32 1.0, %v6956_v50  ;;  %6977 = vpow2.f32 %v5563_v10  ;;  %v5896_v33 = vadd.f32 %v4067_v28, %v8561_v7  ;;  %v4069_v26 = vpop.f32.mrb[71].mxu1  ;;  %v5565_v40 = vmul.f32 -1.442695, %v5894_v39 }
 0x379   : > { %v6960_v46 = vpop.eup %6959  ;;  %v4417_v9 = vadd.f32 1.0, %v6958_v19  ;;  %6979 = vpow2.f32 %v5564_v32  ;;  %v5897_v20 = vadd.f32 %v4069_v26, %v8567_v3  ;;  %v4655_v55 = vpack.c.bf16 %v4603_v1, %v4601_v61 }
 0x37a   : > { %v6962_v27 = vpop.eup %6961  ;;  %6981 = vrcp.f32 %v4416_v49  ;;  %v4418_v8 = vadd.f32 1.0, %v6960_v46  ;;  %v5566_v5 = vmul.f32 -1.442695, %v5895_v34  ;;  %v4654_v25 = vpack.c.bf16 %v4602_v43, %v4600_v36  ;;  %v8923_v46 = vld [vmem:[#allocation13_spill] sm:$0xff] }
 0x37b   : > { %v8693_v58 = vpop.eup %6963  ;;  %6983 = vrcp.f32 %v4417_v9  ;;  %v4419_v31 = vadd.f32 1.0, %v6962_v27  ;;  %v5567_v60 = vmul.f32 -1.442695, %v5896_v33  ;;  %4883 = vmatprep.mubr.bf16.mxu0 %v4655_v55  ;;  %v5568_v54 = vmul.f32 -1.442695, %v5897_v20 }
 0x37c   : > { %v6966_v42 = vpop.eup %6965  ;;  %6985 = vrcp.f32 %v4418_v8 }
 0x37d   : > { %v6968_v38 = vpop.eup %6967  ;;  %6987 = vrcp.f32 %v4419_v31  ;;  %4884 = vmatmul.mubr.bf16.gmra.mrb[84].mxu0 %v4654_v25  ;;  %v4073_v63 = vpop.f32.mrb[72].mxu1  ;;  %v4604_v41 = vmul.f32 %v6966_v42, %v8510_v17 }
 0x37e   : > { %v6970_v30 = vpop.eup %6969  ;;  %6989 = vpow2.f32 %v5565_v40  ;;  %v5898_v37 = vadd.f32 %v4073_v63, %v8561_v7  ;;  %v4075_v21 = vpop.f32.mrb[73].mxu1  ;;  %v4605_v14 = vmul.f32 %v6968_v38, %v8515_v47  ;;  %v8924_v40 = vld [vmem:[#allocation14_spill] sm:$0xff] }
 0x37f   : > { %v6972_v0 = vpop.eup %6971  ;;  %6991 = vpow2.f32 %v5566_v5  ;;  %v5899_v35 = vadd.f32 %v4075_v21, %v8567_v3  ;;  %v4077_v13 = vpop.f32.mrb[74].mxu1  ;;  %v4606_v45 = vmul.f32 %v6970_v30, %v8518_v48 }
 0x380   : > { %v6974_v6 = vpop.eup %6973  ;;  %6993 = vpow2.f32 %v5567_v60  ;;  %v5569_v10 = vmul.f32 -1.442695, %v5898_v37  ;;  %v5900_v36 = vadd.f32 %v4077_v13, %v8561_v7  ;;  %v4079_v17 = vpop.f32.mrb[75].mxu1  ;;  %v4607_v32 = vmul.f32 %v6972_v0, %v8922_v16 }
 0x381   : > { %v6976_v4 = vpop.eup %6975  ;;  %v4420_v61 = vadd.f32 1.0, %v6974_v6  ;;  %6995 = vpow2.f32 %v5568_v54  ;;  %v5901_v47 = vadd.f32 %v4079_v17, %v8567_v3  ;;  %v5570_v50 = vmul.f32 -1.442695, %v5899_v35 }
 0x382   : > { %v6978_v59 = vpop.eup %6977  ;;  %v4421_v39 = vadd.f32 1.0, %v6976_v4  ;;  %6997 = vpow2.f32 %v5569_v10  ;;  %v4657_v56 = vpack.c.bf16 %v4607_v32, %v4605_v14  ;;  %v4656_v34 = vpack.c.bf16 %v4606_v45, %v4604_v41 }
 0x383   : > { %v6980_v43 = vpop.eup %6979  ;;  %6999 = vrcp.f32 %v4420_v61  ;;  %v4422_v48 = vadd.f32 1.0, %v6978_v59  ;;  %v5571_v19 = vmul.f32 -1.442695, %v5900_v36  ;;  %v5572_v33 = vmul.f32 -1.442695, %v5901_v47 }
 0x384   : > { %v6982_v28 = vpop.eup %6981  ;;  %7001 = vrcp.f32 %v4421_v39  ;;  %v4423_v1 = vadd.f32 1.0, %v6980_v43  ;;  %4891 = vmatprep.mubr.bf16.mxu0 %v4657_v56 }
 0x385   : > { %v6984_v49 = vpop.eup %6983  ;;  %7003 = vrcp.f32 %v4422_v48  ;;  %4892 = vmatmul.mubr.bf16.gmra.mrb[88].mxu0 %v4656_v34  ;;  %v4083_v26 = vpop.f32.mrb[76].mxu1  ;;  %v4608_v9 = vmul.f32 %v6982_v28, %v8923_v46 }
 0x386   : > { %v6986_v20 = vpop.eup %6985  ;;  %7005 = vrcp.f32 %v4423_v1  ;;  %v5902_v27 = vadd.f32 %v4083_v26, %v8561_v7  ;;  %v4085_v8 = vpop.f32.mrb[77].mxu1  ;;  %v4609_v55 = vmul.f32 %v6984_v49, %v8924_v40 }
 0x387   : > { %v6988_v31 = vpop.eup %6987  ;;  %7007 = vpow2.f32 %v5570_v50  ;;  %v4087_v5 = vpop.f32.mrb[78].mxu1  ;;  %v4610_v25 = vmul.f32 %v6986_v20, %v8539_v62  ;;  %v5903_v38 = vadd.f32 %v4085_v8, %v8567_v3 }
 0x388   : > { %v6990_v42 = vpop.eup %6989  ;;  %7009 = vpow2.f32 %v5571_v19  ;;  %v5573_v60 = vmul.f32 -1.442695, %v5902_v27  ;;  %v4089_v54 = vpop.f32.mrb[79].mxu1  ;;  %v4611_v63 = vmul.f32 %v6988_v31, %v8547_v22  ;;  %v5904_v37 = vadd.f32 %v4087_v5, %v8561_v7 }
 0x389   : > { %v6992_v41 = vpop.eup %6991  ;;  %v4424_v30 = vadd.f32 1.0, %v6990_v42  ;;  %7011 = vpow2.f32 %v5572_v33  ;;  %v5905_v0 = vadd.f32 %v4089_v54, %v8567_v3  ;;  %v4658_v45 = vpack.c.bf16 %v4610_v25, %v4608_v9 }
 0x38a   : > { %v6994_v21 = vpop.eup %6993  ;;  %v4425_v14 = vadd.f32 1.0, %v6992_v41  ;;  %7013 = vpow2.f32 %v5573_v60  ;;  %v4659_v35 = vpack.c.bf16 %v4611_v63, %v4609_v55  ;;  %v5574_v36 = vmul.f32 -1.442695, %v5903_v38 }
 0x38b   : > { %v6996_v62 = vpop.eup %6995  ;;  %7015 = vrcp.f32 %v4424_v30  ;;  %v4426_v13 = vadd.f32 1.0, %v6994_v21  ;;  %v5575_v16 = vmul.f32 -1.442695, %v5904_v37  ;;  %v5576_v61 = vmul.f32 -1.442695, %v5905_v0 }
 0x38c   : > { %v6998_v6 = vpop.eup %6997  ;;  %7017 = vrcp.f32 %v4425_v14  ;;  %v4427_v10 = vadd.f32 1.0, %v6996_v62  ;;  %4899 = vmatprep.mubr.bf16.mxu0 %v4659_v35 }
 0x38d   : > { %v7000_v22 = vpop.eup %6999  ;;  %7019 = vrcp.f32 %v4426_v13  ;;  %v4428_v17 = vadd.f32 1.0, %v6998_v6  ;;  %4900 = vmatmul.mubr.bf16.gmra.mrb[92].mxu0 %v4658_v45  ;;  %v4093_v32 = vpop.f32.mrb[80].mxu1 }
 0x38e   : > { %v7002_v4 = vpop.eup %7001  ;;  %7021 = vrcp.f32 %v4427_v10  ;;  %v5906_v47 = vadd.f32 %v4093_v32, %v8561_v7  ;;  %v4095_v59 = vpop.f32.mrb[81].mxu1  ;;  %v4612_v39 = vmul.f32 %v7000_v22, %v8552_v57 }
 0x38f   : > { %v7004_v56 = vpop.eup %7003  ;;  %7023 = vrcp.f32 %v4428_v17  ;;  %v4097_v43 = vpop.f32.mrb[82].mxu1  ;;  %v4613_v48 = vmul.f32 %v7002_v4, %v8557_v2  ;;  %v5907_v28 = vadd.f32 %v4095_v59, %v8567_v3 }
 0x390   : > { %v7006_v50 = vpop.eup %7005  ;;  %7025 = vpow2.f32 %v5574_v36  ;;  %v5577_v34 = vmul.f32 -1.442695, %v5906_v47  ;;  %v4099_v1 = vpop.f32.mrb[83].mxu1  ;;  %v4614_v19 = vmul.f32 %v7004_v56, %v8563_v12  ;;  %v5908_v33 = vadd.f32 %v4097_v43, %v8561_v7 }
 0x391   : > { %v7008_v49 = vpop.eup %7007  ;;  %7027 = vpow2.f32 %v5575_v16  ;;  %v4615_v26 = vmul.f32 %v7006_v50, %v8569_v23  ;;  %v5909_v9 = vadd.f32 %v4099_v1, %v8567_v3  ;;  %v5578_v12 = vmul.f32 -1.442695, %v5907_v28 }
 0x392   : > { %v7010_v57 = vpop.eup %7009  ;;  %v4429_v46 = vadd.f32 1.0, %v7008_v49  ;;  %7029 = vpow2.f32 %v5576_v61  ;;  %v4660_v2 = vpack.c.bf16 %v4614_v19, %v4612_v39  ;;  %v5579_v25 = vmul.f32 -1.442695, %v5908_v33 }
 0x393   : > { %v7012_v20 = vpop.eup %7011  ;;  %v4430_v27 = vadd.f32 1.0, %v7010_v57  ;;  %7031 = vpow2.f32 %v5577_v34  ;;  %v4661_v8 = vpack.c.bf16 %v4615_v26, %v4613_v48  ;;  %v5580_v60 = vmul.f32 -1.442695, %v5909_v9  ;;  %v8925_v9 = vld [vmem:[#allocation19_spill] sm:$0xff] }
 0x394   : > { %v7014_v40 = vpop.eup %7013  ;;  %7033 = vrcp.f32 %v4429_v46  ;;  %v4431_v55 = vadd.f32 1.0, %v7012_v20 }
 0x395   : > { %v7016_v31 = vpop.eup %7015  ;;  %7035 = vrcp.f32 %v4430_v27  ;;  %v4432_v5 = vadd.f32 1.0, %v7014_v40  ;;  %4907 = vmatprep.mubr.bf16.mxu0 %v4661_v8  ;;  %v4103_v23 = vpop.f32.mrb[84].mxu1  ;;  %v8926_v40 = vld [vmem:[#allocation26_spill] sm:$0xff] }
 0x396   : > { %v7018_v42 = vpop.eup %7017  ;;  %7037 = vrcp.f32 %v4431_v55  ;;  %4908 = vmatmul.mubr.bf16.gmra.mrb[96].mxu0 %v4660_v2  ;;  %v5910_v38 = vadd.f32 %v4103_v23, %v8561_v7  ;;  %v4105_v54 = vpop.f32.mrb[85].mxu1  ;;  %v4616_v63 = vmul.f32 %v7016_v31, %v8572_v24 }
 0x397   : > { %v7020_v41 = vpop.eup %7019  ;;  %7039 = vrcp.f32 %v4432_v5  ;;  %v5911_v30 = vadd.f32 %v4105_v54, %v8567_v3  ;;  %v4107_v37 = vpop.f32.mrb[86].mxu1  ;;  %v4617_v21 = vmul.f32 %v7018_v42, %v8575_v18 }
 0x398   : > { %v7022_v14 = vpop.eup %7021  ;;  %7041 = vpow2.f32 %v5578_v12  ;;  %v5581_v0 = vmul.f32 -1.442695, %v5910_v38  ;;  %v4109_v35 = vpop.f32.mrb[87].mxu1  ;;  %v4618_v62 = vmul.f32 %v7020_v41, %v8579_v51  ;;  %v5912_v6 = vadd.f32 %v4107_v37, %v8561_v7 }
 0x399   : > { %v7024_v13 = vpop.eup %7023  ;;  %7043 = vpow2.f32 %v5579_v25  ;;  %v5582_v45 = vmul.f32 -1.442695, %v5911_v30  ;;  %v4619_v24 = vmul.f32 %v7022_v14, %v8583_v53  ;;  %v5913_v36 = vadd.f32 %v4109_v35, %v8567_v3 }
 0x39a   : > { %v7026_v10 = vpop.eup %7025  ;;  %7045 = vpow2.f32 %v5580_v60  ;;  %v4662_v22 = vpack.c.bf16 %v4618_v62, %v4616_v63  ;;  %v4620_v18 = vmul.f32 %v7024_v13, %v8587_v15  ;;  %v5583_v59 = vmul.f32 -1.442695, %v5912_v6  ;;  %v8927_v6 = vld [vmem:[#allocation20_spill] sm:$0xff] }
 0x39b   : > { %v7028_v17 = vpop.eup %7027  ;;  %v4433_v16 = vadd.f32 1.0, %v7026_v10  ;;  %7047 = vpow2.f32 %v5581_v0  ;;  %v4663_v32 = vpack.c.bf16 %v4619_v24, %v4617_v21  ;;  %v5584_v43 = vmul.f32 -1.442695, %v5913_v36 }
 0x39c   : > { %v7030_v4 = vpop.eup %7029  ;;  %v4434_v51 = vadd.f32 1.0, %v7028_v17  ;;  %7049 = vpow2.f32 %v5582_v45 }
 0x39d   : > { %v7032_v61 = vpop.eup %7031  ;;  %7051 = vrcp.f32 %v4433_v16  ;;  %v4435_v47 = vadd.f32 1.0, %v7030_v4  ;;  %4915 = vmatprep.mubr.bf16.mxu0 %v4663_v32  ;;  %v4113_v53 = vpop.f32.mrb[88].mxu1  ;;  %v8929_v32 = vld [vmem:[#allocation22_spill] sm:$0xff] }
 0x39e   : > { %v7034_v39 = vpop.eup %7033  ;;  %7053 = vrcp.f32 %v4434_v51  ;;  %v4436_v56 = vadd.f32 1.0, %v7032_v61  ;;  %4916 = vmatmul.mubr.bf16.gmra.mrb[100].mxu0 %v4662_v22  ;;  %v5914_v15 = vadd.f32 %v4113_v53, %v8561_v7  ;;  %v4115_v48 = vpop.f32.mrb[89].mxu1  ;;  %v8928_v22 = vld [vmem:[#allocation21_spill] sm:$0xff] }
 0x39f   : > { %v7036_v50 = vpop.eup %7035  ;;  %7055 = vrcp.f32 %v4435_v47  ;;  %v5915_v34 = vadd.f32 %v4115_v48, %v8567_v3  ;;  %v4117_v28 = vpop.f32.mrb[90].mxu1  ;;  %v4621_v1 = vmul.f32 %v7034_v39, %v8591_v44 }
 0x3a0   : > { %v7038_v19 = vpop.eup %7037  ;;  %7057 = vrcp.f32 %v4436_v56  ;;  %v5585_v49 = vmul.f32 -1.442695, %v5914_v15  ;;  %v4119_v33 = vpop.f32.mrb[91].mxu1  ;;  %v4622_v26 = vmul.f32 %v7036_v50, %v8593_v29  ;;  %v5916_v27 = vadd.f32 %v4117_v28, %v8561_v7 }
 0x3a1   : > { %v7040_v57 = vpop.eup %7039  ;;  %7059 = vpow2.f32 %v5583_v59  ;;  %v5586_v46 = vmul.f32 -1.442695, %v5915_v34  ;;  %v4623_v2 = vmul.f32 %v7038_v19, %v8925_v9  ;;  %v5917_v31 = vadd.f32 %v4119_v33, %v8567_v3  ;;  %v8930_v59 = vld [vmem:[#allocation24_spill] sm:$0xff] }
 0x3a2   : > { %v7042_v20 = vpop.eup %7041  ;;  %7061 = vpow2.f32 %v5584_v43  ;;  %v4664_v8 = vpack.c.bf16 %v4622_v26, %v4620_v18  ;;  %v4624_v55 = vmul.f32 %v7040_v57, %v8926_v40  ;;  %v5587_v63 = vmul.f32 -1.442695, %v5916_v27  ;;  %v8932_v57 = vld [vmem:[#allocation25_spill] sm:$0xff]  ;;  %v8934_v40 = vld [vmem:[#allocation28_spill] sm:$0xff] }
 0x3a3   : > { %v7044_v12 = vpop.eup %7043  ;;  %v4437_v44 = vadd.f32 1.0, %v7042_v20  ;;  %7063 = vpow2.f32 %v5585_v49  ;;  %v4665_v5 = vpack.c.bf16 %v4623_v2, %v4621_v1  ;;  %v5588_v14 = vmul.f32 -1.442695, %v5917_v31  ;;  %v8931_v49 = vld [vmem:[#allocation23_spill] sm:$0xff] }
 0x3a4   : > { %v7046_v25 = vpop.eup %7045  ;;  %v4438_v29 = vadd.f32 1.0, %v7044_v12  ;;  %7065 = vpow2.f32 %v5586_v46  ;;  %v8933_v2 = vld [vmem:[#allocation27_spill] sm:$0xff] }
 0x3a5   : > { %v7048_v23 = vpop.eup %7047  ;;  %7067 = vrcp.f32 %v4437_v44  ;;  %v4439_v42 = vadd.f32 1.0, %v7046_v25  ;;  %4923 = vmatprep.mubr.bf16.mxu0 %v4665_v5  ;;  %v4123_v60 = vpop.f32.mrb[92].mxu1  ;;  %v8935_v44 = vld [vmem:[#allocation11_spill] sm:$0xff]  ;;  %v8936_v5 = vld [vmem:[#allocation29_spill] sm:$0xff] }
 0x3a6   : > { %v7050_v38 = vpop.eup %7049  ;;  %7069 = vrcp.f32 %v4438_v29  ;;  %v4440_v54 = vadd.f32 1.0, %v7048_v23  ;;  %4924 = vmatmul.mubr.bf16.gmra.mrb[104].mxu0 %v4664_v8  ;;  %v5918_v41 = vadd.f32 %v4123_v60, %v8561_v7  ;;  %v4125_v30 = vpop.f32.mrb[93].mxu1  ;;  %v8937_v23 = vld [vmem:[#allocation15_spill] sm:$0xff] }
 0x3a7   : > { %v7052_v37 = vpop.eup %7051  ;;  %7071 = vrcp.f32 %v4439_v42  ;;  %v4441_v21 = vadd.f32 1.0, %v7050_v38  ;;  %v5919_v0 = vadd.f32 %v4125_v30, %v8567_v3  ;;  %v4127_v35 = vpop.f32.mrb[94].mxu1  ;;  %v8938_v38 = vld [vmem:[#allocation16_spill] sm:$0xff] }
 0x3a8   : > { %v7054_v62 = vpop.eup %7053  ;;  %7073 = vrcp.f32 %v4440_v54  ;;  %v5589_v13 = vmul.f32 -1.442695, %v5918_v41  ;;  %v4129_v45 = vpop.f32.mrb[95].mxu1  ;;  %v4625_v24 = vmul.f32 %v7052_v37, %v8927_v6  ;;  %v5920_v16 = vadd.f32 %v4127_v35, %v8561_v7 }
 0x3a9   : > { %v7056_v10 = vpop.eup %7055  ;;  %7075 = vrcp.f32 %v4441_v21  ;;  %v5590_v36 = vmul.f32 -1.442695, %v5919_v0  ;;  %v4626_v18 = vmul.f32 %v7054_v62, %v8928_v22  ;;  %v5921_v61 = vadd.f32 %v4129_v45, %v8567_v3  ;;  %v8940_v62 = vld [vmem:[#allocation31_spill] sm:$0xff] }
 0x3aa   : > { %v7058_v17 = vpop.eup %7057  ;;  %7077 = vpow2.f32 %v5587_v63  ;;  %v4627_v4 = vmul.f32 %v7056_v10, %v8929_v32  ;;  %v5591_v7 = vmul.f32 -1.442695, %v5920_v16 }
 0x3ab   : > { %v7060_v51 = vpop.eup %7059  ;;  %7079 = vpow2.f32 %v5588_v14  ;;  %v4666_v47 = vpack.c.bf16 %v4626_v18, %v4624_v55  ;;  %v4628_v53 = vmul.f32 %v7058_v17, %v8930_v59  ;;  %v5592_v19 = vmul.f32 -1.442695, %v5921_v61  ;;  %v8939_v14 = vld [vmem:[#allocation30_spill] sm:$0xff]  ;;  %v8941_v17 = vld [vmem:[#allocation17_spill] sm:$0xff] }
 0x3ac   : > { %v7062_v39 = vpop.eup %7061  ;;  %v4442_v56 = vadd.f32 1.0, %v7060_v51  ;;  %7081 = vpow2.f32 %v5589_v13  ;;  %v4667_v43 = vpack.c.bf16 %v4627_v4, %v4625_v24  ;;  %v8942_v4 = vld [vmem:[#allocation18_spill] sm:$0xff] }
 0x3ad   : > { %v7064_v15 = vpop.eup %7063  ;;  %v4443_v48 = vadd.f32 1.0, %v7062_v39  ;;  %7083 = vpow2.f32 %v5590_v36 }
 0x3ae   : > { %v7066_v50 = vpop.eup %7065  ;;  %7085 = vrcp.f32 %v4442_v56  ;;  %v4444_v34 = vadd.f32 1.0, %v7064_v15  ;;  %4931 = vmatprep.mubr.bf16.mxu0 %v4667_v43 }
 0x3af   : > { %v7068_v28 = vpop.eup %7067  ;;  %7087 = vrcp.f32 %v4443_v48  ;;  %v4445_v1 = vadd.f32 1.0, %v7066_v50  ;;  %4932 = vmatmul.mubr.bf16.gmra.mrb[108].mxu0 %v4666_v47 }
 0x3b0   : > { %v7070_v3 = vpop.eup %7069  ;;  %7089 = vrcp.f32 %v4444_v34  ;;  %v4629_v33 = vmul.f32 %v7068_v28, %v8931_v49 }
 0x3b1   : > { %v7072_v26 = vpop.eup %7071  ;;  %7091 = vrcp.f32 %v4445_v1  ;;  %v4630_v46 = vmul.f32 %v7070_v3, %v8932_v57  ;;  %v8762_v57 = vld [vmem:[%s8849_s4] ss:$0 sm:$0xff] }
 0x3b2   : > { %v7074_v9 = vpop.eup %7073  ;;  %7093 = vpow2.f32 %v5591_v7  ;;  %v4631_v20 = vmul.f32 %v7072_v26, %v8933_v2 }
 0x3b3   : > { %v7076_v27 = vpop.eup %7075  ;;  %7095 = vpow2.f32 %v5592_v19  ;;  %v4668_v8 = vpack.c.bf16 %v4630_v46, %v4628_v53  ;;  %v4632_v55 = vmul.f32 %v7074_v9, %v8934_v40 }
 0x3b4   : > { %v7078_v12 = vpop.eup %7077  ;;  %7097 = vtanh.f32 %v8935_v44  ;;  %v4669_v31 = vpack.c.bf16 %v4631_v20, %v4629_v33  ;;  %v4633_v25 = vmul.f32 %v7076_v27, %v8936_v5 }
 0x3b5   : > { %v7080_v29 = vpop.eup %7079  ;;  %7099 = vtanh.f32 %v8937_v23  ;;  %v4446_v42 = vadd.f32 1.0, %v7078_v12 }
 0x3b6   : > { %v7082_v60 = vpop.eup %7081  ;;  %7101 = vtanh.f32 %v8938_v38  ;;  %v4447_v54 = vadd.f32 1.0, %v7080_v29  ;;  %4939 = vmatprep.mubr.bf16.mxu0 %v4669_v31 }
 0x3b7   : > { %v7084_v63 = vpop.eup %7083  ;;  %7103 = vrcp.f32 %v4446_v42  ;;  %v4448_v41 = vadd.f32 1.0, %v7082_v60  ;;  %4940 = vmatmul.mubr.bf16.gmra.mrb[112].mxu0 %v4668_v8 }
 0x3b8   : > { %v7086_v30 = vpop.eup %7085  ;;  %7105 = vrcp.f32 %v4447_v54  ;;  %v4449_v37 = vadd.f32 1.0, %v7084_v63 }
 0x3b9   : > { %v7088_v21 = vpop.eup %7087  ;;  %7107 = vrcp.f32 %v4448_v41  ;;  %v4634_v0 = vmul.f32 %v7086_v30, %v8939_v14 }
 0x3ba   : > { %v7090_v35 = vpop.eup %7089  ;;  %7109 = vrcp.f32 %v4449_v37  ;;  %v4635_v13 = vmul.f32 %v7088_v21, %v8940_v62 }
 0x3bb   : > { %v7092_v45 = vpop.eup %7091  ;;  %v4670_v6 = vpack.c.bf16 %v4634_v0, %v4632_v55  ;;  %v4636_v24 = vmul.f32 %v7090_v35, %v8654_v52  ;;  %7111 = vtanh.f32 %v8941_v17 }
 0x3bc   : > { %v7094_v10 = vpop.eup %7093  ;;  %v4671_v36 = vpack.c.bf16 %v4635_v13, %v4633_v25  ;;  %v4637_v22 = vmul.f32 %v7092_v45, %v8674_v11  ;;  %7113 = vtanh.f32 %v8942_v4 }
 0x3bd   : > { %v7096_v18 = vpop.eup %7095  ;;  %v4450_v16 = vadd.f32 1.0, %v7094_v10 }
 0x3be   : > { %v7098_v32 = vpop.eup %7097  ;;  %v4451_v51 = vadd.f32 1.0, %v7096_v18  ;;  %4947 = vmatprep.mubr.bf16.mxu0 %v4671_v36 }
 0x3bf   : > { %v7100_v61 = vpop.eup %7099  ;;  %7115 = vrcp.f32 %v4450_v16  ;;  %4948 = vmatmul.mubr.bf16.gmra.mrb[116].mxu0 %v4670_v6 }
 0x3c0   : > { %v7102_v47 = vpop.eup %7101  ;;  %7117 = vrcp.f32 %v4451_v51 }
 0x3c1   : > { %v7104_v59 = vpop.eup %7103 }
 0x3c2   : > { %v7106_v52 = vpop.eup %7105  ;;  %v4638_v53 = vmul.f32 %v7104_v59, %v8693_v58 }
 0x3c3   : > { %v7108_v39 = vpop.eup %7107  ;;  %v4639_v11 = vmul.f32 %v7106_v52, %v7098_v32 }
 0x3c4   : > { %v7110_v56 = vpop.eup %7109  ;;  %v4672_v43 = vpack.c.bf16 %v4638_v53, %v4636_v24  ;;  %v4640_v15 = vmul.f32 %v7108_v39, %v7100_v61 }
 0x3c5   : > { %v4673_v48 = vpack.c.bf16 %v4639_v11, %v4637_v22  ;;  %v4641_v50 = vmul.f32 %v7110_v56, %v7102_v47  ;;  %v7112_v34 = vpop.eup %7111 }
 0x3c6   : > { %v7114_v7 = vpop.eup %7113 }
 0x3c7   : > { %4955 = vmatprep.mubr.bf16.mxu0 %v4673_v48 }
 0x3c8   : > { %4956 = vmatmul.mubr.bf16.gmra.mrb[120].mxu0 %v4672_v43 }
 0x3c9   : > { %v7116_v28 = vpop.eup %7115 }
 0x3ca   : > { %v7118_v1 = vpop.eup %7117  ;;  %v4642_v19 = vmul.f32 %v7116_v28, %v7112_v34 }
 0x3cb   : > { %v4643_v3 = vmul.f32 %v7118_v1, %v7114_v7 }
 0x3cc   : > { %v4674_v49 = vpack.c.bf16 %v4642_v19, %v4640_v15 }
 0x3cd   : > { %v4675_v33 = vpack.c.bf16 %v4643_v3, %v4641_v50 }
 0x3cf   : > { %4963 = vmatprep.mubr.bf16.mxu0 %v4675_v33 }
 0x3d0   : > { %4964 = vmatmul.mubr.bf16.gmra.mrb[124].mxu0 %v4674_v49 }
 0x425   : > { %v5634_v58 = vpop.f32.mrb[64].mxu0 }
 0x426   : > { %v5635_v26 = vpop.f32.mrb[65].mxu0 }
 0x427   : > { %v5636_v46 = vadd.f32 %v5635_v26, %v5634_v58  ;;  %v5637_v9 = vpop.f32.mrb[66].mxu0 }
 0x428   : > { %v5638_v2 = vpop.f32.mrb[67].mxu0 }
 0x429   : > { %v5639_v20 = vadd.f32 %v5638_v2, %v5637_v9  ;;  %v4846_v27 = vadd.f32 %v5636_v46, %v8762_v57 }
 0x42b   : > { %4972 = vxpose.xlu0.b32.start [1/16] (narrow) %v4846_v27, 8  ;;  %v4849_v40 = vadd.f32 %v5639_v20, %v8762_v57 }
 0x42d   : > { %v5640_v8 = vpop.f32.mrb[68].mxu0 }
 0x42e   : > { %v5641_v55 = vpop.f32.mrb[69].mxu0 }
 0x42f   : > { %v5642_v12 = vadd.f32 %v5641_v55, %v5640_v8  ;;  %v5643_v44 = vpop.f32.mrb[70].mxu0  ;;  %4973 = vxpose.xlu0.b32.cont [2/16] (narrow) %v4849_v40, 8 }
 0x430   : > { %v5644_v31 = vpop.f32.mrb[71].mxu0 }
 0x431   : > { %v5645_v5 = vadd.f32 %v5644_v31, %v5643_v44  ;;  %v4854_v25 = vadd.f32 %v5642_v12, %v8762_v57 }
 0x433   : > { %4974 = vxpose.xlu0.b32.cont [3/16] (narrow) %v4854_v25, 8  ;;  %v4857_v29 = vadd.f32 %v5645_v5, %v8762_v57 }
 0x436   : > { %v5646_v23 = vpop.f32.mrb[72].mxu0 }
 0x437   : > { %v5647_v42 = vpop.f32.mrb[73].mxu0  ;;  %4975 = vxpose.xlu0.b32.cont [4/16] (narrow) %v4857_v29, 8 }
 0x438   : > { %v5648_v60 = vadd.f32 %v5647_v42, %v5646_v23  ;;  %v5649_v38 = vpop.f32.mrb[74].mxu0 }
 0x439   : > { %v5650_v54 = vpop.f32.mrb[75].mxu0 }
 0x43a   : > { %v5651_v63 = vadd.f32 %v5650_v54, %v5649_v38  ;;  %v4862_v41 = vadd.f32 %v5648_v60, %v8762_v57 }
 0x43c   : > { %4976 = vxpose.xlu0.b32.cont [5/16] (narrow) %v4862_v41, 8  ;;  %v4865_v30 = vadd.f32 %v5651_v63, %v8762_v57 }
 0x440   : > { %v5652_v37 = vpop.f32.mrb[76].mxu0  ;;  %4977 = vxpose.xlu0.b32.cont [6/16] (narrow) %v4865_v30, 8 }
 0x441   : > { %v5653_v21 = vpop.f32.mrb[77].mxu0 }
 0x442   : > { %v5654_v14 = vadd.f32 %v5653_v21, %v5652_v37  ;;  %v5655_v0 = vpop.f32.mrb[78].mxu0 }
 0x443   : > { %v5656_v35 = vpop.f32.mrb[79].mxu0 }
 0x444   : > { %v5657_v62 = vadd.f32 %v5656_v35, %v5655_v0  ;;  %v4870_v13 = vadd.f32 %v5654_v14, %v8762_v57 }
 0x446   : > { %4978 = vxpose.xlu0.b32.cont [7/16] (narrow) %v4870_v13, 8  ;;  %v4873_v6 = vadd.f32 %v5657_v62, %v8762_v57 }
 0x448   : > { %v5658_v45 = vpop.f32.mrb[80].mxu0 }
 0x449   : > { %v5659_v24 = vpop.f32.mrb[81].mxu0 }
 0x44a   : > { %v5660_v10 = vadd.f32 %v5659_v24, %v5658_v45  ;;  %v5661_v36 = vpop.f32.mrb[82].mxu0  ;;  %4979 = vxpose.xlu0.b32.cont [8/16] (narrow) %v4873_v6, 8 }
 0x44b   : > { %v5662_v22 = vpop.f32.mrb[83].mxu0 }
 0x44c   : > { %v5663_v18 = vadd.f32 %v5662_v22, %v5661_v36  ;;  %v4878_v17 = vadd.f32 %v5660_v10, %v8762_v57 }
 0x44e   : > { %4980 = vxpose.xlu0.b32.cont [9/16] (narrow) %v4878_v17, 8  ;;  %v4881_v32 = vadd.f32 %v5663_v18, %v8762_v57 }
 0x450   : > { %v5664_v16 = vpop.f32.mrb[84].mxu0 }
 0x451   : > { %v5665_v4 = vpop.f32.mrb[85].mxu0 }
 0x452   : > { %v5666_v51 = vadd.f32 %v5665_v4, %v5664_v16  ;;  %v5667_v61 = vpop.f32.mrb[86].mxu0  ;;  %4981 = vxpose.xlu0.b32.cont [10/16] (narrow) %v4881_v32, 8 }
 0x453   : > { %v5668_v47 = vpop.f32.mrb[87].mxu0 }
 0x454   : > { %v5669_v59 = vadd.f32 %v5668_v47, %v5667_v61  ;;  %v4886_v52 = vadd.f32 %v5666_v51, %v8762_v57 }
 0x456   : > { %4982 = vxpose.xlu0.b32.cont [11/16] (narrow) %v4886_v52, 8  ;;  %v4889_v39 = vadd.f32 %v5669_v59, %v8762_v57 }
 0x458   : > { %v5670_v53 = vpop.f32.mrb[88].mxu0 }
 0x459   : > { %v5671_v11 = vpop.f32.mrb[89].mxu0 }
 0x45a   : > { %v5672_v56 = vadd.f32 %v5671_v11, %v5670_v53  ;;  %v5673_v43 = vpop.f32.mrb[90].mxu0  ;;  %4983 = vxpose.xlu0.b32.cont [12/16] (narrow) %v4889_v39, 8 }
 0x45b   : > { %v5674_v15 = vpop.f32.mrb[91].mxu0 }
 0x45c   : > { %v5675_v48 = vadd.f32 %v5674_v15, %v5673_v43  ;;  %v4894_v50 = vadd.f32 %v5672_v56, %v8762_v57 }
 0x45e   : > { %4984 = vxpose.xlu0.b32.cont [13/16] (narrow) %v4894_v50, 8  ;;  %v4897_v7 = vadd.f32 %v5675_v48, %v8762_v57 }
 0x460   : > { %v5676_v34 = vpop.f32.mrb[92].mxu0 }
 0x461   : > { %v5677_v28 = vpop.f32.mrb[93].mxu0 }
 0x462   : > { %v5678_v1 = vadd.f32 %v5677_v28, %v5676_v34  ;;  %v5679_v19 = vpop.f32.mrb[94].mxu0  ;;  %4985 = vxpose.xlu0.b32.cont [14/16] (narrow) %v4897_v7, 8 }
 0x463   : > { %v5680_v3 = vpop.f32.mrb[95].mxu0 }
 0x464   : > { %v5681_v49 = vadd.f32 %v5680_v3, %v5679_v19  ;;  %v4902_v33 = vadd.f32 %v5678_v1, %v8762_v57 }
 0x466   : > { %4986 = vxpose.xlu0.b32.cont [15/16] (narrow) %v4902_v33, 8  ;;  %v4905_v58 = vadd.f32 %v5681_v49, %v8762_v57 }
 0x469   : > { %v5682_v26 = vpop.f32.mrb[96].mxu0 }
 0x46a   : > { %v5683_v46 = vpop.f32.mrb[97].mxu0  ;;  %4987 = vxpose.xlu0.b32.end [16/16] (narrow) %v4905_v58, 8 }
 0x46b   : > { %v5684_v9 = vadd.f32 %v5683_v46, %v5682_v26  ;;  %v5685_v2 = vpop.f32.mrb[98].mxu0 }
 0x46c   : > { %v5686_v20 = vpop.f32.mrb[99].mxu0 }
 0x46d   : > { %v5687_v27 = vadd.f32 %v5686_v20, %v5685_v2  ;;  %v4910_v8 = vadd.f32 %v5684_v9, %v8762_v57 }
 0x46f   : > { %5004 = vxpose.xlu1.b32.start [1/16] (narrow) %v4910_v8, 8  ;;  %v4913_v55 = vadd.f32 %v5687_v27, %v8762_v57 }
 0x471   : > { %v5688_v40 = vpop.f32.mrb[100].mxu0 }
 0x472   : > { %v5689_v12 = vpop.f32.mrb[101].mxu0 }
 0x473   : > { %v5690_v44 = vadd.f32 %v5689_v12, %v5688_v40  ;;  %v5691_v31 = vpop.f32.mrb[102].mxu0  ;;  %5005 = vxpose.xlu1.b32.cont [2/16] (narrow) %v4913_v55, 8 }
 0x474   : > { %v5692_v5 = vpop.f32.mrb[103].mxu0 }
 0x475   : > { %v5693_v25 = vadd.f32 %v5692_v5, %v5691_v31  ;;  %v4918_v29 = vadd.f32 %v5690_v44, %v8762_v57 }
 0x477   : > { %5006 = vxpose.xlu1.b32.cont [3/16] (narrow) %v4918_v29, 8  ;;  %v4921_v42 = vadd.f32 %v5693_v25, %v8762_v57 }
 0x479   : > { %v5694_v23 = vpop.f32.mrb[104].mxu0 }
 0x47a   : > { %v5695_v60 = vpop.f32.mrb[105].mxu0 }
 0x47b   : > { %v5696_v38 = vadd.f32 %v5695_v60, %v5694_v23  ;;  %v5697_v54 = vpop.f32.mrb[106].mxu0  ;;  %5007 = vxpose.xlu1.b32.cont [4/16] (narrow) %v4921_v42, 8 }
 0x47c   : > { %v5698_v63 = vpop.f32.mrb[107].mxu0 }
 0x47d   : > { %v5699_v41 = vadd.f32 %v5698_v63, %v5697_v54  ;;  %v4926_v30 = vadd.f32 %v5696_v38, %v8762_v57 }
 0x47f   : > { %5008 = vxpose.xlu1.b32.cont [5/16] (narrow) %v4926_v30, 8  ;;  %v4929_v37 = vadd.f32 %v5699_v41, %v8762_v57 }
 0x482   : > { %v5700_v21 = vpop.f32.mrb[108].mxu0 }
 0x483   : > { %v5701_v14 = vpop.f32.mrb[109].mxu0  ;;  %5009 = vxpose.xlu1.b32.cont [6/16] (narrow) %v4929_v37, 8 }
 0x484   : > { %v5702_v0 = vadd.f32 %v5701_v14, %v5700_v21  ;;  %v5703_v35 = vpop.f32.mrb[110].mxu0 }
 0x485   : > { %v5704_v62 = vpop.f32.mrb[111].mxu0 }
 0x486   : > { %v5705_v13 = vadd.f32 %v5704_v62, %v5703_v35  ;;  %v4934_v45 = vadd.f32 %v5702_v0, %v8762_v57 }
 0x488   : > { %5010 = vxpose.xlu1.b32.cont [7/16] (narrow) %v4934_v45, 8  ;;  %v4937_v24 = vadd.f32 %v5705_v13, %v8762_v57 }
 0x48a   : > { %v5706_v6 = vpop.f32.mrb[112].mxu0 }
 0x48b   : > { %v5707_v10 = vpop.f32.mrb[113].mxu0 }
 0x48c   : > { %v5708_v36 = vadd.f32 %v5707_v10, %v5706_v6  ;;  %v5709_v22 = vpop.f32.mrb[114].mxu0  ;;  %5011 = vxpose.xlu1.b32.cont [8/16] (narrow) %v4937_v24, 8 }
 0x48d   : > { %v5710_v18 = vpop.f32.mrb[115].mxu0 }
 0x48e   : > { %v5711_v17 = vadd.f32 %v5710_v18, %v5709_v22  ;;  %v4942_v16 = vadd.f32 %v5708_v36, %v8762_v57 }
 0x490   : > { %5012 = vxpose.xlu1.b32.cont [9/16] (narrow) %v4942_v16, 8  ;;  %v4945_v4 = vadd.f32 %v5711_v17, %v8762_v57 }
 0x492   : > { %v5712_v32 = vpop.f32.mrb[116].mxu0 }
 0x493   : > { %v5713_v51 = vpop.f32.mrb[117].mxu0 }
 0x494   : > { %v5714_v61 = vadd.f32 %v5713_v51, %v5712_v32  ;;  %v5715_v47 = vpop.f32.mrb[118].mxu0  ;;  %5013 = vxpose.xlu1.b32.cont [10/16] (narrow) %v4945_v4, 8 }
 0x495   : > { %v5716_v59 = vpop.f32.mrb[119].mxu0 }
 0x496   : > { %v5717_v52 = vadd.f32 %v5716_v59, %v5715_v47  ;;  %v4950_v53 = vadd.f32 %v5714_v61, %v8762_v57 }
 0x498   : > { %5014 = vxpose.xlu1.b32.cont [11/16] (narrow) %v4950_v53, 8  ;;  %v4953_v39 = vadd.f32 %v5717_v52, %v8762_v57 }
 0x49b   : > { %v5718_v11 = vpop.f32.mrb[120].mxu0 }
 0x49c   : > { %v5719_v56 = vpop.f32.mrb[121].mxu0  ;;  %5015 = vxpose.xlu1.b32.cont [12/16] (narrow) %v4953_v39, 8 }
 0x49d   : > { %v5720_v43 = vadd.f32 %v5719_v56, %v5718_v11  ;;  %v5721_v15 = vpop.f32.mrb[122].mxu0 }
 0x49e   : > { %v5722_v48 = vpop.f32.mrb[123].mxu0 }
 0x49f   : > { %v5723_v50 = vadd.f32 %v5722_v48, %v5721_v15  ;;  %v4958_v34 = vadd.f32 %v5720_v43, %v8762_v57 }
 0x4a1   : > { %5016 = vxpose.xlu1.b32.cont [13/16] (narrow) %v4958_v34, 8  ;;  %v4961_v28 = vadd.f32 %v5723_v50, %v8762_v57 }
 0x4a3   : > { %v5724_v7 = vpop.f32.mrb[124].mxu0 }
 0x4a4   : > { %v5725_v1 = vpop.f32.mrb[125].mxu0 }
 0x4a5   : > { %v5726_v19 = vadd.f32 %v5725_v1, %v5724_v7  ;;  %v5727_v3 = vpop.f32.mrb[126].mxu0  ;;  %5017 = vxpose.xlu1.b32.cont [14/16] (narrow) %v4961_v28, 8 }
 0x4a6   : > { %v5728_v49 = vpop.f32.mrb[127].mxu0 }
 0x4a7   : > { %v5729_v33 = vadd.f32 %v5728_v49, %v5727_v3  ;;  %v4966_v58 = vadd.f32 %v5726_v19, %v8762_v57 }
 0x4a9   : > { %5018 = vxpose.xlu1.b32.cont [15/16] (narrow) %v4966_v58, 8  ;;  %v4969_v26 = vadd.f32 %v5729_v33, %v8762_v57 }
 0x4ad   : > { %5019 = vxpose.xlu1.b32.end [16/16] (narrow) %v4969_v26, 8 }
 0x4ae   : > { %v4988_v46 = vpop.trf.xlu0 }
 0x4af   : > { %5036 = vst [vmem:[%s258_s29] sm:$0xff] %v4988_v46 }
 0x4f1   : > { %v5020_v9 = vpop.trf.xlu1 }
 0x4f2   : > { %5037 = vst [vmem:[%s258_s29 + $0x8] sm:$0xff] %v5020_v9 }
 0x4f3   : > { %7190 = shalt.err (!%p7187_p7)
}
 0x4f4   : > { %s7191_s23 = scalar_lea.hbm %s8803_s27, 256  ;;  %s7195_s7 = scalar_lea.hbm %s8850_s5, 512 }
 0x4f5   : > { %p7192_p9 = scmp.ne.s32.totalorder %s8803_s27, %s7191_s23  ;;  %p7196_p5 = scmp.lt.u32.totalorder %s8803_s27, %s8850_s5 }
 0x4f6   : > { %p7197_p11 = scmp.lt.u32.totalorder %s7195_s7, %s7191_s23  ;;  %p7199_p4 = scmp.lt.u32.totalorder %s7191_s23, %s8803_s27 }
 0x4f7   : > { %p7193_p2 = pnand %p7192_p9, %p7377_p12 }
 0x4f8   : > { %p7198_p1 = por %p7197_p11, %p7196_p5 }
 0x4f9   : > { %p7194_p0 = pneg %p7193_p2 }
 0x4fa   : > { %p7200_p6 = por %p7199_p4, %p7198_p1 }
 0x4fc   : > { %p7201_p8 = pnand %p7200_p6, %p7194_p0 }
 0x4fe   : > { %7204 = shalt.err (!%p7201_p8)
}
 0x4ff   : > { %6280 = dma.vmem_to_hbm [thread:$0]  (%p7377_p12), %s8798_s13, 256, %s8803_s27, %s5039_s11  }
 0x500 PF: > { %s5065_s29 = sand.u32 1, %s7235_s18   ;;  %p8943_p10 = scmp.ne.s32.totalorder %s8859_s25, 0 }
 0x501   : > { %p8944_p13 = scmp.ge.s32.totalorder %s7247_s21, 2  ;;  %s5066_s28 = scalar_lea.sflag [#allocation4], %s5065_s29 }
 0x503   : > { %p6291_p3 = pnand %p8944_p13, %p8943_p10 }
 0x505   : > { %7230 = dma.done.wait (!%p6291_p3), %s5066_s28, 256  }
 0x506   : > { %7232 = vsyncadd (!%p6291_p3), %s5066_s28, 4294967040  ;;  %p19_p7 = scmp.ge.s32.totalorder %s7342_s30, 4   ;;  %s8945_s18 = smov %s7239_s19 }
 0x507   : > { %s8946_s19 = smov %s7243_s20  ;;  %s8947_s20 = smov %s7373_s8 }
 0x508   : > { %s8948_s21 = smov %s7342_s30  ;;  %21 = sbr.rel (!%p19_p7) target bundleno = 6 (0x6), region = 89 }
 0x50f   :  { %5071 = vsyncpa [#allocation3], 1 }
 0x510   :  { %5073 = vsyncpa [#allocation3 + $0x1], 1 }
 0x511   :  { %5074 = vsyncpa [#allocation6], 1 }
 0x512   :  { %5075 = vsyncpa [#allocation4], 1 }
 0x513   :  { %5077 = vsyncpa [#allocation4 + $0x1], 1 }

</bundles_post_ra>
